<compile_context>
chip_gen: v6e
topology: v6e:2x2x1
jax: 0.10.0
libtpu: 0.0.40
codegen_flags: <defaults>
</compile_context>

<pallas_src>
import jax
import jax.numpy as jnp
from jax import lax
from jax.experimental import pallas as pl
from jax.experimental.pallas import tpu as pltpu


# Geometry implied by fc1 = Linear(64*2*2, 128): 32x32 spatial input.
_H1, _C1, _OC1 = 32, 3, 32      # conv1: 32x32x3 -> 30x30x32 -> pool -> 15x15x32
_H2, _C2, _OC2 = 15, 32, 64     # conv2: 15x15x32 -> 13x13x64 -> pool -> 6x6x64
_H3, _C3, _OC3 = 6, 64, 64      # conv3: 6x6x64  -> 4x4x64   -> pool -> 2x2x64
_FC1_OUT, _FC2_OUT = 128, 10


# ----------------------------------------------------------------------------
# In-kernel building block: 3x3 valid conv + bias + ReLU + 2x2 max-pool
# ----------------------------------------------------------------------------

def _conv_relu_pool(read_row, w_ref, b_ref, dst_ref, h, wd, oc):
    """One sample: 3x3 conv (stride 1, valid) + bias + ReLU + 2x2/2 max-pool.

    read_row(start, size) -> (size, C) contiguous slab of the flat (H*W, C)
    activation (channels on lanes).  w_ref: (9, C, OC) taps (i*3+j order),
    b_ref: (1, OC), dst_ref: (HP*WP, OC) destination in VMEM.
    """
    ohh, oww = h - 2, wd - 2          # conv output spatial dims
    ohp, owp = ohh // 2, oww // 2     # pooled output spatial dims
    span = wd + oww                   # rows covering TWO adjacent conv rows

    # Constant 0/1 selection matrices: pick the four 2x2-window elements out
    # of the span-long "full coordinate" conv slab (pool decimation as MXU
    # matmuls -> no strided slicing / reshapes in the kernel).
    ri = lax.broadcasted_iota(jnp.int32, (owp, span), 0)
    ci = lax.broadcasted_iota(jnp.int32, (owp, span), 1)
    sel = [
        (ci == 2 * ri).astype(jnp.float32),            # (2r,   2c)
        (ci == 2 * ri + 1).astype(jnp.float32),        # (2r,   2c+1)
        (ci == wd + 2 * ri).astype(jnp.float32),       # (2r+1, 2c)
        (ci == wd + 2 * ri + 1).astype(jnp.float32),   # (2r+1, 2c+1)
    ]
    bias = b_ref[...]                                  # (1, OC)

    def pooled_row(r, carry):
        start0 = 2 * r * wd
        acc = jnp.zeros((span, oc), jnp.float32)
        for t in range(9):                             # 3x3 taps, unrolled
            i, j = t // 3, t % 3
            xs = read_row(start0 + i * wd + j, span)   # (span, C)
            acc = acc + jnp.dot(xs, w_ref[t],
                                preferred_element_type=jnp.float32)
        acc = jnp.maximum(acc + bias, 0.0)             # bias + ReLU (f32)
        pooled = jnp.maximum(
            jnp.maximum(
                jnp.dot(sel[0], acc, preferred_element_type=jnp.float32),
                jnp.dot(sel[1], acc, preferred_element_type=jnp.float32)),
            jnp.maximum(
                jnp.dot(sel[2], acc, preferred_element_type=jnp.float32),
                jnp.dot(sel[3], acc, preferred_element_type=jnp.float32)))
        dst_ref[pl.ds(r * owp, owp), :] = pooled       # (WP, OC) rows
        return carry

    lax.fori_loop(0, ohp, pooled_row, 0)


# ----------------------------------------------------------------------------
# Whole-network kernel (one grid step == one sample)
# ----------------------------------------------------------------------------

def _simple_cnn_kernel(x_ref, w1_ref, b1_ref, w2_ref, b2_ref, w3_ref, b3_ref,
                       fw1_ref, fb1_ref, fw2_ref, fb2_ref, o_ref,
                       s1_ref, s2_ref, s3_ref):
    # conv1 + ReLU + pool : (32*32, 3)  -> (15*15, 32)   (stays in VMEM)
    _conv_relu_pool(lambda st, sz: x_ref[pl.ds(st, sz), :],
                    w1_ref, b1_ref, s1_ref, _H1, _H1, _OC1)
    # conv2 + ReLU + pool : (15*15, 32) -> (6*6, 64)
    _conv_relu_pool(lambda st, sz: s1_ref[pl.ds(st, sz), :],
                    w2_ref, b2_ref, s2_ref, _H2, _H2, _OC2)
    # conv3 + ReLU + pool : (6*6, 64)   -> (2*2, 64)
    _conv_relu_pool(lambda st, sz: s2_ref[pl.ds(st, sz), :],
                    w3_ref, b3_ref, s3_ref, _H3, _H3, _OC3)

    # fc1 (+ReLU) and fc2 fused.  fw1 is pre-packed as (4, 64, 128) so the
    # PyTorch channel-major view(-1, 256) is folded into the weight layout.
    hvec = fb1_ref[...]                                # (1, 128)
    for s in range(4):                                 # 4 spatial positions
        hvec = hvec + jnp.dot(s3_ref[pl.ds(s, 1), :], fw1_ref[s],
                              preferred_element_type=jnp.float32)
    hvec = jnp.maximum(hvec, 0.0)
    # TODO(synk): nn.Dropout(0.25) is identity in eval(); training-mode random
    #             masking intentionally not implemented.
    logits = jnp.dot(hvec, fw2_ref[...],
                     preferred_element_type=jnp.float32) + fb2_ref[...]
    o_ref[0] = logits.astype(o_ref.dtype)              # (1, 10)


# ----------------------------------------------------------------------------
# Host-side wrappers
# ----------------------------------------------------------------------------

def prepare_params(params):
    """One-time re-layout of PyTorch-style parameters into kernel layouts."""
    def conv_w(w):                                     # (OC, IC, 3, 3) -> (9, IC, OC)
        oc, ic, kh, kw = w.shape
        return jnp.transpose(w, (2, 3, 1, 0)).reshape(kh * kw, ic, oc)

    # fc1 columns are indexed c*4 + s (torch channel-major flatten); re-key to
    # the kernel's (spatial s, channel c) pooled-activation layout.
    fw1 = jnp.transpose(params['fc1_w'].reshape(_FC1_OUT, _OC3, 4), (2, 1, 0))
    return {
        'w1': conv_w(params['conv1_w']), 'b1': params['conv1_b'].reshape(1, -1),
        'w2': conv_w(params['conv2_w']), 'b2': params['conv2_b'].reshape(1, -1),
        'w3': conv_w(params['conv3_w']), 'b3': params['conv3_b'].reshape(1, -1),
        'fw1': fw1, 'fb1': params['fc1_b'].reshape(1, -1),
        'fw2': params['fc2_w'].T, 'fb2': params['fc2_b'].reshape(1, -1),
    }


def simple_cnn_forward(prep, x_nchw):
    n = x_nchw.shape[0]
    # NCHW -> NHWC -> flat (N*H*W, C): channels on lanes, flat spatial rows on
    # sublanes (the reshape is a free row-major view).
    x = jnp.transpose(x_nchw, (0, 2, 3, 1)).reshape(n * _H1 * _H1, _C1)

    full2 = lambda i: (0, 0)
    full3 = lambda i: (0, 0, 0)
    out = pl.pallas_call(
        _simple_cnn_kernel,
        out_shape=jax.ShapeDtypeStruct((n, 1, _FC2_OUT), jnp.float32),
        grid_spec=pltpu.PrefetchScalarGridSpec(
            num_scalar_prefetch=0,
            grid=(n,),                                        # one program / sample
            in_specs=[
                pl.BlockSpec((_H1 * _H1, _C1), lambda i: (i, 0)),   # x sample slab
                pl.BlockSpec((9, _C1, _OC1), full3),                # conv1 w
                pl.BlockSpec((1, _OC1), full2),                     # conv1 b
                pl.BlockSpec((9, _C2, _OC2), full3),                # conv2 w
                pl.BlockSpec((1, _OC2), full2),                     # conv2 b
                pl.BlockSpec((9, _C3, _OC3), full3),                # conv3 w
                pl.BlockSpec((1, _OC3), full2),                     # conv3 b
                pl.BlockSpec((4, _OC3, _FC1_OUT), full3),           # fc1 w
                pl.BlockSpec((1, _FC1_OUT), full2),                 # fc1 b
                pl.BlockSpec((_FC1_OUT, _FC2_OUT), full2),          # fc2 w
                pl.BlockSpec((1, _FC2_OUT), full2),                 # fc2 b
            ],
            out_specs=pl.BlockSpec((1, 1, _FC2_OUT), lambda i: (i, 0, 0)),
            scratch_shapes=[
                pltpu.VMEM((15 * 15, _OC1), jnp.float32),   # pooled conv1 act
                pltpu.VMEM((6 * 6, _OC2), jnp.float32),     # pooled conv2 act
                pltpu.VMEM((2 * 2, _OC3), jnp.float32),     # pooled conv3 act
            ],
        ),
        compiler_params=pltpu.CompilerParams(
            dimension_semantics=("parallel",)),   # batch axis -> both TCs on v7x
    )(x, prep['w1'], prep['b1'], prep['w2'], prep['b2'], prep['w3'], prep['b3'],
      prep['fw1'], prep['fb1'], prep['fw2'], prep['fb2'])
    return out.reshape(n, _FC2_OUT)


# ----------------------------------------------------------------------------
# Pure-JAX (XLA) reference of the PyTorch forward, for validation only
# ----------------------------------------------------------------------------

def reference_forward(params, x_nchw):
    def conv_relu(x, w, b):                  # x NHWC, w (OC, IC, 3, 3)
        y = lax.conv_general_dilated(
            x, jnp.transpose(w, (2, 3, 1, 0)), window_strides=(1, 1),
            padding='VALID', dimension_numbers=('NHWC', 'HWIO', 'NHWC'))
        return jnp.maximum(y + b, 0.0)

    def pool(x):
        return lax.reduce_window(x, -jnp.inf, lax.max,
                                 (1, 2, 2, 1), (1, 2, 2, 1), 'VALID')

    x = jnp.transpose(x_nchw, (0, 2, 3, 1))
    x = pool(conv_relu(x, params['conv1_w'], params['conv1_b']))
    x = pool(conv_relu(x, params['conv2_w'], params['conv2_b']))
    x = pool(conv_relu(x, params['conv3_w'], params['conv3_b']))
    x = jnp.transpose(x, (0, 3, 1, 2)).reshape(x.shape[0], -1)   # torch .view
    x = jnp.maximum(x @ params['fc1_w'].T + params['fc1_b'], 0.0)
    return x @ params['fc2_w'].T + params['fc2_b']


# ----------------------------------------------------------------------------
# Deterministic parameter init (PyTorch-style uniform(-1/sqrt(fan_in), ...))
# ----------------------------------------------------------------------------

def init_params(key):
    ks = jax.random.split(key, 10)

    def u(k, shape, fan_in):
        bound = 1.0 / float(fan_in) ** 0.5
        return jax.random.uniform(k, shape, jnp.float32, -bound, bound)

    return {
        'conv1_w': u(ks[0], (32, 3, 3, 3), 3 * 3 * 3),
        'conv1_b': u(ks[1], (32,), 3 * 3 * 3),
        'conv2_w': u(ks[2], (64, 32, 3, 3), 32 * 3 * 3),
        'conv2_b': u(ks[3], (64,), 32 * 3 * 3),
        'conv3_w': u(ks[4], (64, 64, 3, 3), 64 * 3 * 3),
        'conv3_b': u(ks[5], (64,), 64 * 3 * 3),
        'fc1_w': u(ks[6], (128, 64 * 2 * 2), 64 * 2 * 2),
        'fc1_b': u(ks[7], (128,), 64 * 2 * 2),
        'fc2_w': u(ks[8], (10, 128), 128),
        'fc2_b': u(ks[9], (10,), 128),
    }


if __name__ == "__main__":
    key = jax.random.PRNGKey(0)
    pkey, xkey = jax.random.split(key)
    params = init_params(pkey)
    prep = prepare_params(params)          # one-time weight re-layout

    # fc1 = Linear(64*2*2, 128) implies 32x32 spatial input (CIFAR-like):
    # 32 -conv3x3-> 30 -pool-> 15 -conv-> 13 -pool-> 6 -conv-> 4 -pool-> 2
    x = jax.random.normal(xkey, (2, 3, 32, 32), jnp.float32)

    fwd = jax.jit(simple_cnn_forward)
    out = jax.block_until_ready(fwd(prep, x))
    assert out.shape == (2, 10), out.shape

    # Validate against the pure-JAX reference of the PyTorch forward.
    ref = reference_forward(params, x)
    err = float(jnp.max(jnp.abs(out - ref)))
    assert err < 1e-3, f"max abs error vs reference: {err}"

    print("KERNEL_OK")
</pallas_src>

<mosaic_0001>
module attributes {stable_mosaic.version = 11 : i64} {
  func.func @_simple_cnn_kernel(%arg0: i32, %arg1: memref<1024x3xf32, #tpu.memory_space<vmem>>, %arg2: memref<9x3x32xf32, #tpu.memory_space<vmem>>, %arg3: memref<1x32xf32, #tpu.memory_space<vmem>>, %arg4: memref<9x32x64xf32, #tpu.memory_space<vmem>>, %arg5: memref<1x64xf32, #tpu.memory_space<vmem>>, %arg6: memref<9x64x64xf32, #tpu.memory_space<vmem>>, %arg7: memref<1x64xf32, #tpu.memory_space<vmem>>, %arg8: memref<4x64x128xf32, #tpu.memory_space<vmem>>, %arg9: memref<1x128xf32, #tpu.memory_space<vmem>>, %arg10: memref<128x10xf32, #tpu.memory_space<vmem>>, %arg11: memref<1x10xf32, #tpu.memory_space<vmem>>, %arg12: memref<1x1x10xf32, #tpu.memory_space<vmem>>, %arg13: memref<225x32xf32, #tpu.memory_space<vmem>>, %arg14: memref<36x64xf32, #tpu.memory_space<vmem>>, %arg15: memref<4x64xf32, #tpu.memory_space<vmem>>) attributes {dimension_semantics = [#tpu.dimension_semantics<parallel>], iteration_bounds = array<i64: 2>, scalar_prefetch = 0 : i64, scratch_operands = 3 : i64, tpu.core_type = #tpu.core_type<tc>, window_params = [{transform_indices = @transform_0, window_bounds = array<i64: 1024, 3>}, {pipeline_mode = #tpu.pipeline_mode<synchronous>, transform_indices = @transform_1, window_bounds = array<i64: 9, 3, 32>}, {pipeline_mode = #tpu.pipeline_mode<synchronous>, transform_indices = @transform_2, window_bounds = array<i64: 1, 32>}, {pipeline_mode = #tpu.pipeline_mode<synchronous>, transform_indices = @transform_3, window_bounds = array<i64: 9, 32, 64>}, {pipeline_mode = #tpu.pipeline_mode<synchronous>, transform_indices = @transform_4, window_bounds = array<i64: 1, 64>}, {pipeline_mode = #tpu.pipeline_mode<synchronous>, transform_indices = @transform_5, window_bounds = array<i64: 9, 64, 64>}, {pipeline_mode = #tpu.pipeline_mode<synchronous>, transform_indices = @transform_6, window_bounds = array<i64: 1, 64>}, {pipeline_mode = #tpu.pipeline_mode<synchronous>, transform_indices = @transform_7, window_bounds = array<i64: 4, 64, 128>}, {pipeline_mode = #tpu.pipeline_mode<synchronous>, transform_indices = @transform_8, window_bounds = array<i64: 1, 128>}, {pipeline_mode = #tpu.pipeline_mode<synchronous>, transform_indices = @transform_9, window_bounds = array<i64: 128, 10>}, {pipeline_mode = #tpu.pipeline_mode<synchronous>, transform_indices = @transform_10, window_bounds = array<i64: 1, 10>}, {transform_indices = @transform_11, window_bounds = array<i64: 1, 1, 10>}]} {
    %0 = tpu.iota {dimensions = array<i32: 0>} : vector<15x62xi32>
    %1 = tpu.iota {dimensions = array<i32: 1>} : vector<15x62xi32>
    %c2_i32 = arith.constant 2 : i32
    %2 = vector.broadcast %c2_i32 : i32 to vector<15x62xi32>
    %3 = arith.muli %2, %0 : vector<15x62xi32>
    %4 = arith.cmpi eq, %1, %3 : vector<15x62xi32>
    %5 = arith.extui %4 : vector<15x62xi1> to vector<15x62xi32>
    %6 = arith.sitofp %5 : vector<15x62xi32> to vector<15x62xf32>
    %c2_i32_0 = arith.constant 2 : i32
    %7 = vector.broadcast %c2_i32_0 : i32 to vector<15x62xi32>
    %8 = arith.muli %7, %0 : vector<15x62xi32>
    %c1_i32 = arith.constant 1 : i32
    %9 = vector.broadcast %c1_i32 : i32 to vector<15x62xi32>
    %10 = arith.addi %8, %9 : vector<15x62xi32>
    %11 = arith.cmpi eq, %1, %10 : vector<15x62xi32>
    %12 = arith.extui %11 : vector<15x62xi1> to vector<15x62xi32>
    %13 = arith.sitofp %12 : vector<15x62xi32> to vector<15x62xf32>
    %c2_i32_1 = arith.constant 2 : i32
    %14 = vector.broadcast %c2_i32_1 : i32 to vector<15x62xi32>
    %15 = arith.muli %14, %0 : vector<15x62xi32>
    %c32_i32 = arith.constant 32 : i32
    %16 = vector.broadcast %c32_i32 : i32 to vector<15x62xi32>
    %17 = arith.addi %16, %15 : vector<15x62xi32>
    %18 = arith.cmpi eq, %1, %17 : vector<15x62xi32>
    %19 = arith.extui %18 : vector<15x62xi1> to vector<15x62xi32>
    %20 = arith.sitofp %19 : vector<15x62xi32> to vector<15x62xf32>
    %c2_i32_2 = arith.constant 2 : i32
    %21 = vector.broadcast %c2_i32_2 : i32 to vector<15x62xi32>
    %22 = arith.muli %21, %0 : vector<15x62xi32>
    %c32_i32_3 = arith.constant 32 : i32
    %23 = vector.broadcast %c32_i32_3 : i32 to vector<15x62xi32>
    %24 = arith.addi %23, %22 : vector<15x62xi32>
    %c1_i32_4 = arith.constant 1 : i32
    %25 = vector.broadcast %c1_i32_4 : i32 to vector<15x62xi32>
    %26 = arith.addi %24, %25 : vector<15x62xi32>
    %27 = arith.cmpi eq, %1, %26 : vector<15x62xi32>
    %28 = arith.extui %27 : vector<15x62xi1> to vector<15x62xi32>
    %29 = arith.sitofp %28 : vector<15x62xi32> to vector<15x62xf32>
    %c0 = arith.constant 0 : index
    %c0_5 = arith.constant 0 : index
    %30 = vector.load %arg3[%c0, %c0_5] : memref<1x32xf32, #tpu.memory_space<vmem>>, vector<1x32xf32>
    %c0_i32 = arith.constant 0 : i32
    %c15_i32 = arith.constant 15 : i32
    %31 = arith.addi %c0_i32, %c15_i32 : i32
    %c1_i32_6 = arith.constant 1 : i32
    scf.for %arg16 = %c0_i32 to %31 step %c1_i32_6  : i32 {
      %c2_i32_66 = arith.constant 2 : i32
      %126 = arith.muli %c2_i32_66, %arg16 : i32
      %c32_i32_67 = arith.constant 32 : i32
      %127 = arith.muli %126, %c32_i32_67 : i32
      %cst_68 = arith.constant 0.000000e+00 : f32
      %128 = vector.broadcast %cst_68 : f32 to vector<62x32xf32>
      %c0_i32_69 = arith.constant 0 : i32
      %129 = arith.addi %127, %c0_i32_69 : i32
      %c0_i32_70 = arith.constant 0 : i32
      %130 = arith.addi %129, %c0_i32_70 : i32
      %131 = arith.index_cast %130 : i32 to index
      %c0_71 = arith.constant 0 : index
      %132 = vector.load %arg1[%131, %c0_71] : memref<1024x3xf32, #tpu.memory_space<vmem>>, vector<62x3xf32>
      %c0_72 = arith.constant 0 : index
      %c0_73 = arith.constant 0 : index
      %c0_74 = arith.constant 0 : index
      %133 = vector.load %arg2[%c0_72, %c0_73, %c0_74] : memref<9x3x32xf32, #tpu.memory_space<vmem>>, vector<1x3x32xf32>
      %134 = vector.shape_cast %133 : vector<1x3x32xf32> to vector<3x32xf32>
      %cst_75 = arith.constant dense<0.000000e+00> : vector<62x32xf32>
      %135 = tpu.matmul %132, %134, %cst_75 {dimension_numbers = #tpu.dot_dimension_numbers<[1], [0], [0], [1], [0, 0, 1, 1], [], []>} : vector<62x3xf32>, vector<3x32xf32>, vector<62x32xf32> -> vector<62x32xf32>
      %136 = arith.addf %128, %135 : vector<62x32xf32>
      %c0_i32_76 = arith.constant 0 : i32
      %137 = arith.addi %127, %c0_i32_76 : i32
      %c1_i32_77 = arith.constant 1 : i32
      %138 = arith.addi %137, %c1_i32_77 : i32
      %139 = arith.index_cast %138 : i32 to index
      %c0_78 = arith.constant 0 : index
      %140 = vector.load %arg1[%139, %c0_78] : memref<1024x3xf32, #tpu.memory_space<vmem>>, vector<62x3xf32>
      %c1_79 = arith.constant 1 : index
      %c0_80 = arith.constant 0 : index
      %c0_81 = arith.constant 0 : index
      %141 = vector.load %arg2[%c1_79, %c0_80, %c0_81] : memref<9x3x32xf32, #tpu.memory_space<vmem>>, vector<1x3x32xf32>
      %142 = vector.shape_cast %141 : vector<1x3x32xf32> to vector<3x32xf32>
      %cst_82 = arith.constant dense<0.000000e+00> : vector<62x32xf32>
      %143 = tpu.matmul %140, %142, %cst_82 {dimension_numbers = #tpu.dot_dimension_numbers<[1], [0], [0], [1], [0, 0, 1, 1], [], []>} : vector<62x3xf32>, vector<3x32xf32>, vector<62x32xf32> -> vector<62x32xf32>
      %144 = arith.addf %136, %143 : vector<62x32xf32>
      %c0_i32_83 = arith.constant 0 : i32
      %145 = arith.addi %127, %c0_i32_83 : i32
      %c2_i32_84 = arith.constant 2 : i32
      %146 = arith.addi %145, %c2_i32_84 : i32
      %147 = arith.index_cast %146 : i32 to index
      %c0_85 = arith.constant 0 : index
      %148 = vector.load %arg1[%147, %c0_85] : memref<1024x3xf32, #tpu.memory_space<vmem>>, vector<62x3xf32>
      %c2_86 = arith.constant 2 : index
      %c0_87 = arith.constant 0 : index
      %c0_88 = arith.constant 0 : index
      %149 = vector.load %arg2[%c2_86, %c0_87, %c0_88] : memref<9x3x32xf32, #tpu.memory_space<vmem>>, vector<1x3x32xf32>
      %150 = vector.shape_cast %149 : vector<1x3x32xf32> to vector<3x32xf32>
      %cst_89 = arith.constant dense<0.000000e+00> : vector<62x32xf32>
      %151 = tpu.matmul %148, %150, %cst_89 {dimension_numbers = #tpu.dot_dimension_numbers<[1], [0], [0], [1], [0, 0, 1, 1], [], []>} : vector<62x3xf32>, vector<3x32xf32>, vector<62x32xf32> -> vector<62x32xf32>
      %152 = arith.addf %144, %151 : vector<62x32xf32>
      %c32_i32_90 = arith.constant 32 : i32
      %153 = arith.addi %127, %c32_i32_90 : i32
      %c0_i32_91 = arith.constant 0 : i32
      %154 = arith.addi %153, %c0_i32_91 : i32
      %155 = arith.index_cast %154 : i32 to index
      %c0_92 = arith.constant 0 : index
      %156 = vector.load %arg1[%155, %c0_92] : memref<1024x3xf32, #tpu.memory_space<vmem>>, vector<62x3xf32>
      %c3_93 = arith.constant 3 : index
      %c0_94 = arith.constant 0 : index
      %c0_95 = arith.constant 0 : index
      %157 = vector.load %arg2[%c3_93, %c0_94, %c0_95] : memref<9x3x32xf32, #tpu.memory_space<vmem>>, vector<1x3x32xf32>
      %158 = vector.shape_cast %157 : vector<1x3x32xf32> to vector<3x32xf32>
      %cst_96 = arith.constant dense<0.000000e+00> : vector<62x32xf32>
      %159 = tpu.matmul %156, %158, %cst_96 {dimension_numbers = #tpu.dot_dimension_numbers<[1], [0], [0], [1], [0, 0, 1, 1], [], []>} : vector<62x3xf32>, vector<3x32xf32>, vector<62x32xf32> -> vector<62x32xf32>
      %160 = arith.addf %152, %159 : vector<62x32xf32>
      %c32_i32_97 = arith.constant 32 : i32
      %161 = arith.addi %127, %c32_i32_97 : i32
      %c1_i32_98 = arith.constant 1 : i32
      %162 = arith.addi %161, %c1_i32_98 : i32
      %163 = arith.index_cast %162 : i32 to index
      %c0_99 = arith.constant 0 : index
      %164 = vector.load %arg1[%163, %c0_99] : memref<1024x3xf32, #tpu.memory_space<vmem>>, vector<62x3xf32>
      %c4 = arith.constant 4 : index
      %c0_100 = arith.constant 0 : index
      %c0_101 = arith.constant 0 : index
      %165 = vector.load %arg2[%c4, %c0_100, %c0_101] : memref<9x3x32xf32, #tpu.memory_space<vmem>>, vector<1x3x32xf32>
      %166 = vector.shape_cast %165 : vector<1x3x32xf32> to vector<3x32xf32>
      %cst_102 = arith.constant dense<0.000000e+00> : vector<62x32xf32>
      %167 = tpu.matmul %164, %166, %cst_102 {dimension_numbers = #tpu.dot_dimension_numbers<[1], [0], [0], [1], [0, 0, 1, 1], [], []>} : vector<62x3xf32>, vector<3x32xf32>, vector<62x32xf32> -> vector<62x32xf32>
      %168 = arith.addf %160, %167 : vector<62x32xf32>
      %c32_i32_103 = arith.constant 32 : i32
      %169 = arith.addi %127, %c32_i32_103 : i32
      %c2_i32_104 = arith.constant 2 : i32
      %170 = arith.addi %169, %c2_i32_104 : i32
      %171 = arith.index_cast %170 : i32 to index
      %c0_105 = arith.constant 0 : index
      %172 = vector.load %arg1[%171, %c0_105] : memref<1024x3xf32, #tpu.memory_space<vmem>>, vector<62x3xf32>
      %c5 = arith.constant 5 : index
      %c0_106 = arith.constant 0 : index
      %c0_107 = arith.constant 0 : index
      %173 = vector.load %arg2[%c5, %c0_106, %c0_107] : memref<9x3x32xf32, #tpu.memory_space<vmem>>, vector<1x3x32xf32>
      %174 = vector.shape_cast %173 : vector<1x3x32xf32> to vector<3x32xf32>
      %cst_108 = arith.constant dense<0.000000e+00> : vector<62x32xf32>
      %175 = tpu.matmul %172, %174, %cst_108 {dimension_numbers = #tpu.dot_dimension_numbers<[1], [0], [0], [1], [0, 0, 1, 1], [], []>} : vector<62x3xf32>, vector<3x32xf32>, vector<62x32xf32> -> vector<62x32xf32>
      %176 = arith.addf %168, %175 : vector<62x32xf32>
      %c64_i32 = arith.constant 64 : i32
      %177 = arith.addi %127, %c64_i32 : i32
      %c0_i32_109 = arith.constant 0 : i32
      %178 = arith.addi %177, %c0_i32_109 : i32
      %179 = arith.index_cast %178 : i32 to index
      %c0_110 = arith.constant 0 : index
      %180 = vector.load %arg1[%179, %c0_110] : memref<1024x3xf32, #tpu.memory_space<vmem>>, vector<62x3xf32>
      %c6 = arith.constant 6 : index
      %c0_111 = arith.constant 0 : index
      %c0_112 = arith.constant 0 : index
      %181 = vector.load %arg2[%c6, %c0_111, %c0_112] : memref<9x3x32xf32, #tpu.memory_space<vmem>>, vector<1x3x32xf32>
      %182 = vector.shape_cast %181 : vector<1x3x32xf32> to vector<3x32xf32>
      %cst_113 = arith.constant dense<0.000000e+00> : vector<62x32xf32>
      %183 = tpu.matmul %180, %182, %cst_113 {dimension_numbers = #tpu.dot_dimension_numbers<[1], [0], [0], [1], [0, 0, 1, 1], [], []>} : vector<62x3xf32>, vector<3x32xf32>, vector<62x32xf32> -> vector<62x32xf32>
      %184 = arith.addf %176, %183 : vector<62x32xf32>
      %c64_i32_114 = arith.constant 64 : i32
      %185 = arith.addi %127, %c64_i32_114 : i32
      %c1_i32_115 = arith.constant 1 : i32
      %186 = arith.addi %185, %c1_i32_115 : i32
      %187 = arith.index_cast %186 : i32 to index
      %c0_116 = arith.constant 0 : index
      %188 = vector.load %arg1[%187, %c0_116] : memref<1024x3xf32, #tpu.memory_space<vmem>>, vector<62x3xf32>
      %c7 = arith.constant 7 : index
      %c0_117 = arith.constant 0 : index
      %c0_118 = arith.constant 0 : index
      %189 = vector.load %arg2[%c7, %c0_117, %c0_118] : memref<9x3x32xf32, #tpu.memory_space<vmem>>, vector<1x3x32xf32>
      %190 = vector.shape_cast %189 : vector<1x3x32xf32> to vector<3x32xf32>
      %cst_119 = arith.constant dense<0.000000e+00> : vector<62x32xf32>
      %191 = tpu.matmul %188, %190, %cst_119 {dimension_numbers = #tpu.dot_dimension_numbers<[1], [0], [0], [1], [0, 0, 1, 1], [], []>} : vector<62x3xf32>, vector<3x32xf32>, vector<62x32xf32> -> vector<62x32xf32>
      %192 = arith.addf %184, %191 : vector<62x32xf32>
      %c64_i32_120 = arith.constant 64 : i32
      %193 = arith.addi %127, %c64_i32_120 : i32
      %c2_i32_121 = arith.constant 2 : i32
      %194 = arith.addi %193, %c2_i32_121 : i32
      %195 = arith.index_cast %194 : i32 to index
      %c0_122 = arith.constant 0 : index
      %196 = vector.load %arg1[%195, %c0_122] : memref<1024x3xf32, #tpu.memory_space<vmem>>, vector<62x3xf32>
      %c8 = arith.constant 8 : index
      %c0_123 = arith.constant 0 : index
      %c0_124 = arith.constant 0 : index
      %197 = vector.load %arg2[%c8, %c0_123, %c0_124] : memref<9x3x32xf32, #tpu.memory_space<vmem>>, vector<1x3x32xf32>
      %198 = vector.shape_cast %197 : vector<1x3x32xf32> to vector<3x32xf32>
      %cst_125 = arith.constant dense<0.000000e+00> : vector<62x32xf32>
      %199 = tpu.matmul %196, %198, %cst_125 {dimension_numbers = #tpu.dot_dimension_numbers<[1], [0], [0], [1], [0, 0, 1, 1], [], []>} : vector<62x3xf32>, vector<3x32xf32>, vector<62x32xf32> -> vector<62x32xf32>
      %200 = arith.addf %192, %199 : vector<62x32xf32>
      %201 = vector.broadcast %30 : vector<1x32xf32> to vector<62x32xf32>
      %202 = arith.addf %200, %201 : vector<62x32xf32>
      %cst_126 = arith.constant 0.000000e+00 : f32
      %203 = vector.broadcast %cst_126 : f32 to vector<62x32xf32>
      %204 = arith.maximumf %202, %203 : vector<62x32xf32>
      %cst_127 = arith.constant dense<0.000000e+00> : vector<15x32xf32>
      %205 = tpu.matmul %6, %204, %cst_127 {dimension_numbers = #tpu.dot_dimension_numbers<[1], [0], [0], [1], [0, 0, 1, 1], [], []>} : vector<15x62xf32>, vector<62x32xf32>, vector<15x32xf32> -> vector<15x32xf32>
      %cst_128 = arith.constant dense<0.000000e+00> : vector<15x32xf32>
      %206 = tpu.matmul %13, %204, %cst_128 {dimension_numbers = #tpu.dot_dimension_numbers<[1], [0], [0], [1], [0, 0, 1, 1], [], []>} : vector<15x62xf32>, vector<62x32xf32>, vector<15x32xf32> -> vector<15x32xf32>
      %207 = arith.maximumf %205, %206 : vector<15x32xf32>
      %cst_129 = arith.constant dense<0.000000e+00> : vector<15x32xf32>
      %208 = tpu.matmul %20, %204, %cst_129 {dimension_numbers = #tpu.dot_dimension_numbers<[1], [0], [0], [1], [0, 0, 1, 1], [], []>} : vector<15x62xf32>, vector<62x32xf32>, vector<15x32xf32> -> vector<15x32xf32>
      %cst_130 = arith.constant dense<0.000000e+00> : vector<15x32xf32>
      %209 = tpu.matmul %29, %204, %cst_130 {dimension_numbers = #tpu.dot_dimension_numbers<[1], [0], [0], [1], [0, 0, 1, 1], [], []>} : vector<15x62xf32>, vector<62x32xf32>, vector<15x32xf32> -> vector<15x32xf32>
      %210 = arith.maximumf %208, %209 : vector<15x32xf32>
      %211 = arith.maximumf %207, %210 : vector<15x32xf32>
      %c15_i32_131 = arith.constant 15 : i32
      %212 = arith.muli %arg16, %c15_i32_131 : i32
      %213 = arith.index_cast %212 : i32 to index
      %c0_132 = arith.constant 0 : index
      %214 = vector.load %arg13[%213, %c0_132] : memref<225x32xf32, #tpu.memory_space<vmem>>, vector<15x32xf32>
      tpu.vector_store %arg13[%213, %c0_132], %211 {strides = array<i32>} : memref<225x32xf32, #tpu.memory_space<vmem>>, vector<15x32xf32>,
    }
    %c15_i32_7 = arith.constant 15 : i32
    %32 = tpu.iota {dimensions = array<i32: 0>} : vector<6x28xi32>
    %33 = tpu.iota {dimensions = array<i32: 1>} : vector<6x28xi32>
    %c2_i32_8 = arith.constant 2 : i32
    %34 = vector.broadcast %c2_i32_8 : i32 to vector<6x28xi32>
    %35 = arith.muli %34, %32 : vector<6x28xi32>
    %36 = arith.cmpi eq, %33, %35 : vector<6x28xi32>
    %37 = arith.extui %36 : vector<6x28xi1> to vector<6x28xi32>
    %38 = arith.sitofp %37 : vector<6x28xi32> to vector<6x28xf32>
    %c2_i32_9 = arith.constant 2 : i32
    %39 = vector.broadcast %c2_i32_9 : i32 to vector<6x28xi32>
    %40 = arith.muli %39, %32 : vector<6x28xi32>
    %c1_i32_10 = arith.constant 1 : i32
    %41 = vector.broadcast %c1_i32_10 : i32 to vector<6x28xi32>
    %42 = arith.addi %40, %41 : vector<6x28xi32>
    %43 = arith.cmpi eq, %33, %42 : vector<6x28xi32>
    %44 = arith.extui %43 : vector<6x28xi1> to vector<6x28xi32>
    %45 = arith.sitofp %44 : vector<6x28xi32> to vector<6x28xf32>
    %c2_i32_11 = arith.constant 2 : i32
    %46 = vector.broadcast %c2_i32_11 : i32 to vector<6x28xi32>
    %47 = arith.muli %46, %32 : vector<6x28xi32>
    %c15_i32_12 = arith.constant 15 : i32
    %48 = vector.broadcast %c15_i32_12 : i32 to vector<6x28xi32>
    %49 = arith.addi %48, %47 : vector<6x28xi32>
    %50 = arith.cmpi eq, %33, %49 : vector<6x28xi32>
    %51 = arith.extui %50 : vector<6x28xi1> to vector<6x28xi32>
    %52 = arith.sitofp %51 : vector<6x28xi32> to vector<6x28xf32>
    %c2_i32_13 = arith.constant 2 : i32
    %53 = vector.broadcast %c2_i32_13 : i32 to vector<6x28xi32>
    %54 = arith.muli %53, %32 : vector<6x28xi32>
    %c15_i32_14 = arith.constant 15 : i32
    %55 = vector.broadcast %c15_i32_14 : i32 to vector<6x28xi32>
    %56 = arith.addi %55, %54 : vector<6x28xi32>
    %c1_i32_15 = arith.constant 1 : i32
    %57 = vector.broadcast %c1_i32_15 : i32 to vector<6x28xi32>
    %58 = arith.addi %56, %57 : vector<6x28xi32>
    %59 = arith.cmpi eq, %33, %58 : vector<6x28xi32>
    %60 = arith.extui %59 : vector<6x28xi1> to vector<6x28xi32>
    %61 = arith.sitofp %60 : vector<6x28xi32> to vector<6x28xf32>
    %c0_16 = arith.constant 0 : index
    %c0_17 = arith.constant 0 : index
    %62 = vector.load %arg5[%c0_16, %c0_17] : memref<1x64xf32, #tpu.memory_space<vmem>>, vector<1x64xf32>
    %c0_i32_18 = arith.constant 0 : i32
    %c6_i32 = arith.constant 6 : i32
    %63 = arith.addi %c0_i32_18, %c6_i32 : i32
    %c1_i32_19 = arith.constant 1 : i32
    scf.for %arg16 = %c0_i32_18 to %63 step %c1_i32_19  : i32 {
      %c2_i32_66 = arith.constant 2 : i32
      %126 = arith.muli %c2_i32_66, %arg16 : i32
      %c15_i32_67 = arith.constant 15 : i32
      %127 = arith.muli %126, %c15_i32_67 : i32
      %cst_68 = arith.constant 0.000000e+00 : f32
      %128 = vector.broadcast %cst_68 : f32 to vector<28x64xf32>
      %c0_i32_69 = arith.constant 0 : i32
      %129 = arith.addi %127, %c0_i32_69 : i32
      %c0_i32_70 = arith.constant 0 : i32
      %130 = arith.addi %129, %c0_i32_70 : i32
      %131 = arith.index_cast %130 : i32 to index
      %c0_71 = arith.constant 0 : index
      %132 = vector.load %arg13[%131, %c0_71] : memref<225x32xf32, #tpu.memory_space<vmem>>, vector<28x32xf32>
      %c0_72 = arith.constant 0 : index
      %c0_73 = arith.constant 0 : index
      %c0_74 = arith.constant 0 : index
      %133 = vector.load %arg4[%c0_72, %c0_73, %c0_74] : memref<9x32x64xf32, #tpu.memory_space<vmem>>, vector<1x32x64xf32>
      %134 = vector.shape_cast %133 : vector<1x32x64xf32> to vector<32x64xf32>
      %cst_75 = arith.constant dense<0.000000e+00> : vector<28x64xf32>
      %135 = tpu.matmul %132, %134, %cst_75 {dimension_numbers = #tpu.dot_dimension_numbers<[1], [0], [0], [1], [0, 0, 1, 1], [], []>} : vector<28x32xf32>, vector<32x64xf32>, vector<28x64xf32> -> vector<28x64xf32>
      %136 = arith.addf %128, %135 : vector<28x64xf32>
      %c0_i32_76 = arith.constant 0 : i32
      %137 = arith.addi %127, %c0_i32_76 : i32
      %c1_i32_77 = arith.constant 1 : i32
      %138 = arith.addi %137, %c1_i32_77 : i32
      %139 = arith.index_cast %138 : i32 to index
      %c0_78 = arith.constant 0 : index
      %140 = vector.load %arg13[%139, %c0_78] : memref<225x32xf32, #tpu.memory_space<vmem>>, vector<28x32xf32>
      %c1_79 = arith.constant 1 : index
      %c0_80 = arith.constant 0 : index
      %c0_81 = arith.constant 0 : index
      %141 = vector.load %arg4[%c1_79, %c0_80, %c0_81] : memref<9x32x64xf32, #tpu.memory_space<vmem>>, vector<1x32x64xf32>
      %142 = vector.shape_cast %141 : vector<1x32x64xf32> to vector<32x64xf32>
      %cst_82 = arith.constant dense<0.000000e+00> : vector<28x64xf32>
      %143 = tpu.matmul %140, %142, %cst_82 {dimension_numbers = #tpu.dot_dimension_numbers<[1], [0], [0], [1], [0, 0, 1, 1], [], []>} : vector<28x32xf32>, vector<32x64xf32>, vector<28x64xf32> -> vector<28x64xf32>
      %144 = arith.addf %136, %143 : vector<28x64xf32>
      %c0_i32_83 = arith.constant 0 : i32
      %145 = arith.addi %127, %c0_i32_83 : i32
      %c2_i32_84 = arith.constant 2 : i32
      %146 = arith.addi %145, %c2_i32_84 : i32
      %147 = arith.index_cast %146 : i32 to index
      %c0_85 = arith.constant 0 : index
      %148 = vector.load %arg13[%147, %c0_85] : memref<225x32xf32, #tpu.memory_space<vmem>>, vector<28x32xf32>
      %c2_86 = arith.constant 2 : index
      %c0_87 = arith.constant 0 : index
      %c0_88 = arith.constant 0 : index
      %149 = vector.load %arg4[%c2_86, %c0_87, %c0_88] : memref<9x32x64xf32, #tpu.memory_space<vmem>>, vector<1x32x64xf32>
      %150 = vector.shape_cast %149 : vector<1x32x64xf32> to vector<32x64xf32>
      %cst_89 = arith.constant dense<0.000000e+00> : vector<28x64xf32>
      %151 = tpu.matmul %148, %150, %cst_89 {dimension_numbers = #tpu.dot_dimension_numbers<[1], [0], [0], [1], [0, 0, 1, 1], [], []>} : vector<28x32xf32>, vector<32x64xf32>, vector<28x64xf32> -> vector<28x64xf32>
      %152 = arith.addf %144, %151 : vector<28x64xf32>
      %c15_i32_90 = arith.constant 15 : i32
      %153 = arith.addi %127, %c15_i32_90 : i32
      %c0_i32_91 = arith.constant 0 : i32
      %154 = arith.addi %153, %c0_i32_91 : i32
      %155 = arith.index_cast %154 : i32 to index
      %c0_92 = arith.constant 0 : index
      %156 = vector.load %arg13[%155, %c0_92] : memref<225x32xf32, #tpu.memory_space<vmem>>, vector<28x32xf32>
      %c3_93 = arith.constant 3 : index
      %c0_94 = arith.constant 0 : index
      %c0_95 = arith.constant 0 : index
      %157 = vector.load %arg4[%c3_93, %c0_94, %c0_95] : memref<9x32x64xf32, #tpu.memory_space<vmem>>, vector<1x32x64xf32>
      %158 = vector.shape_cast %157 : vector<1x32x64xf32> to vector<32x64xf32>
      %cst_96 = arith.constant dense<0.000000e+00> : vector<28x64xf32>
      %159 = tpu.matmul %156, %158, %cst_96 {dimension_numbers = #tpu.dot_dimension_numbers<[1], [0], [0], [1], [0, 0, 1, 1], [], []>} : vector<28x32xf32>, vector<32x64xf32>, vector<28x64xf32> -> vector<28x64xf32>
      %160 = arith.addf %152, %159 : vector<28x64xf32>
      %c15_i32_97 = arith.constant 15 : i32
      %161 = arith.addi %127, %c15_i32_97 : i32
      %c1_i32_98 = arith.constant 1 : i32
      %162 = arith.addi %161, %c1_i32_98 : i32
      %163 = arith.index_cast %162 : i32 to index
      %c0_99 = arith.constant 0 : index
      %164 = vector.load %arg13[%163, %c0_99] : memref<225x32xf32, #tpu.memory_space<vmem>>, vector<28x32xf32>
      %c4 = arith.constant 4 : index
      %c0_100 = arith.constant 0 : index
      %c0_101 = arith.constant 0 : index
      %165 = vector.load %arg4[%c4, %c0_100, %c0_101] : memref<9x32x64xf32, #tpu.memory_space<vmem>>, vector<1x32x64xf32>
      %166 = vector.shape_cast %165 : vector<1x32x64xf32> to vector<32x64xf32>
      %cst_102 = arith.constant dense<0.000000e+00> : vector<28x64xf32>
      %167 = tpu.matmul %164, %166, %cst_102 {dimension_numbers = #tpu.dot_dimension_numbers<[1], [0], [0], [1], [0, 0, 1, 1], [], []>} : vector<28x32xf32>, vector<32x64xf32>, vector<28x64xf32> -> vector<28x64xf32>
      %168 = arith.addf %160, %167 : vector<28x64xf32>
      %c15_i32_103 = arith.constant 15 : i32
      %169 = arith.addi %127, %c15_i32_103 : i32
      %c2_i32_104 = arith.constant 2 : i32
      %170 = arith.addi %169, %c2_i32_104 : i32
      %171 = arith.index_cast %170 : i32 to index
      %c0_105 = arith.constant 0 : index
      %172 = vector.load %arg13[%171, %c0_105] : memref<225x32xf32, #tpu.memory_space<vmem>>, vector<28x32xf32>
      %c5 = arith.constant 5 : index
      %c0_106 = arith.constant 0 : index
      %c0_107 = arith.constant 0 : index
      %173 = vector.load %arg4[%c5, %c0_106, %c0_107] : memref<9x32x64xf32, #tpu.memory_space<vmem>>, vector<1x32x64xf32>
      %174 = vector.shape_cast %173 : vector<1x32x64xf32> to vector<32x64xf32>
      %cst_108 = arith.constant dense<0.000000e+00> : vector<28x64xf32>
      %175 = tpu.matmul %172, %174, %cst_108 {dimension_numbers = #tpu.dot_dimension_numbers<[1], [0], [0], [1], [0, 0, 1, 1], [], []>} : vector<28x32xf32>, vector<32x64xf32>, vector<28x64xf32> -> vector<28x64xf32>
      %176 = arith.addf %168, %175 : vector<28x64xf32>
      %c30_i32 = arith.constant 30 : i32
      %177 = arith.addi %127, %c30_i32 : i32
      %c0_i32_109 = arith.constant 0 : i32
      %178 = arith.addi %177, %c0_i32_109 : i32
      %179 = arith.index_cast %178 : i32 to index
      %c0_110 = arith.constant 0 : index
      %180 = vector.load %arg13[%179, %c0_110] : memref<225x32xf32, #tpu.memory_space<vmem>>, vector<28x32xf32>
      %c6 = arith.constant 6 : index
      %c0_111 = arith.constant 0 : index
      %c0_112 = arith.constant 0 : index
      %181 = vector.load %arg4[%c6, %c0_111, %c0_112] : memref<9x32x64xf32, #tpu.memory_space<vmem>>, vector<1x32x64xf32>
      %182 = vector.shape_cast %181 : vector<1x32x64xf32> to vector<32x64xf32>
      %cst_113 = arith.constant dense<0.000000e+00> : vector<28x64xf32>
      %183 = tpu.matmul %180, %182, %cst_113 {dimension_numbers = #tpu.dot_dimension_numbers<[1], [0], [0], [1], [0, 0, 1, 1], [], []>} : vector<28x32xf32>, vector<32x64xf32>, vector<28x64xf32> -> vector<28x64xf32>
      %184 = arith.addf %176, %183 : vector<28x64xf32>
      %c30_i32_114 = arith.constant 30 : i32
      %185 = arith.addi %127, %c30_i32_114 : i32
      %c1_i32_115 = arith.constant 1 : i32
      %186 = arith.addi %185, %c1_i32_115 : i32
      %187 = arith.index_cast %186 : i32 to index
      %c0_116 = arith.constant 0 : index
      %188 = vector.load %arg13[%187, %c0_116] : memref<225x32xf32, #tpu.memory_space<vmem>>, vector<28x32xf32>
      %c7 = arith.constant 7 : index
      %c0_117 = arith.constant 0 : index
      %c0_118 = arith.constant 0 : index
      %189 = vector.load %arg4[%c7, %c0_117, %c0_118] : memref<9x32x64xf32, #tpu.memory_space<vmem>>, vector<1x32x64xf32>
      %190 = vector.shape_cast %189 : vector<1x32x64xf32> to vector<32x64xf32>
      %cst_119 = arith.constant dense<0.000000e+00> : vector<28x64xf32>
      %191 = tpu.matmul %188, %190, %cst_119 {dimension_numbers = #tpu.dot_dimension_numbers<[1], [0], [0], [1], [0, 0, 1, 1], [], []>} : vector<28x32xf32>, vector<32x64xf32>, vector<28x64xf32> -> vector<28x64xf32>
      %192 = arith.addf %184, %191 : vector<28x64xf32>
      %c30_i32_120 = arith.constant 30 : i32
      %193 = arith.addi %127, %c30_i32_120 : i32
      %c2_i32_121 = arith.constant 2 : i32
      %194 = arith.addi %193, %c2_i32_121 : i32
      %195 = arith.index_cast %194 : i32 to index
      %c0_122 = arith.constant 0 : index
      %196 = vector.load %arg13[%195, %c0_122] : memref<225x32xf32, #tpu.memory_space<vmem>>, vector<28x32xf32>
      %c8 = arith.constant 8 : index
      %c0_123 = arith.constant 0 : index
      %c0_124 = arith.constant 0 : index
      %197 = vector.load %arg4[%c8, %c0_123, %c0_124] : memref<9x32x64xf32, #tpu.memory_space<vmem>>, vector<1x32x64xf32>
      %198 = vector.shape_cast %197 : vector<1x32x64xf32> to vector<32x64xf32>
      %cst_125 = arith.constant dense<0.000000e+00> : vector<28x64xf32>
      %199 = tpu.matmul %196, %198, %cst_125 {dimension_numbers = #tpu.dot_dimension_numbers<[1], [0], [0], [1], [0, 0, 1, 1], [], []>} : vector<28x32xf32>, vector<32x64xf32>, vector<28x64xf32> -> vector<28x64xf32>
      %200 = arith.addf %192, %199 : vector<28x64xf32>
      %201 = vector.broadcast %62 : vector<1x64xf32> to vector<28x64xf32>
      %202 = arith.addf %200, %201 : vector<28x64xf32>
      %cst_126 = arith.constant 0.000000e+00 : f32
      %203 = vector.broadcast %cst_126 : f32 to vector<28x64xf32>
      %204 = arith.maximumf %202, %203 : vector<28x64xf32>
      %cst_127 = arith.constant dense<0.000000e+00> : vector<6x64xf32>
      %205 = tpu.matmul %38, %204, %cst_127 {dimension_numbers = #tpu.dot_dimension_numbers<[1], [0], [0], [1], [0, 0, 1, 1], [], []>} : vector<6x28xf32>, vector<28x64xf32>, vector<6x64xf32> -> vector<6x64xf32>
      %cst_128 = arith.constant dense<0.000000e+00> : vector<6x64xf32>
      %206 = tpu.matmul %45, %204, %cst_128 {dimension_numbers = #tpu.dot_dimension_numbers<[1], [0], [0], [1], [0, 0, 1, 1], [], []>} : vector<6x28xf32>, vector<28x64xf32>, vector<6x64xf32> -> vector<6x64xf32>
      %207 = arith.maximumf %205, %206 : vector<6x64xf32>
      %cst_129 = arith.constant dense<0.000000e+00> : vector<6x64xf32>
      %208 = tpu.matmul %52, %204, %cst_129 {dimension_numbers = #tpu.dot_dimension_numbers<[1], [0], [0], [1], [0, 0, 1, 1], [], []>} : vector<6x28xf32>, vector<28x64xf32>, vector<6x64xf32> -> vector<6x64xf32>
      %cst_130 = arith.constant dense<0.000000e+00> : vector<6x64xf32>
      %209 = tpu.matmul %61, %204, %cst_130 {dimension_numbers = #tpu.dot_dimension_numbers<[1], [0], [0], [1], [0, 0, 1, 1], [], []>} : vector<6x28xf32>, vector<28x64xf32>, vector<6x64xf32> -> vector<6x64xf32>
      %210 = arith.maximumf %208, %209 : vector<6x64xf32>
      %211 = arith.maximumf %207, %210 : vector<6x64xf32>
      %c6_i32_131 = arith.constant 6 : i32
      %212 = arith.muli %arg16, %c6_i32_131 : i32
      %213 = arith.index_cast %212 : i32 to index
      %c0_132 = arith.constant 0 : index
      %214 = vector.load %arg14[%213, %c0_132] : memref<36x64xf32, #tpu.memory_space<vmem>>, vector<6x64xf32>
      tpu.vector_store %arg14[%213, %c0_132], %211 {strides = array<i32>} : memref<36x64xf32, #tpu.memory_space<vmem>>, vector<6x64xf32>,
    }
    %c6_i32_20 = arith.constant 6 : i32
    %64 = tpu.iota {dimensions = array<i32: 0>} : vector<2x10xi32>
    %65 = tpu.iota {dimensions = array<i32: 1>} : vector<2x10xi32>
    %c2_i32_21 = arith.constant 2 : i32
    %66 = vector.broadcast %c2_i32_21 : i32 to vector<2x10xi32>
    %67 = arith.muli %66, %64 : vector<2x10xi32>
    %68 = arith.cmpi eq, %65, %67 : vector<2x10xi32>
    %69 = arith.extui %68 : vector<2x10xi1> to vector<2x10xi32>
    %70 = arith.sitofp %69 : vector<2x10xi32> to vector<2x10xf32>
    %c2_i32_22 = arith.constant 2 : i32
    %71 = vector.broadcast %c2_i32_22 : i32 to vector<2x10xi32>
    %72 = arith.muli %71, %64 : vector<2x10xi32>
    %c1_i32_23 = arith.constant 1 : i32
    %73 = vector.broadcast %c1_i32_23 : i32 to vector<2x10xi32>
    %74 = arith.addi %72, %73 : vector<2x10xi32>
    %75 = arith.cmpi eq, %65, %74 : vector<2x10xi32>
    %76 = arith.extui %75 : vector<2x10xi1> to vector<2x10xi32>
    %77 = arith.sitofp %76 : vector<2x10xi32> to vector<2x10xf32>
    %c2_i32_24 = arith.constant 2 : i32
    %78 = vector.broadcast %c2_i32_24 : i32 to vector<2x10xi32>
    %79 = arith.muli %78, %64 : vector<2x10xi32>
    %c6_i32_25 = arith.constant 6 : i32
    %80 = vector.broadcast %c6_i32_25 : i32 to vector<2x10xi32>
    %81 = arith.addi %80, %79 : vector<2x10xi32>
    %82 = arith.cmpi eq, %65, %81 : vector<2x10xi32>
    %83 = arith.extui %82 : vector<2x10xi1> to vector<2x10xi32>
    %84 = arith.sitofp %83 : vector<2x10xi32> to vector<2x10xf32>
    %c2_i32_26 = arith.constant 2 : i32
    %85 = vector.broadcast %c2_i32_26 : i32 to vector<2x10xi32>
    %86 = arith.muli %85, %64 : vector<2x10xi32>
    %c6_i32_27 = arith.constant 6 : i32
    %87 = vector.broadcast %c6_i32_27 : i32 to vector<2x10xi32>
    %88 = arith.addi %87, %86 : vector<2x10xi32>
    %c1_i32_28 = arith.constant 1 : i32
    %89 = vector.broadcast %c1_i32_28 : i32 to vector<2x10xi32>
    %90 = arith.addi %88, %89 : vector<2x10xi32>
    %91 = arith.cmpi eq, %65, %90 : vector<2x10xi32>
    %92 = arith.extui %91 : vector<2x10xi1> to vector<2x10xi32>
    %93 = arith.sitofp %92 : vector<2x10xi32> to vector<2x10xf32>
    %c0_29 = arith.constant 0 : index
    %c0_30 = arith.constant 0 : index
    %94 = vector.load %arg7[%c0_29, %c0_30] : memref<1x64xf32, #tpu.memory_space<vmem>>, vector<1x64xf32>
    %c0_i32_31 = arith.constant 0 : i32
    %c2_i32_32 = arith.constant 2 : i32
    %95 = arith.addi %c0_i32_31, %c2_i32_32 : i32
    %c1_i32_33 = arith.constant 1 : i32
    scf.for %arg16 = %c0_i32_31 to %95 step %c1_i32_33  : i32 {
      %c2_i32_66 = arith.constant 2 : i32
      %126 = arith.muli %c2_i32_66, %arg16 : i32
      %c6_i32_67 = arith.constant 6 : i32
      %127 = arith.muli %126, %c6_i32_67 : i32
      %cst_68 = arith.constant 0.000000e+00 : f32
      %128 = vector.broadcast %cst_68 : f32 to vector<10x64xf32>
      %c0_i32_69 = arith.constant 0 : i32
      %129 = arith.addi %127, %c0_i32_69 : i32
      %c0_i32_70 = arith.constant 0 : i32
      %130 = arith.addi %129, %c0_i32_70 : i32
      %131 = arith.index_cast %130 : i32 to index
      %c0_71 = arith.constant 0 : index
      %132 = vector.load %arg14[%131, %c0_71] : memref<36x64xf32, #tpu.memory_space<vmem>>, vector<10x64xf32>
      %c0_72 = arith.constant 0 : index
      %c0_73 = arith.constant 0 : index
      %c0_74 = arith.constant 0 : index
      %133 = vector.load %arg6[%c0_72, %c0_73, %c0_74] : memref<9x64x64xf32, #tpu.memory_space<vmem>>, vector<1x64x64xf32>
      %134 = vector.shape_cast %133 : vector<1x64x64xf32> to vector<64x64xf32>
      %cst_75 = arith.constant dense<0.000000e+00> : vector<10x64xf32>
      %135 = tpu.matmul %132, %134, %cst_75 {dimension_numbers = #tpu.dot_dimension_numbers<[1], [0], [0], [1], [0, 0, 1, 1], [], []>} : vector<10x64xf32>, vector<64x64xf32>, vector<10x64xf32> -> vector<10x64xf32>
      %136 = arith.addf %128, %135 : vector<10x64xf32>
      %c0_i32_76 = arith.constant 0 : i32
      %137 = arith.addi %127, %c0_i32_76 : i32
      %c1_i32_77 = arith.constant 1 : i32
      %138 = arith.addi %137, %c1_i32_77 : i32
      %139 = arith.index_cast %138 : i32 to index
      %c0_78 = arith.constant 0 : index
      %140 = vector.load %arg14[%139, %c0_78] : memref<36x64xf32, #tpu.memory_space<vmem>>, vector<10x64xf32>
      %c1_79 = arith.constant 1 : index
      %c0_80 = arith.constant 0 : index
      %c0_81 = arith.constant 0 : index
      %141 = vector.load %arg6[%c1_79, %c0_80, %c0_81] : memref<9x64x64xf32, #tpu.memory_space<vmem>>, vector<1x64x64xf32>
      %142 = vector.shape_cast %141 : vector<1x64x64xf32> to vector<64x64xf32>
      %cst_82 = arith.constant dense<0.000000e+00> : vector<10x64xf32>
      %143 = tpu.matmul %140, %142, %cst_82 {dimension_numbers = #tpu.dot_dimension_numbers<[1], [0], [0], [1], [0, 0, 1, 1], [], []>} : vector<10x64xf32>, vector<64x64xf32>, vector<10x64xf32> -> vector<10x64xf32>
      %144 = arith.addf %136, %143 : vector<10x64xf32>
      %c0_i32_83 = arith.constant 0 : i32
      %145 = arith.addi %127, %c0_i32_83 : i32
      %c2_i32_84 = arith.constant 2 : i32
      %146 = arith.addi %145, %c2_i32_84 : i32
      %147 = arith.index_cast %146 : i32 to index
      %c0_85 = arith.constant 0 : index
      %148 = vector.load %arg14[%147, %c0_85] : memref<36x64xf32, #tpu.memory_space<vmem>>, vector<10x64xf32>
      %c2_86 = arith.constant 2 : index
      %c0_87 = arith.constant 0 : index
      %c0_88 = arith.constant 0 : index
      %149 = vector.load %arg6[%c2_86, %c0_87, %c0_88] : memref<9x64x64xf32, #tpu.memory_space<vmem>>, vector<1x64x64xf32>
      %150 = vector.shape_cast %149 : vector<1x64x64xf32> to vector<64x64xf32>
      %cst_89 = arith.constant dense<0.000000e+00> : vector<10x64xf32>
      %151 = tpu.matmul %148, %150, %cst_89 {dimension_numbers = #tpu.dot_dimension_numbers<[1], [0], [0], [1], [0, 0, 1, 1], [], []>} : vector<10x64xf32>, vector<64x64xf32>, vector<10x64xf32> -> vector<10x64xf32>
      %152 = arith.addf %144, %151 : vector<10x64xf32>
      %c6_i32_90 = arith.constant 6 : i32
      %153 = arith.addi %127, %c6_i32_90 : i32
      %c0_i32_91 = arith.constant 0 : i32
      %154 = arith.addi %153, %c0_i32_91 : i32
      %155 = arith.index_cast %154 : i32 to index
      %c0_92 = arith.constant 0 : index
      %156 = vector.load %arg14[%155, %c0_92] : memref<36x64xf32, #tpu.memory_space<vmem>>, vector<10x64xf32>
      %c3_93 = arith.constant 3 : index
      %c0_94 = arith.constant 0 : index
      %c0_95 = arith.constant 0 : index
      %157 = vector.load %arg6[%c3_93, %c0_94, %c0_95] : memref<9x64x64xf32, #tpu.memory_space<vmem>>, vector<1x64x64xf32>
      %158 = vector.shape_cast %157 : vector<1x64x64xf32> to vector<64x64xf32>
      %cst_96 = arith.constant dense<0.000000e+00> : vector<10x64xf32>
      %159 = tpu.matmul %156, %158, %cst_96 {dimension_numbers = #tpu.dot_dimension_numbers<[1], [0], [0], [1], [0, 0, 1, 1], [], []>} : vector<10x64xf32>, vector<64x64xf32>, vector<10x64xf32> -> vector<10x64xf32>
      %160 = arith.addf %152, %159 : vector<10x64xf32>
      %c6_i32_97 = arith.constant 6 : i32
      %161 = arith.addi %127, %c6_i32_97 : i32
      %c1_i32_98 = arith.constant 1 : i32
      %162 = arith.addi %161, %c1_i32_98 : i32
      %163 = arith.index_cast %162 : i32 to index
      %c0_99 = arith.constant 0 : index
      %164 = vector.load %arg14[%163, %c0_99] : memref<36x64xf32, #tpu.memory_space<vmem>>, vector<10x64xf32>
      %c4 = arith.constant 4 : index
      %c0_100 = arith.constant 0 : index
      %c0_101 = arith.constant 0 : index
      %165 = vector.load %arg6[%c4, %c0_100, %c0_101] : memref<9x64x64xf32, #tpu.memory_space<vmem>>, vector<1x64x64xf32>
      %166 = vector.shape_cast %165 : vector<1x64x64xf32> to vector<64x64xf32>
      %cst_102 = arith.constant dense<0.000000e+00> : vector<10x64xf32>
      %167 = tpu.matmul %164, %166, %cst_102 {dimension_numbers = #tpu.dot_dimension_numbers<[1], [0], [0], [1], [0, 0, 1, 1], [], []>} : vector<10x64xf32>, vector<64x64xf32>, vector<10x64xf32> -> vector<10x64xf32>
      %168 = arith.addf %160, %167 : vector<10x64xf32>
      %c6_i32_103 = arith.constant 6 : i32
      %169 = arith.addi %127, %c6_i32_103 : i32
      %c2_i32_104 = arith.constant 2 : i32
      %170 = arith.addi %169, %c2_i32_104 : i32
      %171 = arith.index_cast %170 : i32 to index
      %c0_105 = arith.constant 0 : index
      %172 = vector.load %arg14[%171, %c0_105] : memref<36x64xf32, #tpu.memory_space<vmem>>, vector<10x64xf32>
      %c5 = arith.constant 5 : index
      %c0_106 = arith.constant 0 : index
      %c0_107 = arith.constant 0 : index
      %173 = vector.load %arg6[%c5, %c0_106, %c0_107] : memref<9x64x64xf32, #tpu.memory_space<vmem>>, vector<1x64x64xf32>
      %174 = vector.shape_cast %173 : vector<1x64x64xf32> to vector<64x64xf32>
      %cst_108 = arith.constant dense<0.000000e+00> : vector<10x64xf32>
      %175 = tpu.matmul %172, %174, %cst_108 {dimension_numbers = #tpu.dot_dimension_numbers<[1], [0], [0], [1], [0, 0, 1, 1], [], []>} : vector<10x64xf32>, vector<64x64xf32>, vector<10x64xf32> -> vector<10x64xf32>
      %176 = arith.addf %168, %175 : vector<10x64xf32>
      %c12_i32 = arith.constant 12 : i32
      %177 = arith.addi %127, %c12_i32 : i32
      %c0_i32_109 = arith.constant 0 : i32
      %178 = arith.addi %177, %c0_i32_109 : i32
      %179 = arith.index_cast %178 : i32 to index
      %c0_110 = arith.constant 0 : index
      %180 = vector.load %arg14[%179, %c0_110] : memref<36x64xf32, #tpu.memory_space<vmem>>, vector<10x64xf32>
      %c6 = arith.constant 6 : index
      %c0_111 = arith.constant 0 : index
      %c0_112 = arith.constant 0 : index
      %181 = vector.load %arg6[%c6, %c0_111, %c0_112] : memref<9x64x64xf32, #tpu.memory_space<vmem>>, vector<1x64x64xf32>
      %182 = vector.shape_cast %181 : vector<1x64x64xf32> to vector<64x64xf32>
      %cst_113 = arith.constant dense<0.000000e+00> : vector<10x64xf32>
      %183 = tpu.matmul %180, %182, %cst_113 {dimension_numbers = #tpu.dot_dimension_numbers<[1], [0], [0], [1], [0, 0, 1, 1], [], []>} : vector<10x64xf32>, vector<64x64xf32>, vector<10x64xf32> -> vector<10x64xf32>
      %184 = arith.addf %176, %183 : vector<10x64xf32>
      %c12_i32_114 = arith.constant 12 : i32
      %185 = arith.addi %127, %c12_i32_114 : i32
      %c1_i32_115 = arith.constant 1 : i32
      %186 = arith.addi %185, %c1_i32_115 : i32
      %187 = arith.index_cast %186 : i32 to index
      %c0_116 = arith.constant 0 : index
      %188 = vector.load %arg14[%187, %c0_116] : memref<36x64xf32, #tpu.memory_space<vmem>>, vector<10x64xf32>
      %c7 = arith.constant 7 : index
      %c0_117 = arith.constant 0 : index
      %c0_118 = arith.constant 0 : index
      %189 = vector.load %arg6[%c7, %c0_117, %c0_118] : memref<9x64x64xf32, #tpu.memory_space<vmem>>, vector<1x64x64xf32>
      %190 = vector.shape_cast %189 : vector<1x64x64xf32> to vector<64x64xf32>
      %cst_119 = arith.constant dense<0.000000e+00> : vector<10x64xf32>
      %191 = tpu.matmul %188, %190, %cst_119 {dimension_numbers = #tpu.dot_dimension_numbers<[1], [0], [0], [1], [0, 0, 1, 1], [], []>} : vector<10x64xf32>, vector<64x64xf32>, vector<10x64xf32> -> vector<10x64xf32>
      %192 = arith.addf %184, %191 : vector<10x64xf32>
      %c12_i32_120 = arith.constant 12 : i32
      %193 = arith.addi %127, %c12_i32_120 : i32
      %c2_i32_121 = arith.constant 2 : i32
      %194 = arith.addi %193, %c2_i32_121 : i32
      %195 = arith.index_cast %194 : i32 to index
      %c0_122 = arith.constant 0 : index
      %196 = vector.load %arg14[%195, %c0_122] : memref<36x64xf32, #tpu.memory_space<vmem>>, vector<10x64xf32>
      %c8 = arith.constant 8 : index
      %c0_123 = arith.constant 0 : index
      %c0_124 = arith.constant 0 : index
      %197 = vector.load %arg6[%c8, %c0_123, %c0_124] : memref<9x64x64xf32, #tpu.memory_space<vmem>>, vector<1x64x64xf32>
      %198 = vector.shape_cast %197 : vector<1x64x64xf32> to vector<64x64xf32>
      %cst_125 = arith.constant dense<0.000000e+00> : vector<10x64xf32>
      %199 = tpu.matmul %196, %198, %cst_125 {dimension_numbers = #tpu.dot_dimension_numbers<[1], [0], [0], [1], [0, 0, 1, 1], [], []>} : vector<10x64xf32>, vector<64x64xf32>, vector<10x64xf32> -> vector<10x64xf32>
      %200 = arith.addf %192, %199 : vector<10x64xf32>
      %201 = vector.broadcast %94 : vector<1x64xf32> to vector<10x64xf32>
      %202 = arith.addf %200, %201 : vector<10x64xf32>
      %cst_126 = arith.constant 0.000000e+00 : f32
      %203 = vector.broadcast %cst_126 : f32 to vector<10x64xf32>
      %204 = arith.maximumf %202, %203 : vector<10x64xf32>
      %cst_127 = arith.constant dense<0.000000e+00> : vector<2x64xf32>
      %205 = tpu.matmul %70, %204, %cst_127 {dimension_numbers = #tpu.dot_dimension_numbers<[1], [0], [0], [1], [0, 0, 1, 1], [], []>} : vector<2x10xf32>, vector<10x64xf32>, vector<2x64xf32> -> vector<2x64xf32>
      %cst_128 = arith.constant dense<0.000000e+00> : vector<2x64xf32>
      %206 = tpu.matmul %77, %204, %cst_128 {dimension_numbers = #tpu.dot_dimension_numbers<[1], [0], [0], [1], [0, 0, 1, 1], [], []>} : vector<2x10xf32>, vector<10x64xf32>, vector<2x64xf32> -> vector<2x64xf32>
      %207 = arith.maximumf %205, %206 : vector<2x64xf32>
      %cst_129 = arith.constant dense<0.000000e+00> : vector<2x64xf32>
      %208 = tpu.matmul %84, %204, %cst_129 {dimension_numbers = #tpu.dot_dimension_numbers<[1], [0], [0], [1], [0, 0, 1, 1], [], []>} : vector<2x10xf32>, vector<10x64xf32>, vector<2x64xf32> -> vector<2x64xf32>
      %cst_130 = arith.constant dense<0.000000e+00> : vector<2x64xf32>
      %209 = tpu.matmul %93, %204, %cst_130 {dimension_numbers = #tpu.dot_dimension_numbers<[1], [0], [0], [1], [0, 0, 1, 1], [], []>} : vector<2x10xf32>, vector<10x64xf32>, vector<2x64xf32> -> vector<2x64xf32>
      %210 = arith.maximumf %208, %209 : vector<2x64xf32>
      %211 = arith.maximumf %207, %210 : vector<2x64xf32>
      %c2_i32_131 = arith.constant 2 : i32
      %212 = arith.muli %arg16, %c2_i32_131 : i32
      %213 = arith.index_cast %212 : i32 to index
      %c0_132 = arith.constant 0 : index
      %214 = vector.load %arg15[%213, %c0_132] : memref<4x64xf32, #tpu.memory_space<vmem>>, vector<2x64xf32>
      tpu.vector_store %arg15[%213, %c0_132], %211 {strides = array<i32>} : memref<4x64xf32, #tpu.memory_space<vmem>>, vector<2x64xf32>,
    }
    %c2_i32_34 = arith.constant 2 : i32
    %c0_35 = arith.constant 0 : index
    %c0_36 = arith.constant 0 : index
    %96 = vector.load %arg9[%c0_35, %c0_36] : memref<1x128xf32, #tpu.memory_space<vmem>>, vector<1x128xf32>
    %c0_37 = arith.constant 0 : index
    %c0_38 = arith.constant 0 : index
    %97 = vector.load %arg15[%c0_37, %c0_38] : memref<4x64xf32, #tpu.memory_space<vmem>>, vector<1x64xf32>
    %c0_39 = arith.constant 0 : index
    %c0_40 = arith.constant 0 : index
    %c0_41 = arith.constant 0 : index
    %98 = vector.load %arg8[%c0_39, %c0_40, %c0_41] : memref<4x64x128xf32, #tpu.memory_space<vmem>>, vector<1x64x128xf32>
    %99 = vector.shape_cast %98 : vector<1x64x128xf32> to vector<64x128xf32>
    %cst = arith.constant dense<0.000000e+00> : vector<1x128xf32>
    %100 = tpu.matmul %97, %99, %cst {dimension_numbers = #tpu.dot_dimension_numbers<[1], [0], [0], [1], [0, 0, 1, 1], [], []>} : vector<1x64xf32>, vector<64x128xf32>, vector<1x128xf32> -> vector<1x128xf32>
    %101 = arith.addf %96, %100 : vector<1x128xf32>
    %c1 = arith.constant 1 : index
    %c0_42 = arith.constant 0 : index
    %102 = vector.load %arg15[%c1, %c0_42] : memref<4x64xf32, #tpu.memory_space<vmem>>, vector<1x64xf32>
    %c1_43 = arith.constant 1 : index
    %c0_44 = arith.constant 0 : index
    %c0_45 = arith.constant 0 : index
    %103 = vector.load %arg8[%c1_43, %c0_44, %c0_45] : memref<4x64x128xf32, #tpu.memory_space<vmem>>, vector<1x64x128xf32>
    %104 = vector.shape_cast %103 : vector<1x64x128xf32> to vector<64x128xf32>
    %cst_46 = arith.constant dense<0.000000e+00> : vector<1x128xf32>
    %105 = tpu.matmul %102, %104, %cst_46 {dimension_numbers = #tpu.dot_dimension_numbers<[1], [0], [0], [1], [0, 0, 1, 1], [], []>} : vector<1x64xf32>, vector<64x128xf32>, vector<1x128xf32> -> vector<1x128xf32>
    %106 = arith.addf %101, %105 : vector<1x128xf32>
    %c2 = arith.constant 2 : index
    %c0_47 = arith.constant 0 : index
    %107 = vector.load %arg15[%c2, %c0_47] : memref<4x64xf32, #tpu.memory_space<vmem>>, vector<1x64xf32>
    %c2_48 = arith.constant 2 : index
    %c0_49 = arith.constant 0 : index
    %c0_50 = arith.constant 0 : index
    %108 = vector.load %arg8[%c2_48, %c0_49, %c0_50] : memref<4x64x128xf32, #tpu.memory_space<vmem>>, vector<1x64x128xf32>
    %109 = vector.shape_cast %108 : vector<1x64x128xf32> to vector<64x128xf32>
    %cst_51 = arith.constant dense<0.000000e+00> : vector<1x128xf32>
    %110 = tpu.matmul %107, %109, %cst_51 {dimension_numbers = #tpu.dot_dimension_numbers<[1], [0], [0], [1], [0, 0, 1, 1], [], []>} : vector<1x64xf32>, vector<64x128xf32>, vector<1x128xf32> -> vector<1x128xf32>
    %111 = arith.addf %106, %110 : vector<1x128xf32>
    %c3 = arith.constant 3 : index
    %c0_52 = arith.constant 0 : index
    %112 = vector.load %arg15[%c3, %c0_52] : memref<4x64xf32, #tpu.memory_space<vmem>>, vector<1x64xf32>
    %c3_53 = arith.constant 3 : index
    %c0_54 = arith.constant 0 : index
    %c0_55 = arith.constant 0 : index
    %113 = vector.load %arg8[%c3_53, %c0_54, %c0_55] : memref<4x64x128xf32, #tpu.memory_space<vmem>>, vector<1x64x128xf32>
    %114 = vector.shape_cast %113 : vector<1x64x128xf32> to vector<64x128xf32>
    %cst_56 = arith.constant dense<0.000000e+00> : vector<1x128xf32>
    %115 = tpu.matmul %112, %114, %cst_56 {dimension_numbers = #tpu.dot_dimension_numbers<[1], [0], [0], [1], [0, 0, 1, 1], [], []>} : vector<1x64xf32>, vector<64x128xf32>, vector<1x128xf32> -> vector<1x128xf32>
    %116 = arith.addf %111, %115 : vector<1x128xf32>
    %cst_57 = arith.constant 0.000000e+00 : f32
    %117 = vector.broadcast %cst_57 : f32 to vector<1x128xf32>
    %118 = arith.maximumf %116, %117 : vector<1x128xf32>
    %c0_58 = arith.constant 0 : index
    %c0_59 = arith.constant 0 : index
    %119 = vector.load %arg10[%c0_58, %c0_59] : memref<128x10xf32, #tpu.memory_space<vmem>>, vector<128x10xf32>
    %cst_60 = arith.constant dense<0.000000e+00> : vector<1x10xf32>
    %120 = tpu.matmul %118, %119, %cst_60 {dimension_numbers = #tpu.dot_dimension_numbers<[1], [0], [0], [1], [0, 0, 1, 1], [], []>} : vector<1x128xf32>, vector<128x10xf32>, vector<1x10xf32> -> vector<1x10xf32>
    %c0_61 = arith.constant 0 : index
    %c0_62 = arith.constant 0 : index
    %121 = vector.load %arg11[%c0_61, %c0_62] : memref<1x10xf32, #tpu.memory_space<vmem>>, vector<1x10xf32>
    %122 = arith.addf %120, %121 : vector<1x10xf32>
    %c0_63 = arith.constant 0 : index
    %c0_64 = arith.constant 0 : index
    %c0_65 = arith.constant 0 : index
    %123 = vector.load %arg12[%c0_63, %c0_64, %c0_65] : memref<1x1x10xf32, #tpu.memory_space<vmem>>, vector<1x1x10xf32>
    %124 = vector.shape_cast %123 : vector<1x1x10xf32> to vector<1x10xf32>
    %125 = vector.shape_cast %122 : vector<1x10xf32> to vector<1x1x10xf32>
    tpu.vector_store %arg12[%c0_63, %c0_64, %c0_65], %125 {strides = array<i32>} : memref<1x1x10xf32, #tpu.memory_space<vmem>>, vector<1x1x10xf32>,
    return
  }
  func.func @transform_0(%arg0: i32) -> (i32, i32) {
    %c0_i32 = arith.constant 0 : i32
    %c0_i32_0 = arith.constant 0 : i32
    return %arg0, %c0_i32 : i32, i32
  }
  func.func @transform_1(%arg0: i32) -> (i32, i32, i32) {
    %c0_i32 = arith.constant 0 : i32
    %c0_i32_0 = arith.constant 0 : i32
    %c0_i32_1 = arith.constant 0 : i32
    %c0_i32_2 = arith.constant 0 : i32
    return %c0_i32, %c0_i32_0, %c0_i32_1 : i32, i32, i32
  }
  func.func @transform_2(%arg0: i32) -> (i32, i32) {
    %c0_i32 = arith.constant 0 : i32
    %c0_i32_0 = arith.constant 0 : i32
    %c0_i32_1 = arith.constant 0 : i32
    return %c0_i32, %c0_i32_0 : i32, i32
  }
  func.func @transform_3(%arg0: i32) -> (i32, i32, i32) {
    %c0_i32 = arith.constant 0 : i32
    %c0_i32_0 = arith.constant 0 : i32
    %c0_i32_1 = arith.constant 0 : i32
    %c0_i32_2 = arith.constant 0 : i32
    return %c0_i32, %c0_i32_0, %c0_i32_1 : i32, i32, i32
  }
  func.func @transform_4(%arg0: i32) -> (i32, i32) {
    %c0_i32 = arith.constant 0 : i32
    %c0_i32_0 = arith.constant 0 : i32
    %c0_i32_1 = arith.constant 0 : i32
    return %c0_i32, %c0_i32_0 : i32, i32
  }
  func.func @transform_5(%arg0: i32) -> (i32, i32, i32) {
    %c0_i32 = arith.constant 0 : i32
    %c0_i32_0 = arith.constant 0 : i32
    %c0_i32_1 = arith.constant 0 : i32
    %c0_i32_2 = arith.constant 0 : i32
    return %c0_i32, %c0_i32_0, %c0_i32_1 : i32, i32, i32
  }
  func.func @transform_6(%arg0: i32) -> (i32, i32) {
    %c0_i32 = arith.constant 0 : i32
    %c0_i32_0 = arith.constant 0 : i32
    %c0_i32_1 = arith.constant 0 : i32
    return %c0_i32, %c0_i32_0 : i32, i32
  }
  func.func @transform_7(%arg0: i32) -> (i32, i32, i32) {
    %c0_i32 = arith.constant 0 : i32
    %c0_i32_0 = arith.constant 0 : i32
    %c0_i32_1 = arith.constant 0 : i32
    %c0_i32_2 = arith.constant 0 : i32
    return %c0_i32, %c0_i32_0, %c0_i32_1 : i32, i32, i32
  }
  func.func @transform_8(%arg0: i32) -> (i32, i32) {
    %c0_i32 = arith.constant 0 : i32
    %c0_i32_0 = arith.constant 0 : i32
    %c0_i32_1 = arith.constant 0 : i32
    return %c0_i32, %c0_i32_0 : i32, i32
  }
  func.func @transform_9(%arg0: i32) -> (i32, i32) {
    %c0_i32 = arith.constant 0 : i32
    %c0_i32_0 = arith.constant 0 : i32
    %c0_i32_1 = arith.constant 0 : i32
    return %c0_i32, %c0_i32_0 : i32, i32
  }
  func.func @transform_10(%arg0: i32) -> (i32, i32) {
    %c0_i32 = arith.constant 0 : i32
    %c0_i32_0 = arith.constant 0 : i32
    %c0_i32_1 = arith.constant 0 : i32
    return %c0_i32, %c0_i32_0 : i32, i32
  }
  func.func @transform_11(%arg0: i32) -> (i32, i32, i32) {
    %c0_i32 = arith.constant 0 : i32
    %c0_i32_0 = arith.constant 0 : i32
    %c0_i32_1 = arith.constant 0 : i32
    return %arg0, %c0_i32, %c0_i32_0 : i32, i32, i32
  }
}

</mosaic_0001>

<bundles_post_ra>
// kernel: simple_cnn_forward.1
= control target key start
LH: loop header
LB: loop body
LE: loop exit
PB: predicated region body
PF: predicated region fallthrough
CT: control target
= control target key end

     0   :  { %s8165_s0 = inlined_call_operand.vmem [shape: f32[2048,3], index: 0, kind: input, shape index: {}]   ;;  %s8166_s1 = inlined_call_operand.vmem [shape: f32[9,3,32], index: 1, kind: input, shape index: {}]   ;;  %s8167_s2 = inlined_call_operand.vmem [shape: f32[1,32], index: 2, kind: input, shape index: {}]   ;;  %s8168_s3 = inlined_call_operand.vmem [shape: f32[9,32,64], index: 3, kind: input, shape index: {}]   ;;  %s8169_s4 = inlined_call_operand.vmem [shape: f32[1,64], index: 4, kind: input, shape index: {}]   ;;  %s8170_s5 = inlined_call_operand.vmem [shape: f32[9,64,64], index: 5, kind: input, shape index: {}]   ;;  %s8171_s6 = inlined_call_operand.vmem [shape: f32[1,64], index: 6, kind: input, shape index: {}]   ;;  %s8172_s7 = inlined_call_operand.vmem [shape: f32[4,64,128], index: 7, kind: input, shape index: {}]   ;;  %s8173_s8 = inlined_call_operand.vmem [shape: f32[1,128], index: 8, kind: input, shape index: {}]   ;;  %s8174_s9 = inlined_call_operand.vmem [shape: f32[128,10], index: 9, kind: input, shape index: {}]   ;;  %s8175_s10 = inlined_call_operand.vmem [shape: f32[1,10], index: 10, kind: input, shape index: {}]   ;;  %s8176_s11 = inlined_call_operand.hbm [shape: f32[2,1,10], index: 11, kind: output, shape index: {}]  }
   0x1   :  { %8187 = sst [smem:[#allocation23_spill]] %s8165_s0 }
   0x2   :  { %8188 = sst [smem:[#allocation24_spill]] %s8166_s1 }
   0x3   :  { %16 = vsyncpa [#allocation6], 0 }
   0x4   :  { %18 = vsyncpa [#allocation6 + $0x1], 0  ;;  %s6977_s17 = smov 0   ;;  %s6979_s18 = smov 0  }
   0x5   :  { %s6981_s19 = smov 0   ;;  %s6983_s20 = smov 0  }
   0x6 LB: > { %s6998_s21 = sadd.s32 4294967295, %s6896_s20   ;;  %s5262_s22 = sadd.s32 4294967294, %s6896_s20   ;;  %s6896_s20 = sphi %s6983_s20, %s8236_s20   ;;  %s6892_s19 = sphi %s6981_s19, %s8235_s19   ;;  %s6888_s18 = sphi %s6979_s18, %s8234_s18   ;;  %s6884_s17 = sphi %s6977_s17, %s8233_s17  }
   0x7   : > { %s7002_s23 = sadd.s32 1, %s6896_s20   ;;  %s267_s24 = sadd.s32 1, %s6892_s19 }
   0x8   : > { %s264_s25 = ssub.s32 %s6896_s20, %s7002_s23  ;;  %p277_p0 = scmp.ne.s32.totalorder %s6892_s19, %s6888_s18 }
   0x9   : > { %p265_p1 = scmp.eq.s32.totalorder %s264_s25, 0  ;;  %p278_p2 = scmp.eq.s32.totalorder %s6998_s21, 1 }
   0xa   : > { %p283_p3 = scmp.ne.s32.totalorder %s6888_s18, %s6884_s17  ;;  %p284_p4 = scmp.eq.s32.totalorder %s5262_s22, 1 }
   0xb   : > { %s7013_s26 = scalar_select %p265_p1, %s6892_s19, %s267_s24  }
   0xc   : > { %p7015_p5 = por %p278_p2, %p277_p0  ;;  %p7019_p6 = por %p284_p4, %p283_p3 }
   0xd   : > { %p5265_p7 = scmp.ge.s32.totalorder %s6896_s20, 1  ;;  %p341_p8 = scmp.lt.s32.totalorder %s6896_s20, 3 }
   0xf   : > { %p342_p9 = pnand %p5265_p7, %p341_p8 }
  0x11   : > { %345 = sbr.rel (%p342_p9) target bundleno = 1967 (0x7af), region = 64 }
  0x16   : > { %s8186_s29 = sand.u32 1, %s6888_s18   ;;  %s5266_s30 = sshll.u32 %s6998_s21, 7  ;;  %v386_v0 = vlaneseq  ;;  %v7030_v1 = vld [vmem:[%s8167_s2] ss:$0 sm:$0xff]  ;;  %v8177_v9 = vmov 0.0  }
  0x17   : > { %8191 = vst [vmem:[#allocation8_spill] sm:$0xff] %v7030_v1  ;;  %p381_p10 = scmp.lt.s32.totalorder %s5266_s30, 255  ;;  %s8194_s0 = sld [smem:[#allocation23_spill]] }
  0x18   : > { %v387_v2 = vshrl.u32 %v386_v0, 7  ;;  %v7032_v3 = vand.u32 127, %v386_v0  ;;  %s7078_s24 = scalar_lea.vmem [#allocation5], %s8186_s29  ;;  %s7080_s25 = smov 0  }
  0x19   : > { %s8238_s30 = smov (!%p381_p10, %s5266_s30), 255 }
  0x1a   : > { %8192 = vst [vmem:[#allocation9_spill] sm:$0xff] %v7032_v3  ;;  %v388_v4 = vadd.s32 8, %v387_v2  ;;  %v7034_v5 = vmul.u32 2, %v387_v2  ;;  %s5267_s14 = sshll.u32 %s8238_s30, 3 }
  0x1c   : > { %8193 = vst [vmem:[#allocation10_spill] sm:$0xff] %v7034_v5  ;;  %v392_v6 = vmul.u32 2, %v388_v4  ;;  %vm393_vm0 = vcmp.eq.s32.totalorder %v7032_v3, %v7034_v5  ;;  %v399_v7 = vadd.s32 1, %v7034_v5  ;;  %v407_v8 = vadd.s32 32, %v7034_v5 }
  0x1d   : > { %s7039_s22 = scalar_lea.vmem %s8194_s0, %s5267_s14  ;;  %v7046_v10 = vsel %vm393_vm0, 1.0, %v8177_v9 }
  0x1e   : > { %8195 = vst [vmem:[#allocation11_spill] sm:$0xff] %v7046_v10  ;;  %vm394_vm1 = vcmp.eq.s32.totalorder %v7032_v3, %v392_v6  ;;  %v400_v11 = vadd.s32 1, %v392_v6  ;;  %vm401_vm2 = vcmp.eq.s32.totalorder %v7032_v3, %v399_v7  ;;  %v408_v12 = vadd.s32 32, %v392_v6 }
  0x1f   : > { %v7051_v13 = vsel %vm394_vm1, 1.0, %v8177_v9  ;;  %v7054_v14 = vsel %vm401_vm2, 1.0, %v8177_v9  ;;  %vm409_vm3 = vcmp.eq.s32.totalorder %v7032_v3, %v407_v8  ;;  %v415_v15 = vadd.s32 1, %v407_v8 }
  0x20   : > { %8196 = vst [vmem:[#allocation12_spill] sm:$0xff] %v7051_v13  ;;  %8197 = vst [vmem:[#allocation13_spill] sm:$0xff] %v7054_v14  ;;  %vm402_vm4 = vcmp.eq.s32.totalorder %v7032_v3, %v400_v11  ;;  %vm410_vm5 = vcmp.eq.s32.totalorder %v7032_v3, %v408_v12  ;;  %v7060_v16 = vsel %vm409_vm3, 1.0, %v8177_v9  ;;  %v416_v17 = vadd.s32 1, %v408_v12 }
  0x21   : > { %8198 = vst [vmem:[#allocation14_spill] sm:$0xff] %v7060_v16  ;;  %v7063_v18 = vsel %vm402_vm4, 1.0, %v8177_v9  ;;  %v7066_v19 = vsel %vm410_vm5, 1.0, %v8177_v9  ;;  %vm417_vm6 = vcmp.eq.s32.totalorder %v7032_v3, %v415_v15 }
  0x22   : > { %8199 = vst [vmem:[#allocation15_spill] sm:$0xff] %v7063_v18  ;;  %8200 = vst [vmem:[#allocation16_spill] sm:$0xff] %v7066_v19  ;;  %vm418_vm7 = vcmp.eq.s32.totalorder %v7032_v3, %v416_v17  ;;  %v7071_v20 = vsel %vm417_vm6, 1.0, %v8177_v9 }
  0x23   : > { %8201 = vst [vmem:[#allocation17_spill] sm:$0xff] %v7071_v20  ;;  %v7074_v21 = vsel %vm418_vm7, 1.0, %v8177_v9 }
  0x24   : > { %8202 = vst [vmem:[#allocation18_spill] sm:$0xff] %v7074_v21 }
  0x25 LB: >> { %s8203_s1 = sld [smem:[#allocation24_spill]]  ;;  %vm478_vm8 = vcmask 1042432   ;;  %s5276_s30 = sshll.u32 %s6900_s25, 6  ;;  %vm453_vm9 = vcmask 23552   ;;  %vm1805_vm10 = vcmask 506880   ;;  %v8204_v10 = vld [vmem:[#allocation11_spill] sm:$0xff]  ;;  %s6900_s25 = sphi %s7080_s25, %s429_s25  }
  0x26   : >> { %s7100_s12 = scalar_lea.vmem %s7039_s22, %s5276_s30  ;;  %vm1812_vm11 = vcmask 1045504   ;;  %vm2144_vm12 = vcmask 260096   ;;  %vm2142_vm13 = vcmask 261120  }
  0x27   : >> { %v5278_v25 = vld [vmem:[%s7100_s12 + $0x1] sm:$0xff]  ;;  %v5279_v27 = vld [vmem:[%s7100_s12 + $0x9] sm:$0xff]  ;;  %v5280_v29 = vld [vmem:[%s7100_s12 + $0x11] sm:$0xff] }
  0x28   : >> { %v5282_v26 = vld [vmem:[%s7100_s12 + $0x21] sm:$0xff]  ;;  %6073 = vmatprep.mubr.msk.f32.mxu0 %vm453_vm9, %v5278_v25  ;;  %v5283_v28 = vld [vmem:[%s7100_s12 + $0x29] sm:$0xff]  ;;  %v7112_v30 = vld [vmem:[%s7100_s12 + $0x31] sm:$0xff] }
  0x29   : >> { %6079 = vmatprep.mubr.msk.f32.mxu1 %vm453_vm9, %v5282_v26  ;;  %v5281_v33 = vld [vmem:[%s7100_s12 + $0x19] sm:$0xff]  ;;  %v5306_v36 = vld [vmem:[%s7100_s12 + $0x2] sm:$0xff]  ;;  %v5307_v38 = vld [vmem:[%s7100_s12 + $0xa] sm:$0xff] }
  0x2a   : >> { %v5285_v34 = vld [vmem:[%s7100_s12 + $0x39] sm:$0x3f]  ;;  %v432_v35 = vld [vmem:[%s7100_s12] sm:$0xff]  ;;  %v433_v37 = vld [vmem:[%s7100_s12 + $0x8] sm:$0xff] }
  0x2b   : >> { %v5286_v22 = vld [vmem:[%s8203_s1 + $0x4] sm:$0x7]  ;;  %v440_v23 = vld [vmem:[%s8203_s1] sm:$0x7]  ;;  %v5314_v24 = vld [vmem:[%s8203_s1 + $0x8] sm:$0x7] }
  0x2c   : >> { %6753 = vmatprep.subr.msk.mxu1 %vm478_vm8, %v5286_v22  ;;  %6071 = vmatprep.subr.msk.mxu0 %vm478_vm8, %v5286_v22  ;;  %v5333_v31 = vld [vmem:[%s8203_s1 + $0xc] sm:$0x7]  ;;  %v5352_v32 = vld [vmem:[%s8203_s1 + $0x10] sm:$0x7]  ;;  %v5371_v41 = vld [vmem:[%s8203_s1 + $0x14] sm:$0x7] }
  0x2d   : >> { %6754 = vmatpush3.msk.msra.mxu1 %vm478_vm8, %v5286_v22  ;;  %6072 = vmatpush3.msk.msra.mxu0 %vm478_vm8, %v5286_v22  ;;  %v434_v39 = vld [vmem:[%s7100_s12 + $0x10] sm:$0xff]  ;;  %v5390_v42 = vld [vmem:[%s8203_s1 + $0x18] sm:$0x7]  ;;  %v436_v45 = vld [vmem:[%s7100_s12 + $0x20] sm:$0xff] }
  0x2e   : >> { %6085 = vmatprep.subr.msk.mxu1 %vm478_vm8, %v440_v23  ;;  %6099 = vmatprep.subr.msk.mxu0 %vm478_vm8, %v5314_v24  ;;  %v5308_v40 = vld [vmem:[%s7100_s12 + $0x12] sm:$0xff]  ;;  %v5309_v44 = vld [vmem:[%s7100_s12 + $0x1a] sm:$0xff]  ;;  %v5310_v46 = vld [vmem:[%s7100_s12 + $0x22] sm:$0xff] }
  0x2f   : >> { %6074 = vmatmul.mubr.msk.f32.vlgmr.msra.gmra.mxu0 %vm453_vm9, %v5279_v27  ;;  %6080 = vmatmul.mubr.msk.f32.vlgmr.msra.gmra.mxu1 %vm453_vm9, %v5283_v28  ;;  %v435_v43 = vld [vmem:[%s7100_s12 + $0x18] sm:$0xff]  ;;  %v437_v47 = vld [vmem:[%s7100_s12 + $0x28] sm:$0xff]  ;;  %v438_v49 = vld [vmem:[%s7100_s12 + $0x30] sm:$0xff] }
  0x30   : >> { %6086 = vmatpush3.msk.msra.mxu1 %vm478_vm8, %v440_v23  ;;  %6100 = vmatpush3.msk.msra.mxu0 %vm478_vm8, %v5314_v24  ;;  %v5311_v48 = vld [vmem:[%s7100_s12 + $0x2a] sm:$0xff]  ;;  %v5312_v50 = vld [vmem:[%s7100_s12 + $0x32] sm:$0xff]  ;;  %v5313_v52 = vld [vmem:[%s7100_s12 + $0x3a] sm:$0x3f] }
  0x31   : >> { %6076 = vmatprep.mubr.msk.f32.mxu0 %vm453_vm9, %v5280_v29  ;;  %6082 = vmatprep.mubr.msk.f32.mxu1 %vm453_vm9, %v7112_v30  ;;  %v439_v51 = vld [vmem:[%s7100_s12 + $0x38] sm:$0x3f]  ;;  %v5428_v54 = vld [vmem:[%s8203_s1 + $0x20] sm:$0x7]  ;;  %v5330_v59 = vld [vmem:[%s7100_s12 + $0x48] sm:$0xff] }
  0x32   : >> { %6113 = vmatprep.subr.msk.mxu1 %vm478_vm8, %v5333_v31  ;;  %6127 = vmatprep.subr.msk.mxu0 %vm478_vm8, %v5352_v32  ;;  %v5409_v53 = vld [vmem:[%s8203_s1 + $0x1c] sm:$0x7]  ;;  %v5329_v57 = vld [vmem:[%s7100_s12 + $0x40] sm:$0xff]  ;;  %v5349_v60 = vld [vmem:[%s7100_s12 + $0x49] sm:$0xff] }
  0x33   : >> { %6077 = vmatmul.mubr.msk.f32.gmra.mxu0 %vm453_vm9, %v5281_v33  ;;  %6083 = vmatmul.mubr.msk.f32.gmra.mxu1 %vm453_vm9, %v5285_v34  ;;  %v5328_v55 = vld [vmem:[%s7100_s12 + $0x38] sm:$0xff]  ;;  %v5348_v58 = vld [vmem:[%s7100_s12 + $0x41] sm:$0xff]  ;;  %v5331_v61 = vld [vmem:[%s7100_s12 + $0x50] sm:$0xff] }
  0x34   : >> { %6087 = vmatprep.mubr.msk.f32.mxu1 %vm453_vm9, %v432_v35  ;;  %6101 = vmatprep.mubr.msk.f32.mxu0 %vm453_vm9, %v5306_v36  ;;  %v5347_v56 = vld [vmem:[%s7100_s12 + $0x39] sm:$0xff]  ;;  %v5350_v62 = vld [vmem:[%s7100_s12 + $0x51] sm:$0xff]  ;;  %v5367_v6 = vld [vmem:[%s7100_s12 + $0x42] sm:$0xff] }
  0x35   : >> { %v5332_v63 = vld [vmem:[%s7100_s12 + $0x58] sm:$0x3f]  ;;  %v5386_v7 = vld [vmem:[%s7100_s12 + $0x60] sm:$0xff]  ;;  %v5368_v8 = vld [vmem:[%s7100_s12 + $0x4a] sm:$0xff] }
  0x36   : >> { %v5351_v0 = vld [vmem:[%s7100_s12 + $0x59] sm:$0x3f]  ;;  %v5387_v11 = vld [vmem:[%s7100_s12 + $0x68] sm:$0xff]  ;;  %v5388_v15 = vld [vmem:[%s7100_s12 + $0x70] sm:$0xff] }
  0x37   : >> { %6088 = vmatmul.mubr.msk.f32.vlgmr.msra.gmra.mxu1 %vm453_vm9, %v433_v37  ;;  %6102 = vmatmul.mubr.msk.f32.vlgmr.msra.gmra.mxu0 %vm453_vm9, %v5307_v38  ;;  %v5366_v2 = vld [vmem:[%s7100_s12 + $0x3a] sm:$0xff]  ;;  %v5369_v12 = vld [vmem:[%s7100_s12 + $0x52] sm:$0xff]  ;;  %v5406_v27 = vld [vmem:[%s7100_s12 + $0x69] sm:$0xff] }
  0x38   : >> { %6114 = vmatpush3.msk.msra.mxu1 %vm478_vm8, %v5333_v31  ;;  %6128 = vmatpush3.msk.msra.mxu0 %vm478_vm8, %v5352_v32  ;;  %v5385_v4 = vld [vmem:[%s7100_s12 + $0x58] sm:$0xff]  ;;  %v5405_v25 = vld [vmem:[%s7100_s12 + $0x61] sm:$0xff] }
  0x39   : >> { %6090 = vmatprep.mubr.msk.f32.mxu1 %vm453_vm9, %v434_v39  ;;  %6104 = vmatprep.mubr.msk.f32.mxu0 %vm453_vm9, %v5308_v40  ;;  %v5370_v17 = vld [vmem:[%s7100_s12 + $0x5a] sm:$0x3f]  ;;  %v5407_v29 = vld [vmem:[%s7100_s12 + $0x71] sm:$0xff] }
  0x3a   : >> { %6141 = vmatprep.subr.msk.mxu1 %vm478_vm8, %v5371_v41  ;;  %6155 = vmatprep.subr.msk.mxu0 %vm478_vm8, %v5390_v42  ;;  %v5389_v22 = vld [vmem:[%s7100_s12 + $0x78] sm:$0x3f]  ;;  %v8205_v14 = vld [vmem:[#allocation13_spill] sm:$0xff] }
  0x3b   : >> { %6091 = vmatmul.mubr.msk.f32.gmra.mxu1 %vm453_vm9, %v435_v43  ;;  %6105 = vmatmul.mubr.msk.f32.gmra.mxu0 %vm453_vm9, %v5309_v44  ;;  %v5404_v23 = vld [vmem:[%s7100_s12 + $0x59] sm:$0xff] }
  0x3c   : >> { %6093 = vmatprep.mubr.msk.f32.mxu1 %vm453_vm9, %v436_v45  ;;  %6107 = vmatprep.mubr.msk.f32.mxu0 %vm453_vm9, %v5310_v46  ;;  %v5423_v24 = vld [vmem:[%s7100_s12 + $0x5a] sm:$0xff] }
  0x3d   : >> { %v5408_v31 = vld [vmem:[%s7100_s12 + $0x79] sm:$0x3f] }
  0x3e   : >> { %v5427_v32 = vld [vmem:[%s7100_s12 + $0x7a] sm:$0x3f] }
  0x3f   : >> { %6094 = vmatmul.mubr.msk.f32.gmra.mxu1 %vm453_vm9, %v437_v47  ;;  %6108 = vmatmul.mubr.msk.f32.gmra.mxu0 %vm453_vm9, %v5311_v48 }
  0x40   : >> { %6096 = vmatprep.mubr.msk.f32.mxu1 %vm453_vm9, %v438_v49  ;;  %6110 = vmatprep.mubr.msk.f32.mxu0 %vm453_vm9, %v5312_v50 }
  0x43   : >> { %6097 = vmatmul.mubr.msk.f32.gmra.mxu1 %vm453_vm9, %v439_v51  ;;  %6111 = vmatmul.mubr.msk.f32.gmra.mxu0 %vm453_vm9, %v5313_v52 }
  0x44   : >> { %6115 = vmatprep.mubr.msk.f32.mxu1 %vm453_vm9, %v436_v45  ;;  %6129 = vmatprep.mubr.msk.f32.mxu0 %vm453_vm9, %v5282_v26  ;;  %v5424_v26 = vld [vmem:[%s7100_s12 + $0x62] sm:$0xff] }
  0x47   : >> { %6116 = vmatmul.mubr.msk.f32.vlgmr.msra.gmra.mxu1 %vm453_vm9, %v437_v47  ;;  %6130 = vmatmul.mubr.msk.f32.vlgmr.msra.gmra.mxu0 %vm453_vm9, %v5283_v28  ;;  %v5425_v28 = vld [vmem:[%s7100_s12 + $0x6a] sm:$0xff] }
  0x48   : >> { %6142 = vmatpush3.msk.msra.mxu1 %vm478_vm8, %v5371_v41  ;;  %6156 = vmatpush3.msk.msra.mxu0 %vm478_vm8, %v5390_v42 }
  0x49   : >> { %6118 = vmatprep.mubr.msk.f32.mxu1 %vm453_vm9, %v438_v49  ;;  %6132 = vmatprep.mubr.msk.f32.mxu0 %vm453_vm9, %v7112_v30  ;;  %v5426_v30 = vld [vmem:[%s7100_s12 + $0x72] sm:$0xff]  ;;  %s2140_s12 = smul.u32 15, %s6900_s25  ;;  %s429_s25 = sadd.s32 1, %s6900_s25  }
  0x4a   : >> { %6169 = vmatprep.subr.msk.mxu1 %vm478_vm8, %v5409_v53  ;;  %6183 = vmatprep.subr.msk.mxu0 %vm478_vm8, %v5428_v54  ;;  %p426_p11 = scmp.ge.s32.totalorder %s429_s25, 15  }
  0x4b   : >> { %6119 = vmatmul.mubr.msk.f32.gmra.mxu1 %vm453_vm9, %v5328_v55  ;;  %6133 = vmatmul.mubr.msk.f32.gmra.mxu0 %vm453_vm9, %v5347_v56  ;;  %s2141_s15 = scalar_lea.vmem [#allocation2], %s2140_s12  ;;  %s7374_s25 = smov (%p426_p11), 0  }
  0x4c   : >> { %6121 = vmatprep.mubr.msk.f32.mxu1 %vm453_vm9, %v5329_v57  ;;  %6135 = vmatprep.mubr.msk.f32.mxu0 %vm453_vm9, %v5348_v58 }
  0x4f   : >> { %6122 = vmatmul.mubr.msk.f32.gmra.mxu1 %vm453_vm9, %v5330_v59  ;;  %6136 = vmatmul.mubr.msk.f32.gmra.mxu0 %vm453_vm9, %v5349_v60 }
  0x50   : >> { %6124 = vmatprep.mubr.msk.f32.mxu1 %vm453_vm9, %v5331_v61  ;;  %6138 = vmatprep.mubr.msk.f32.mxu0 %vm453_vm9, %v5350_v62 }
  0x53   : >> { %6125 = vmatmul.mubr.msk.f32.gmra.mxu1 %vm453_vm9, %v5332_v63  ;;  %6139 = vmatmul.mubr.msk.f32.gmra.mxu0 %vm453_vm9, %v5351_v0 }
  0x54   : >> { %6143 = vmatprep.mubr.msk.f32.mxu1 %vm453_vm9, %v5310_v46  ;;  %6157 = vmatprep.mubr.msk.f32.mxu0 %vm453_vm9, %v5329_v57 }
  0x57   : >> { %6144 = vmatmul.mubr.msk.f32.vlgmr.msra.gmra.mxu1 %vm453_vm9, %v5311_v48  ;;  %6158 = vmatmul.mubr.msk.f32.vlgmr.msra.gmra.mxu0 %vm453_vm9, %v5330_v59 }
  0x58   : >> { %6170 = vmatpush3.msk.msra.mxu1 %vm478_vm8, %v5409_v53  ;;  %6184 = vmatpush3.msk.msra.mxu0 %vm478_vm8, %v5428_v54 }
  0x59   : >> { %6146 = vmatprep.mubr.msk.f32.mxu1 %vm453_vm9, %v5312_v50  ;;  %6160 = vmatprep.mubr.msk.f32.mxu0 %vm453_vm9, %v5331_v61 }
  0x5b   : >> { %6147 = vmatmul.mubr.msk.f32.gmra.mxu1 %vm453_vm9, %v5366_v2  ;;  %6161 = vmatmul.mubr.msk.f32.gmra.mxu0 %vm453_vm9, %v5385_v4 }
  0x5c   : >> { %6149 = vmatprep.mubr.msk.f32.mxu1 %vm453_vm9, %v5367_v6  ;;  %6163 = vmatprep.mubr.msk.f32.mxu0 %vm453_vm9, %v5386_v7 }
  0x5f   : >> { %6150 = vmatmul.mubr.msk.f32.gmra.mxu1 %vm453_vm9, %v5368_v8  ;;  %6164 = vmatmul.mubr.msk.f32.gmra.mxu0 %vm453_vm9, %v5387_v11 }
  0x60   : >> { %6152 = vmatprep.mubr.msk.f32.mxu1 %vm453_vm9, %v5369_v12  ;;  %6166 = vmatprep.mubr.msk.f32.mxu0 %vm453_vm9, %v5388_v15 }
  0x63   : >> { %6153 = vmatmul.mubr.msk.f32.gmra.mxu1 %vm453_vm9, %v5370_v17  ;;  %6167 = vmatmul.mubr.msk.f32.gmra.mxu0 %vm453_vm9, %v5389_v22 }
  0x64   : >> { %6171 = vmatprep.mubr.msk.f32.mxu1 %vm453_vm9, %v5348_v58  ;;  %6185 = vmatprep.mubr.msk.f32.mxu0 %vm453_vm9, %v5367_v6 }
  0x67   : >> { %6172 = vmatmul.mubr.msk.f32.vlgmr.msra.gmra.mxu1 %vm453_vm9, %v5349_v60  ;;  %6186 = vmatmul.mubr.msk.f32.vlgmr.msra.gmra.mxu0 %vm453_vm9, %v5368_v8 }
  0x68   : >> { %6174 = vmatprep.mubr.msk.f32.mxu1 %vm453_vm9, %v5350_v62  ;;  %6188 = vmatprep.mubr.msk.f32.mxu0 %vm453_vm9, %v5369_v12 }
  0x6b   : >> { %6175 = vmatmul.mubr.msk.f32.gmra.mxu1 %vm453_vm9, %v5404_v23  ;;  %6189 = vmatmul.mubr.msk.f32.gmra.mxu0 %vm453_vm9, %v5423_v24 }
  0x6c   : >> { %6177 = vmatprep.mubr.msk.f32.mxu1 %vm453_vm9, %v5405_v25  ;;  %6191 = vmatprep.mubr.msk.f32.mxu0 %vm453_vm9, %v5424_v26 }
  0x6f   : >> { %6178 = vmatmul.mubr.msk.f32.gmra.mxu1 %vm453_vm9, %v5406_v27  ;;  %6192 = vmatmul.mubr.msk.f32.gmra.mxu0 %vm453_vm9, %v5425_v28 }
  0x70   : >> { %6180 = vmatprep.mubr.msk.f32.mxu1 %vm453_vm9, %v5407_v29  ;;  %6194 = vmatprep.mubr.msk.f32.mxu0 %vm453_vm9, %v5426_v30 }
  0x73   : >> { %6181 = vmatmul.mubr.msk.f32.gmra.mxu1 %vm453_vm9, %v5408_v31  ;;  %6195 = vmatmul.mubr.msk.f32.gmra.mxu0 %vm453_vm9, %v5427_v32 }
  0x74   : >> { %6213 = vmatprep.mubr.msk.f32.mxu1 %vm1805_vm10, %v8204_v10  ;;  %6232 = vmatprep.mubr.msk.f32.mxu0 %vm1805_vm10, %v8205_v14 }
  0xef   : >> { %v7270_v33 = vpop.f32.mrf.mxu0  ;;  %v6081_v34 = vpop.f32.mrf.mxu1 }
  0xf1   : >> { %v7272_v35 = vpop.f32.mrf.mxu0  ;;  %v568_v36 = vpop.f32.mrf.mxu1 }
  0xf3   : >> { %v6078_v37 = vpop.f32.mrf.mxu0  ;;  %v6084_v38 = vpop.f32.mrf.mxu1 }
  0xf5   : >> { %v558_v39 = vpop.f32.mrf.mxu0  ;;  %v578_v40 = vpop.f32.mrf.mxu1 }
  0xf7   : >> { %v6089_v41 = vpop.f32.mrf.mxu1  ;;  %v7274_v42 = vpop.f32.mrf.mxu0 }
  0xf9   : >> { %v7276_v43 = vpop.f32.mrf.mxu1  ;;  %v7278_v44 = vpop.f32.mrf.mxu0 }
  0xfb   : >> { %v6092_v45 = vpop.f32.mrf.mxu1  ;;  %v6106_v46 = vpop.f32.mrf.mxu0 }
  0xfc   : >> { %v696_v21 = vadd.f32 %v6092_v45, %v6078_v37  ;;  %v681_v37 = vadd.f32 %v7276_v43, %v7272_v35 }
  0xfd   : >> { %v690_v47 = vpop.f32.mrf.mxu1  ;;  %v834_v48 = vpop.f32.mrf.mxu0 }
  0xfe   : >> { %v691_v16 = vadd.f32 %v690_v47, %v558_v39 }
  0xff   : >> { %v6095_v49 = vpop.f32.mrf.mxu1  ;;  %v6109_v50 = vpop.f32.mrf.mxu0 }
 0x100   : >> { %v706_v31 = vadd.f32 %v6095_v49, %v6081_v34  ;;  %v866_v49 = vadd.f32 %v6106_v46, %v696_v21 }
 0x101   : >> { %v700_v51 = vpop.f32.mrf.mxu1  ;;  %v844_v52 = vpop.f32.mrf.mxu0 }
 0x102   : >> { %v701_v14 = vadd.f32 %v700_v51, %v568_v36  ;;  %v868_v19 = vadd.f32 %v6109_v50, %v706_v31 }
 0x103   : >> { %v6098_v53 = vpop.f32.mrf.mxu1  ;;  %v6112_v54 = vpop.f32.mrf.mxu0 }
 0x104   : >> { %v716_v10 = vadd.f32 %v6098_v53, %v6084_v38 }
 0x105   : >> { %v710_v55 = vpop.f32.mrf.mxu1  ;;  %v854_v56 = vpop.f32.mrf.mxu0 }
 0x106   : >> { %v711_v20 = vadd.f32 %v710_v55, %v578_v40  ;;  %v870_v1 = vadd.f32 %v6112_v54, %v716_v10  ;;  %v865_v40 = vadd.f32 %v834_v48, %v691_v16 }
 0x107   : >> { %v7280_v57 = vpop.f32.mrf.mxu1  ;;  %v7282_v58 = vpop.f32.mrf.mxu0 }
 0x108   : >> { %v869_v36 = vadd.f32 %v854_v56, %v711_v20 }
 0x109   : >> { %v7284_v59 = vpop.f32.mrf.mxu1  ;;  %v7286_v60 = vpop.f32.mrf.mxu0 }
 0x10b   : >> { %v6120_v61 = vpop.f32.mrf.mxu1  ;;  %v6134_v62 = vpop.f32.mrf.mxu0 }
 0x10d   : >> { %v986_v63 = vpop.f32.mrf.mxu1  ;;  %v7288_v0 = vpop.f32.mrf.mxu0 }
 0x10f   : >> { %v6123_v2 = vpop.f32.mrf.mxu1  ;;  %v6137_v4 = vpop.f32.mrf.mxu0 }
 0x111   : >> { %v996_v6 = vpop.f32.mrf.mxu1  ;;  %v1148_v7 = vpop.f32.mrf.mxu0 }
 0x113   : >> { %v6126_v8 = vpop.f32.mrf.mxu1  ;;  %v6140_v11 = vpop.f32.mrf.mxu0 }
 0x114   : >> { %v1022_v51 = vadd.f32 %v6126_v8, %v870_v1  ;;  %v863_v1 = vadd.f32 %v7278_v44, %v681_v37 }
 0x115   : >> { %v1006_v12 = vpop.f32.mrf.mxu1  ;;  %v1158_v15 = vpop.f32.mrf.mxu0 }
 0x116   : >> { %v1174_v21 = vadd.f32 %v6140_v11, %v1022_v51  ;;  %v1015_v55 = vadd.f32 %v7284_v59, %v863_v1 }
 0x117   : >> { %v7290_v17 = vpop.f32.mrf.mxu1  ;;  %v7292_v22 = vpop.f32.mrf.mxu0 }
 0x118   : >> { %8206 = vst [vmem:[#allocation19_spill] sm:$0xff] %v7292_v22  ;;  %v1020_v22 = vadd.f32 %v6123_v2, %v868_v19  ;;  %v1021_v19 = vadd.f32 %v1006_v12, %v869_v36  ;;  %v1167_v12 = vadd.f32 %v7286_v60, %v1015_v55  ;;  %v8217_v55 = vld [vmem:[#allocation14_spill] sm:$0xff] }
 0x119   : >> { %v7294_v23 = vpop.f32.mrf.mxu1  ;;  %v7296_v24 = vpop.f32.mrf.mxu0 }
 0x11a   : >> { %8207 = vst [vmem:[#allocation20_spill] sm:$0xff] %v7294_v23  ;;  %8208 = vst [vmem:[#allocation21_spill] sm:$0xff] %v7296_v24  ;;  %v867_v24 = vadd.f32 %v844_v52, %v701_v14  ;;  %v1018_v14 = vadd.f32 %v6120_v61, %v866_v49  ;;  %v1172_v10 = vadd.f32 %v6137_v4, %v1020_v22 }
 0x11b   : >> { %v6148_v25 = vpop.f32.mrf.mxu1  ;;  %v7298_v26 = vpop.f32.mrf.mxu0  ;;  %v1173_v48 = vadd.f32 %v1158_v15, %v1021_v19 }
 0x11c   : >> { %v1019_v38 = vadd.f32 %v996_v6, %v867_v24  ;;  %v1170_v43 = vadd.f32 %v6134_v62, %v1018_v14 }
 0x11d   : >> { %v1290_v27 = vpop.f32.mrf.mxu1  ;;  %v7300_v28 = vpop.f32.mrf.mxu0 }
 0x11e   : >> { %8209 = vst [vmem:[#allocation22_spill] sm:$0xff] %v7300_v28  ;;  %v686_v28 = vadd.f32 %v6089_v41, %v7270_v33  ;;  %v1017_v41 = vadd.f32 %v986_v63, %v865_v40  ;;  %v1171_v52 = vadd.f32 %v1148_v7, %v1019_v38  ;;  %v1322_v63 = vadd.f32 %v6148_v25, %v1170_v43  ;;  %v8213_v38 = vld [vmem:[#allocation8_spill] sm:$0xff] }
 0x11f   : >> { %v6151_v29 = vpop.f32.mrf.mxu1  ;;  %v6165_v30 = vpop.f32.mrf.mxu0 }
 0x120   : >> { %v864_v33 = vadd.f32 %v7274_v42, %v686_v28  ;;  %v1324_v20 = vadd.f32 %v6151_v29, %v1172_v10  ;;  %v1169_v42 = vadd.f32 %v7288_v0, %v1017_v41  ;;  %v1474_v0 = vadd.f32 %v7298_v26, %v1322_v63 }
 0x121   : >> { %v1300_v32 = vpop.f32.mrf.mxu1  ;;  %v1452_v9 = vpop.f32.mrf.mxu0 }
 0x122   : >> { %v1016_v46 = vadd.f32 %v7280_v57, %v864_v33  ;;  %v1323_v53 = vadd.f32 %v1300_v32, %v1171_v52  ;;  %v1476_v2 = vadd.f32 %v6165_v30, %v1324_v20  ;;  %v1321_v44 = vadd.f32 %v1290_v27, %v1169_v42  ;;  %v8212_v32 = vld [vmem:[#allocation19_spill] sm:$0xff]  ;;  %v8218_v42 = vld [vmem:[#allocation17_spill] sm:$0xff] }
 0x123   : >> { %v6154_v3 = vpop.f32.mrf.mxu1  ;;  %v6168_v5 = vpop.f32.mrf.mxu0 }
 0x124   : >> { %v1326_v54 = vadd.f32 %v6154_v3, %v1174_v21  ;;  %v1168_v6 = vadd.f32 %v7282_v58, %v1016_v46  ;;  %v1475_v8 = vadd.f32 %v1452_v9, %v1323_v53  ;;  %v8215_v53 = vld [vmem:[#allocation12_spill] sm:$0xff] }
 0x125   : >> { %v1310_v18 = vpop.f32.mrf.mxu1  ;;  %v1462_v13 = vpop.f32.mrf.mxu0  ;;  %v8211_v58 = vld [vmem:[#allocation22_spill] sm:$0xff] }
 0x126   : >> { %v1325_v4 = vadd.f32 %v1310_v18, %v1173_v48  ;;  %v1478_v11 = vadd.f32 %v6168_v5, %v1326_v54  ;;  %v1320_v3 = vadd.f32 %v7290_v17, %v1168_v6  ;;  %v8210_v18 = vld [vmem:[#allocation20_spill] sm:$0xff]  ;;  %v1473_v27 = vadd.f32 %v8211_v58, %v1321_v44  ;;  %v8216_v54 = vld [vmem:[#allocation15_spill] sm:$0xff] }
 0x127   : >> { %v7303_v23 = vpop.f32.mrf.mxu1  ;;  %v7305_v34 = vpop.f32.mrf.mxu0  ;;  %v1319_v28 = vadd.f32 %v8210_v18, %v1167_v12 }
 0x128   : >> { %v1477_v22 = vadd.f32 %v1462_v13, %v1325_v4  ;;  %v1472_v60 = vadd.f32 %v8212_v32, %v1320_v3  ;;  %v8214_v13 = vld [vmem:[#allocation21_spill] sm:$0xff] }
 0x129   : >> { %v1584_v39 = vpop.f32.mrf.mxu1  ;;  %v7309_v45 = vpop.f32.mrf.mxu0  ;;  %v1471_v37 = vadd.f32 %v8214_v13, %v1319_v28  ;;  %v8223_v28 = vmov (%p426_p11), 0.0  }
 0x12a   : >> { %v1624_v40 = vadd.f32 %v7303_v23, %v1472_v60 }
 0x12b   : >> { %v6176_v47 = vpop.f32.mrf.mxu1  ;;  %v6190_v50 = vpop.f32.mrf.mxu0  ;;  %v1623_v41 = vadd.f32 %v1584_v39, %v1471_v37 }
 0x12c   : >> { %v1626_v30 = vadd.f32 %v6176_v47, %v1474_v0  ;;  %v1776_v23 = vadd.f32 %v7305_v34, %v1624_v40  ;;  %v8221_v0 = vld [vmem:[#allocation10_spill] sm:$0xff] (%p426_p11) }
 0x12d   : >> { %v1594_v35 = vpop.f32.mrf.mxu1  ;;  %v1746_v16 = vpop.f32.mrf.mxu0  ;;  %v1775_v39 = vadd.f32 %v7309_v45, %v1623_v41 }
 0x12e   : >> { %v1625_v17 = vadd.f32 %v1594_v35, %v1473_v27  ;;  %v1778_v14 = vadd.f32 %v6190_v50, %v1626_v30  ;;  %v1790_v35 = vadd.f32 %v8213_v38, %v1776_v23 }
 0x12f   : >> { %v6179_v56 = vpop.f32.mrf.mxu1  ;;  %v6193_v61 = vpop.f32.mrf.mxu0  ;;  %v1789_v34 = vadd.f32 %v8213_v38, %v1775_v39 }
 0x130   : >> { %v1628_v62 = vadd.f32 %v6179_v56, %v1476_v2  ;;  %v1777_v47 = vadd.f32 %v1746_v16, %v1625_v17  ;;  %v1792_v50 = vadd.f32 %v8213_v38, %v1778_v14  ;;  %v1798_v45 = vmax.f32 %v1790_v35, 0.0  ;;  %v8219_v56 = vld [vmem:[#allocation16_spill] sm:$0xff] }
 0x131   : >> { %v1604_v7 = vpop.f32.mrf.mxu1  ;;  %v1756_v57 = vpop.f32.mrf.mxu0  ;;  %v1797_v48 = vmax.f32 %v1789_v34, 0.0 }
 0x132   : >> { %v1627_v24 = vadd.f32 %v1604_v7, %v1475_v8  ;;  %v1780_v9 = vadd.f32 %v6193_v61, %v1628_v62  ;;  %v1791_v1 = vadd.f32 %v8213_v38, %v1777_v47  ;;  %v1800_v16 = vmax.f32 %v1792_v50, 0.0  ;;  %v8220_v61 = vld [vmem:[#allocation18_spill] sm:$0xff] }
 0x133   : >> { %v6182_v59 = vpop.f32.mrf.mxu1  ;;  %v6196_v15 = vpop.f32.mrf.mxu0 }
 0x134   : >> { %v1630_v25 = vadd.f32 %v6182_v59, %v1478_v11  ;;  %v1779_v36 = vadd.f32 %v1756_v57, %v1627_v24  ;;  %v1794_v10 = vadd.f32 %v8213_v38, %v1780_v9  ;;  %v1799_v43 = vmax.f32 %v1791_v1, 0.0  ;;  %v7364_v24 = vld [vmem:[%s8169_s4] ss:$0 sm:$0xff] (%p426_p11) }
 0x135   : >> { %v1614_v29 = vpop.f32.mrf.mxu1  ;;  %v1766_v49 = vpop.f32.mrf.mxu0 }
 0x136   : >> { %v1782_v5 = vadd.f32 %v6196_v15, %v1630_v25  ;;  %v1629_v31 = vadd.f32 %v1614_v29, %v1477_v22  ;;  %v1793_v52 = vadd.f32 %v8213_v38, %v1779_v36  ;;  %v1802_v20 = vmax.f32 %v1794_v10, 0.0  ;;  %v8222_v25 = vld [vmem:[#allocation9_spill] sm:$0xff] (%p426_p11) }
 0x137   : > { %v2146_v22 = vadd.s32 (%p426_p11), 15, %v8221_v0 }
 0x138   : >> { %v1796_v51 = vadd.f32 %v8213_v38, %v1782_v5  ;;  %v1781_v26 = vadd.f32 %v1766_v49, %v1629_v31  ;;  %v1801_v46 = vmax.f32 %v1793_v52, 0.0 }
 0x139   : > { %vm2147_vm14 = vcmp.eq.s32.totalorder (%p426_p11), %v8222_v25, %v2146_v22  ;;  %v2150_v18 = vadd.s32 (%p426_p11), 1, %v2146_v22 }
 0x13a   : >> { %v1804_v19 = vmax.f32 %v1796_v51, 0.0  ;;  %v1795_v33 = vadd.f32 %v8213_v38, %v1781_v26  ;;  %v7368_v58 = vsel (%p426_p11), %vm2147_vm14, 1.0, %v8223_v28 }
 0x13b   : > { %vm2151_vm15 = vcmp.eq.s32.totalorder (%p426_p11), %v8222_v25, %v2150_v18 }
 0x13c   : >> { %v1803_v21 = vmax.f32 %v1795_v33, 0.0  ;;  %6197 = vmatprep.subr.msk.mxu1 %vm1812_vm11, %v1804_v19  ;;  %6216 = vmatprep.subr.msk.mxu0 %vm1812_vm11, %v1804_v19  ;;  %v7372_v27 = vsel (%p426_p11), %vm2151_vm15, 1.0, %v8223_v28 }
 0x13d   : >> { %6198 = vmatpush3.msk.msra.mxu1 %vm1812_vm11, %v1804_v19  ;;  %6217 = vmatpush3.msk.msra.mxu0 %vm1812_vm11, %v1804_v19 }
 0x13e   : >> { %6199 = vmatprep.subr.mxu1 %v1803_v21  ;;  %6218 = vmatprep.subr.mxu0 %v1803_v21 }
 0x13f   : >> { %6200 = vmatpush3.msra.mxu1 %v1803_v21  ;;  %6219 = vmatpush3.msra.mxu0 %v1803_v21 }
 0x140   : >> { %6201 = vmatprep.subr.mxu1 %v1802_v20  ;;  %6220 = vmatprep.subr.mxu0 %v1802_v20 }
 0x141   : >> { %6202 = vmatpush3.msra.mxu1 %v1802_v20  ;;  %6221 = vmatpush3.msra.mxu0 %v1802_v20 }
 0x142   : >> { %6203 = vmatprep.subr.mxu1 %v1801_v46  ;;  %6222 = vmatprep.subr.mxu0 %v1801_v46 }
 0x143   : >> { %6204 = vmatpush3.msra.mxu1 %v1801_v46  ;;  %6223 = vmatpush3.msra.mxu0 %v1801_v46 }
 0x144   : >> { %6205 = vmatprep.subr.mxu1 %v1800_v16  ;;  %6224 = vmatprep.subr.mxu0 %v1800_v16 }
 0x145   : >> { %6206 = vmatpush3.msra.mxu1 %v1800_v16  ;;  %6225 = vmatpush3.msra.mxu0 %v1800_v16 }
 0x146   : >> { %6207 = vmatprep.subr.mxu1 %v1799_v43  ;;  %6226 = vmatprep.subr.mxu0 %v1799_v43 }
 0x147   : >> { %6208 = vmatpush3.msra.mxu1 %v1799_v43  ;;  %6227 = vmatpush3.msra.mxu0 %v1799_v43 }
 0x148   : >> { %6209 = vmatprep.subr.mxu1 %v1798_v45  ;;  %6228 = vmatprep.subr.mxu0 %v1798_v45 }
 0x149   : >> { %6210 = vmatpush3.msra.mxu1 %v1798_v45  ;;  %6229 = vmatpush3.msra.mxu0 %v1798_v45 }
 0x14a   : >> { %6211 = vmatprep.subr.mxu1 %v1797_v48  ;;  %6230 = vmatprep.subr.mxu0 %v1797_v48 }
 0x14b   : >> { %6212 = vmatpush3.msra.mxu1 %v1797_v48  ;;  %6231 = vmatpush3.msra.mxu0 %v1797_v48 }
 0x14c   : >> { %6214 = vmatmul.mubr.msk.f32.vlgmr.msra.gmra.mxu1 %vm1805_vm10, %v8215_v53  ;;  %6233 = vmatmul.mubr.msk.f32.vlgmr.msra.gmra.mxu0 %vm1805_vm10, %v8216_v54 }
 0x14d   : >> { %6235 = vmatprep.subr.msk.mxu1 %vm1812_vm11, %v1804_v19  ;;  %6254 = vmatprep.subr.msk.mxu0 %vm1812_vm11, %v1804_v19 }
 0x14e   : >> { %6236 = vmatpush3.msk.msra.mxu1 %vm1812_vm11, %v1804_v19  ;;  %6255 = vmatpush3.msk.msra.mxu0 %vm1812_vm11, %v1804_v19 }
 0x14f   : >> { %6237 = vmatprep.subr.mxu1 %v1803_v21  ;;  %6256 = vmatprep.subr.mxu0 %v1803_v21 }
 0x150   : >> { %6238 = vmatpush3.msra.mxu1 %v1803_v21  ;;  %6257 = vmatpush3.msra.mxu0 %v1803_v21 }
 0x151   : >> { %6239 = vmatprep.subr.mxu1 %v1802_v20  ;;  %6258 = vmatprep.subr.mxu0 %v1802_v20 }
 0x152   : >> { %6240 = vmatpush3.msra.mxu1 %v1802_v20  ;;  %6259 = vmatpush3.msra.mxu0 %v1802_v20 }
 0x153   : >> { %6241 = vmatprep.subr.mxu1 %v1801_v46  ;;  %6260 = vmatprep.subr.mxu0 %v1801_v46 }
 0x154   : >> { %6242 = vmatpush3.msra.mxu1 %v1801_v46  ;;  %6261 = vmatpush3.msra.mxu0 %v1801_v46 }
 0x155   : >> { %6243 = vmatprep.subr.mxu1 %v1800_v16  ;;  %6262 = vmatprep.subr.mxu0 %v1800_v16 }
 0x156   : >> { %6244 = vmatpush3.msra.mxu1 %v1800_v16  ;;  %6263 = vmatpush3.msra.mxu0 %v1800_v16 }
 0x157   : >> { %6245 = vmatprep.subr.mxu1 %v1799_v43  ;;  %6264 = vmatprep.subr.mxu0 %v1799_v43 }
 0x158   : >> { %6246 = vmatpush3.msra.mxu1 %v1799_v43  ;;  %6265 = vmatpush3.msra.mxu0 %v1799_v43 }
 0x159   : >> { %6247 = vmatprep.subr.mxu1 %v1798_v45  ;;  %6266 = vmatprep.subr.mxu0 %v1798_v45 }
 0x15a   : >> { %6248 = vmatpush3.msra.mxu1 %v1798_v45  ;;  %6267 = vmatpush3.msra.mxu0 %v1798_v45 }
 0x15b   : >> { %6249 = vmatprep.subr.mxu1 %v1797_v48  ;;  %6268 = vmatprep.subr.mxu0 %v1797_v48 }
 0x15c   : >> { %6250 = vmatpush3.msra.mxu1 %v1797_v48  ;;  %6251 = vmatprep.mubr.msk.f32.mxu1 %vm1805_vm10, %v8217_v55 }
 0x15d   : >> { %6269 = vmatpush3.msra.mxu0 %v1797_v48  ;;  %6270 = vmatprep.mubr.msk.f32.mxu0 %vm1805_vm10, %v8218_v42 }
 0x15e   : >> { %6252 = vmatmul.mubr.msk.f32.vlgmr.msra.gmra.mxu1 %vm1805_vm10, %v8219_v56  ;;  %6271 = vmatmul.mubr.msk.f32.vlgmr.msra.gmra.mxu0 %vm1805_vm10, %v8220_v61 }
 0x20c   : >> { %v6215_v63 = vpop.f32.mrf.mxu1  ;;  %v6234_v2 = vpop.f32.mrf.mxu0 }
 0x20d   : >> { %v1973_v57 = vmax.f32 %v6215_v63, %v6234_v2 }
 0x20e   : >> { %v1882_v4 = vpop.f32.mrf.mxu1  ;;  %v1963_v6 = vpop.f32.mrf.mxu0 }
 0x20f   : >> { %v1972_v12 = vmax.f32 %v1882_v4, %v1963_v6 }
 0x21e   : >> { %v6253_v44 = vpop.f32.mrf.mxu1  ;;  %v6272_v7 = vpop.f32.mrf.mxu0 }
 0x21f   : >> { %v2137_v8 = vmax.f32 %v6253_v44, %v6272_v7 }
 0x220   : >> { %v2046_v11 = vpop.f32.mrf.mxu1  ;;  %v2127_v62 = vpop.f32.mrf.mxu0 }
 0x221   : >> { %v2139_v3 = vmax.f32 %v1973_v57, %v2137_v8  ;;  %v2136_v59 = vmax.f32 %v2046_v11, %v2127_v62  ;;  %428 = sbr.rel (!%p426_p11) target bundleno = 37 (0x25), region = 177 }
 0x223   : >> { %2145 = vst.msk [vmem:[%s2141_s15 + $0x8] sm:$0x7f] %vm2144_vm12, %v2139_v3  ;;  %v2138_v15 = vmax.f32 %v1972_v12, %v2136_v59 }
 0x225   : >> { %2143 = vst.msk [vmem:[%s2141_s15] sm:$0xff] %vm2142_vm13, %v2138_v15 }
 0x226 LB: >> { %v5460_v29 = vld [vmem:[%s8168_s3 + $0x38] sm:$0xff]  ;;  %v5459_v9 = vld [vmem:[%s8168_s3 + $0x30] sm:$0xff]  ;;  %v5458_v31 = vld [vmem:[%s8168_s3 + $0x28] sm:$0xff]  ;;  %s2161_s14 = smul.u32 30, %s6904_s25  ;;  %vm6912_vm0 = vmmov 0   ;;  %vm3179_vm1 = vcmask 1043456   ;;  %s6904_s25 = sphi %s7374_s25, %s2160_s25  }
 0x227   : >> { %v2170_v30 = vld [vmem:[%s8168_s3 + $0x18] sm:$0xff]  ;;  %6273 = vmatprep.subr.mxu0 %v5460_v29  ;;  %v2169_v5 = vld [vmem:[%s8168_s3 + $0x10] sm:$0xff]  ;;  %v2168_v32 = vld [vmem:[%s8168_s3 + $0x8] sm:$0xff]  ;;  %vm3175_vm2 = vcmask 228352   ;;  %vm3477_vm3 = vcmask 521216  }
 0x228   : >> { %6287 = vmatprep.subr.mxu1 %v2170_v30  ;;  %6274 = vmatpush3.msra.mxu0 %v5460_v29  ;;  %v5457_v60 = vld [vmem:[%s8168_s3 + $0x20] sm:$0xff]  ;;  %s7404_s0 = scalar_lea.vmem [#allocation2], %s2161_s14  ;;  %v5476_v26 = vld [vmem:[%s8168_s3 + $0x58] sm:$0xff]  ;;  %v5475_v40 = vld [vmem:[%s8168_s3 + $0x50] sm:$0xff] }
 0x229   : >> { %6288 = vmatpush3.msra.mxu1 %v2170_v30  ;;  %6275 = vmatprep.subr.mxu0 %v5459_v9  ;;  %v2167_v49 = vld [vmem:[%s8168_s3] sm:$0xff]  ;;  %v5488_v13 = vld [vmem:[%s8168_s3 + $0x78] sm:$0xff]  ;;  %v5474_v33 = vld [vmem:[%s8168_s3 + $0x48] sm:$0xff] }
 0x22a   : >> { %6289 = vmatprep.subr.mxu1 %v2169_v5  ;;  %6276 = vmatpush3.msra.mxu0 %v5459_v9  ;;  %v5487_v41 = vld [vmem:[%s8168_s3 + $0x70] sm:$0xff]  ;;  %v5473_v47 = vld [vmem:[%s8168_s3 + $0x40] sm:$0xff]  ;;  %v5486_v52 = vld [vmem:[%s8168_s3 + $0x68] sm:$0xff] }
 0x22b   : >> { %6290 = vmatpush3.msra.mxu1 %v2169_v5  ;;  %6277 = vmatprep.subr.mxu0 %v5458_v31  ;;  %v5485_v50 = vld [vmem:[%s8168_s3 + $0x60] sm:$0xff]  ;;  %v5500_v20 = vld [vmem:[%s8168_s3 + $0x98] sm:$0xff]  ;;  %v5499_v46 = vld [vmem:[%s8168_s3 + $0x90] sm:$0xff] }
 0x22c   : >> { %6291 = vmatprep.subr.mxu1 %v2168_v32  ;;  %v5453_v17 = vld [vmem:[%s7404_s0 + $0x1] sm:$0xff]  ;;  %6278 = vmatpush3.msra.mxu0 %v5458_v31  ;;  %v5454_v38 = vld [vmem:[%s7404_s0 + $0x9] sm:$0xff]  ;;  %v7419_v37 = vld [vmem:[%s7404_s0 + $0x11] sm:$0xff] }
 0x22d   : >> { %6292 = vmatpush3.msra.mxu1 %v2168_v32  ;;  %v2163_v36 = vld [vmem:[%s7404_s0] sm:$0xff]  ;;  %6279 = vmatprep.subr.mxu0 %v5457_v60  ;;  %v2164_v51 = vld [vmem:[%s7404_s0 + $0x8] sm:$0xff]  ;;  %v7427_v14 = vld [vmem:[%s7404_s0 + $0x10] sm:$0xff] }
 0x22e   : >> { %6293 = vmatprep.subr.mxu1 %v2167_v49  ;;  %6280 = vmatpush3.msra.mxu0 %v5457_v60  ;;  %v5456_v10 = vld [vmem:[%s7404_s0 + $0x19] sm:$0xf]  ;;  %v5469_v21 = vld [vmem:[%s7404_s0 + $0x2] sm:$0xff]  ;;  %v5470_v23 = vld [vmem:[%s7404_s0 + $0xa] sm:$0xff] }
 0x22f   : >> { %6281 = vmatprep.mubr.msk.f32.mxu0 %vm2142_vm13, %v5453_v17  ;;  %6294 = vmatpush3.msra.mxu1 %v2167_v49  ;;  %v2166_v19 = vld [vmem:[%s7404_s0 + $0x18] sm:$0xf]  ;;  %v5481_v39 = vld [vmem:[%s7404_s0 + $0xf] sm:$0xff]  ;;  %v7479_v48 = vld [vmem:[%s7404_s0 + $0x1f] sm:$0xff]  ;;  %v6911_v49 = vmov 0.0  }
 0x230   : >> { %6295 = vmatprep.mubr.msk.f32.mxu1 %vm2142_vm13, %v2163_v36  ;;  %6282 = vmatmul.mubr.msk.f32.vlgmr.msra.gmra.mxu0 %vm2142_vm13, %v5454_v38  ;;  %v5482_v1 = vld [vmem:[%s7404_s0 + $0x17] sm:$0xff]  ;;  %v5498_v43 = vld [vmem:[%s8168_s3 + $0x88] sm:$0xff]  ;;  %v5497_v53 = vld [vmem:[%s8168_s3 + $0x80] sm:$0xff] }
 0x231   : >> { %6296 = vmatmul.mubr.msk.f32.vlgmr.msra.gmra.mxu1 %vm2142_vm13, %v2164_v51  ;;  %6301 = vmatprep.subr.mxu0 %v5476_v26  ;;  %v5512_v35 = vld [vmem:[%s8168_s3 + $0xb8] sm:$0xff]  ;;  %v5511_v45 = vld [vmem:[%s8168_s3 + $0xb0] sm:$0xff]  ;;  %v5484_v54 = vld [vmem:[%s7404_s0 + $0x27] sm:$0xf] }
 0x232   : >> { %6315 = vmatprep.subr.mxu1 %v5488_v13  ;;  %6302 = vmatpush3.msra.mxu0 %v5476_v26  ;;  %v5471_v16 = vld [vmem:[%s7404_s0 + $0x12] sm:$0xff]  ;;  %v5472_v34 = vld [vmem:[%s7404_s0 + $0x1a] sm:$0xf]  ;;  %v5510_v55 = vld [vmem:[%s8168_s3 + $0xa8] sm:$0xff] }
 0x233   : >> { %6284 = vmatprep.mubr.msk.f32.mxu0 %vm2142_vm13, %v7419_v37  ;;  %6303 = vmatprep.subr.mxu0 %v5475_v40  ;;  %v5494_v42 = vld [vmem:[%s7404_s0 + $0x18] sm:$0xff]  ;;  %v5509_v56 = vld [vmem:[%s8168_s3 + $0xa0] sm:$0xff]  ;;  %v5523_v2 = vld [vmem:[%s8168_s3 + $0xd0] sm:$0xff] }
 0x234   : >> { %6298 = vmatprep.mubr.msk.f32.mxu1 %vm2142_vm13, %v7427_v14  ;;  %6304 = vmatpush3.msra.mxu0 %v5475_v40  ;;  %v5524_v61 = vld [vmem:[%s8168_s3 + $0xd8] sm:$0xff]  ;;  %v5495_v6 = vld [vmem:[%s7404_s0 + $0x20] sm:$0xff]  ;;  %v5496_v44 = vld [vmem:[%s7404_s0 + $0x28] sm:$0xf] }
 0x235   : >> { %6316 = vmatpush3.msra.mxu1 %v5488_v13  ;;  %6285 = vmatmul.mubr.msk.f32.gmra.mxu0 %vm2142_vm13, %v5456_v10  ;;  %v5506_v63 = vld [vmem:[%s7404_s0 + $0x19] sm:$0xff]  ;;  %v5522_v7 = vld [vmem:[%s8168_s3 + $0xc8] sm:$0xff]  ;;  %v5535_v57 = vld [vmem:[%s8168_s3 + $0xf0] sm:$0xff] }
 0x236   : >> { %6299 = vmatmul.mubr.msk.f32.gmra.mxu1 %vm2142_vm13, %v2166_v19  ;;  %6305 = vmatprep.subr.mxu0 %v5474_v33  ;;  %v5536_v4 = vld [vmem:[%s8168_s3 + $0xf8] sm:$0xff]  ;;  %v5507_v8 = vld [vmem:[%s7404_s0 + $0x21] sm:$0xff]  ;;  %v5508_v62 = vld [vmem:[%s7404_s0 + $0x29] sm:$0xf] }
 0x237   : >> { %6317 = vmatprep.subr.mxu1 %v5487_v41  ;;  %6306 = vmatpush3.msra.mxu0 %v5474_v33  ;;  %v5521_v11 = vld [vmem:[%s8168_s3 + $0xc0] sm:$0xff]  ;;  %v5534_v12 = vld [vmem:[%s8168_s3 + $0xe8] sm:$0xff]  ;;  %v5548_v0 = vld [vmem:[%s8168_s3 + $0x118] sm:$0xff] }
 0x238   : >> { %6318 = vmatpush3.msra.mxu1 %v5487_v41  ;;  %6307 = vmatprep.subr.mxu0 %v5473_v47  ;;  %v5517_v3 = vld [vmem:[%s7404_s0 + $0x1e] sm:$0xff]  ;;  %v5518_v59 = vld [vmem:[%s7404_s0 + $0x26] sm:$0xff]  ;;  %v5547_v25 = vld [vmem:[%s8168_s3 + $0x110] sm:$0xff] }
 0x239   : >> { %6319 = vmatprep.subr.mxu1 %v5486_v52  ;;  %6308 = vmatpush3.msra.mxu0 %v5473_v47  ;;  %v5533_v15 = vld [vmem:[%s8168_s3 + $0xe0] sm:$0xff]  ;;  %v5519_v18 = vld [vmem:[%s7404_s0 + $0x2e] sm:$0xff]  ;;  %v5520_v29 = vld [vmem:[%s7404_s0 + $0x36] sm:$0xf] }
 0x23a   : >> { %6309 = vmatprep.mubr.msk.f32.mxu0 %vm2142_vm13, %v5469_v21  ;;  %6320 = vmatpush3.msra.mxu1 %v5486_v52  ;;  %v5530_v22 = vld [vmem:[%s7404_s0 + $0x27] sm:$0xff]  ;;  %v5531_v28 = vld [vmem:[%s7404_s0 + $0x2f] sm:$0xff]  ;;  %v5532_v9 = vld [vmem:[%s7404_s0 + $0x37] sm:$0xf] }
 0x23b   : >> { %6310 = vmatmul.mubr.msk.f32.vlgmr.msra.gmra.mxu0 %vm2142_vm13, %v5470_v23  ;;  %6321 = vmatprep.subr.mxu1 %v5485_v50  ;;  %v5546_v30 = vld [vmem:[%s8168_s3 + $0x108] sm:$0xff]  ;;  %v5545_v5 = vld [vmem:[%s8168_s3 + $0x100] sm:$0xff]  ;;  %v5543_v32 = vld [vmem:[%s7404_s0 + $0x30] sm:$0xff] }
 0x23c   : >> { %6329 = vmatprep.subr.mxu0 %v5500_v20  ;;  %6322 = vmatpush3.msra.mxu1 %v5485_v50  ;;  %v5542_v31 = vld [vmem:[%s7404_s0 + $0x28] sm:$0xff]  ;;  %v5544_v60 = vld [vmem:[%s7404_s0 + $0x38] sm:$0xf]  ;;  %s3475_s0 = smul.u32 6, %s6904_s25  ;;  %s2160_s25 = sadd.s32 1, %s6904_s25  }
 0x23d   : >> { %6323 = vmatprep.mubr.msk.f32.mxu1 %vm2142_vm13, %v5481_v39  ;;  %6330 = vmatpush3.msra.mxu0 %v5500_v20  ;;  %p2157_p12 = scmp.ge.s32.totalorder %s2160_s25, 6  }
 0x23e   : >> { %6324 = vmatmul.mubr.msk.f32.vlgmr.msra.gmra.mxu1 %vm2142_vm13, %v5482_v1  ;;  %6331 = vmatprep.subr.mxu0 %v5499_v46  ;;  %s3476_s22 = scalar_lea.vmem [#allocation3], %s3475_s0  ;;  %s7628_s25 = smov (%p2157_p12), 0  }
 0x23f   : >> { %6343 = vmatprep.subr.mxu1 %v5512_v35  ;;  %6312 = vmatprep.mubr.msk.f32.mxu0 %vm2142_vm13, %v5471_v16 }
 0x240   : >> { %6332 = vmatpush3.msra.mxu0 %v5499_v46  ;;  %6344 = vmatpush3.msra.mxu1 %v5512_v35 }
 0x241   : >> { %6313 = vmatmul.mubr.msk.f32.gmra.mxu0 %vm2142_vm13, %v5472_v34  ;;  %6333 = vmatprep.subr.mxu0 %v5498_v43 }
 0x242   : >> { %6345 = vmatprep.subr.mxu1 %v5511_v45  ;;  %6326 = vmatprep.mubr.msk.f32.mxu1 %vm2142_vm13, %v7479_v48 }
 0x243   : >> { %6334 = vmatpush3.msra.mxu0 %v5498_v43  ;;  %6346 = vmatpush3.msra.mxu1 %v5511_v45 }
 0x244   : >> { %6335 = vmatprep.subr.mxu0 %v5497_v53  ;;  %6327 = vmatmul.mubr.msk.f32.gmra.mxu1 %vm2142_vm13, %v5484_v54 }
 0x245   : >> { %6347 = vmatprep.subr.mxu1 %v5510_v55  ;;  %6336 = vmatpush3.msra.mxu0 %v5497_v53 }
 0x246   : >> { %6337 = vmatprep.mubr.msk.f32.mxu0 %vm2142_vm13, %v7427_v14  ;;  %6348 = vmatpush3.msra.mxu1 %v5510_v55 }
 0x247   : >> { %6338 = vmatmul.mubr.msk.f32.vlgmr.msra.gmra.mxu0 %vm2142_vm13, %v5494_v42  ;;  %6349 = vmatprep.subr.mxu1 %v5509_v56 }
 0x248   : >> { %6357 = vmatprep.subr.mxu0 %v5524_v61  ;;  %6350 = vmatpush3.msra.mxu1 %v5509_v56 }
 0x249   : >> { %6351 = vmatprep.mubr.msk.f32.mxu1 %vm2142_vm13, %v7419_v37  ;;  %6358 = vmatpush3.msra.mxu0 %v5524_v61 }
 0x24a   : >> { %6352 = vmatmul.mubr.msk.f32.vlgmr.msra.gmra.mxu1 %vm2142_vm13, %v5506_v63  ;;  %6359 = vmatprep.subr.mxu0 %v5523_v2 }
 0x24b   : >> { %6371 = vmatprep.subr.mxu1 %v5536_v4  ;;  %6340 = vmatprep.mubr.msk.f32.mxu0 %vm2142_vm13, %v5495_v6 }
 0x24c   : >> { %6360 = vmatpush3.msra.mxu0 %v5523_v2  ;;  %6372 = vmatpush3.msra.mxu1 %v5536_v4 }
 0x24d   : >> { %6341 = vmatmul.mubr.msk.f32.gmra.mxu0 %vm2142_vm13, %v5496_v44  ;;  %6361 = vmatprep.subr.mxu0 %v5522_v7 }
 0x24e   : >> { %6373 = vmatprep.subr.mxu1 %v5535_v57  ;;  %6354 = vmatprep.mubr.msk.f32.mxu1 %vm2142_vm13, %v5507_v8 }
 0x24f   : >> { %6362 = vmatpush3.msra.mxu0 %v5522_v7  ;;  %6374 = vmatpush3.msra.mxu1 %v5535_v57 }
 0x250   : >> { %6363 = vmatprep.subr.mxu0 %v5521_v11  ;;  %6355 = vmatmul.mubr.msk.f32.gmra.mxu1 %vm2142_vm13, %v5508_v62 }
 0x251   : >> { %6375 = vmatprep.subr.mxu1 %v5534_v12  ;;  %6364 = vmatpush3.msra.mxu0 %v5521_v11 }
 0x252   : >> { %6365 = vmatprep.mubr.msk.f32.mxu0 %vm2142_vm13, %v5517_v3  ;;  %6376 = vmatpush3.msra.mxu1 %v5534_v12 }
 0x253   : >> { %6366 = vmatmul.mubr.msk.f32.vlgmr.msra.gmra.mxu0 %vm2142_vm13, %v5518_v59  ;;  %6377 = vmatprep.subr.mxu1 %v5533_v15 }
 0x254   : >> { %6385 = vmatprep.subr.mxu0 %v5548_v0  ;;  %6378 = vmatpush3.msra.mxu1 %v5533_v15 }
 0x255   : >> { %6379 = vmatprep.mubr.msk.f32.mxu1 %vm2142_vm13, %v7479_v48  ;;  %6386 = vmatpush3.msra.mxu0 %v5548_v0 }
 0x256   : >> { %6380 = vmatmul.mubr.msk.f32.vlgmr.msra.gmra.mxu1 %vm2142_vm13, %v5530_v22  ;;  %6387 = vmatprep.subr.mxu0 %v5547_v25 }
 0x257   : >> { %6368 = vmatprep.mubr.msk.f32.mxu0 %vm2142_vm13, %v5519_v18  ;;  %6388 = vmatpush3.msra.mxu0 %v5547_v25 }
 0x258   : >> { %6382 = vmatprep.mubr.msk.f32.mxu1 %vm2142_vm13, %v5531_v28  ;;  %6369 = vmatmul.mubr.msk.f32.gmra.mxu0 %vm2142_vm13, %v5520_v29 }
 0x259   : >> { %6389 = vmatprep.subr.mxu0 %v5546_v30  ;;  %6393 = vmatprep.mubr.msk.f32.mxu0 %vm2142_vm13, %v5495_v6 }
 0x25a   : >> { %6390 = vmatpush3.msra.mxu0 %v5546_v30  ;;  %6383 = vmatmul.mubr.msk.f32.gmra.mxu1 %vm2142_vm13, %v5532_v9 }
 0x25b   : >> { %6391 = vmatprep.subr.mxu0 %v5545_v5  ;;  %6399 = vmatprep.subr.mxu1 %v6911_v49 }
 0x25c   : >> { %6392 = vmatpush3.msra.mxu0 %v5545_v5  ;;  %6407 = vmatprep.mubr.msk.f32.mxu1 %vm6912_vm0, %v6911_v49 }
 0x25d   : >> { %6394 = vmatmul.mubr.msk.f32.vlgmr.msra.gmra.mxu0 %vm2142_vm13, %v5542_v31  ;;  %6410 = vmatprep.subr.mxu0 %v6911_v49 }
 0x25e   : >> { %6396 = vmatprep.mubr.msk.f32.mxu0 %vm2142_vm13, %v5543_v32 }
 0x261   : >> { %6397 = vmatmul.mubr.msk.f32.gmra.mxu0 %vm2142_vm13, %v5544_v60 }
 0x262   : >> { %6418 = vmatprep.mubr.msk.f32.mxu0 %vm6912_vm0, %v6911_v49 }
 0x2f0   : >> { %v6283_v17 = vpop.f32.mrf.mxu0 }
 0x2f1   : >> { %v6297_v36 = vpop.f32.mrf.mxu1 }
 0x2f2   : >> { %v2261_v38 = vpop.f32.mrf.mxu0  ;;  %v2364_v46 = vadd.f32 %v6297_v36, %v6283_v17 }
 0x2f3   : >> { %v2358_v51 = vpop.f32.mrf.mxu1 }
 0x2f4   : >> { %v2359_v34 = vadd.f32 %v2358_v51, %v2261_v38 }
 0x2f5   : >> { %v6286_v26 = vpop.f32.mrf.mxu0 }
 0x2f6   : >> { %v6300_v13 = vpop.f32.mrf.mxu1 }
 0x2f7   : >> { %v2271_v37 = vpop.f32.mrf.mxu0  ;;  %v2374_v35 = vadd.f32 %v6300_v13, %v6286_v26 }
 0x2f8   : >> { %v2368_v14 = vpop.f32.mrf.mxu1 }
 0x2f9   : >> { %v2369_v43 = vadd.f32 %v2368_v14, %v2271_v37 }
 0x2fb   : >> { %v6311_v40 = vpop.f32.mrf.mxu0 }
 0x2fc   : >> { %v2486_v45 = vadd.f32 %v6311_v40, %v2364_v46 }
 0x2fd   : >> { %v2466_v10 = vpop.f32.mrf.mxu0 }
 0x2fe   : >> { %v6325_v19 = vpop.f32.mrf.mxu1  ;;  %v2485_v54 = vadd.f32 %v2466_v10, %v2359_v34 }
 0x2ff   : >> { %v2598_v61 = vadd.f32 %v6325_v19, %v2486_v45 }
 0x300   : >> { %v2578_v41 = vpop.f32.mrf.mxu1 }
 0x301   : >> { %v6314_v33 = vpop.f32.mrf.mxu0  ;;  %v2597_v4 = vadd.f32 %v2578_v41, %v2485_v54 }
 0x302   : >> { %v2488_v48 = vadd.f32 %v6314_v33, %v2374_v35 }
 0x303   : >> { %v2476_v47 = vpop.f32.mrf.mxu0 }
 0x304   : >> { %v6328_v52 = vpop.f32.mrf.mxu1  ;;  %v2487_v55 = vadd.f32 %v2476_v47, %v2369_v43 }
 0x305   : >> { %v2600_v63 = vadd.f32 %v6328_v52, %v2488_v48 }
 0x306   : >> { %v2588_v21 = vpop.f32.mrf.mxu1 }
 0x307   : >> { %v6339_v23 = vpop.f32.mrf.mxu0  ;;  %v2599_v6 = vadd.f32 %v2588_v21, %v2487_v55  ;;  %v7618_v55 = vld [vmem:[%s8171_s6] ss:$0 sm:$0xff] (%p2157_p12) }
 0x308   : >> { %v2710_v44 = vadd.f32 %v6339_v23, %v2598_v61  ;;  %v8224_v23 = vld [vmem:[#allocation11_spill] sm:$0xff]  ;;  %v8228_v61 = vmov (%p2157_p12), 0.0  }
 0x309   : >> { %v2690_v50 = vpop.f32.mrf.mxu0 }
 0x30a   : >> { %v6353_v20 = vpop.f32.mrf.mxu1  ;;  %v2709_v8 = vadd.f32 %v2690_v50, %v2597_v4  ;;  %v8225_v50 = vld [vmem:[#allocation13_spill] sm:$0xff] }
 0x30b   : >> { %v2822_v3 = vadd.f32 %v6353_v20, %v2710_v44 }
 0x30c   : >> { %v2802_v1 = vpop.f32.mrf.mxu1 }
 0x30d   : >> { %v6342_v39 = vpop.f32.mrf.mxu0  ;;  %v2821_v22 = vadd.f32 %v2802_v1, %v2709_v8 }
 0x30e   : >> { %v2712_v7 = vadd.f32 %v6342_v39, %v2600_v63 }
 0x30f   : >> { %v2700_v16 = vpop.f32.mrf.mxu0 }
 0x310   : >> { %v6356_v53 = vpop.f32.mrf.mxu1  ;;  %v2711_v11 = vadd.f32 %v2700_v16, %v2599_v6 }
 0x311   : >> { %v2824_v59 = vadd.f32 %v6356_v53, %v2712_v7 }
 0x312   : >> { %v2812_v42 = vpop.f32.mrf.mxu1 }
 0x313   : >> { %v6367_v56 = vpop.f32.mrf.mxu0  ;;  %v2823_v25 = vadd.f32 %v2812_v42, %v2711_v11  ;;  %v8227_v42 = vld [vmem:[#allocation9_spill] sm:$0xff] (%p2157_p12) }
 0x314   : >> { %v2934_v18 = vadd.f32 %v6367_v56, %v2822_v3 }
 0x315   : >> { %v2914_v2 = vpop.f32.mrf.mxu0 }
 0x316   : >> { %v6381_v57 = vpop.f32.mrf.mxu1  ;;  %v2933_v30 = vadd.f32 %v2914_v2, %v2821_v22 }
 0x317   : >> { %v3046_v32 = vadd.f32 %v6381_v57, %v2934_v18 }
 0x318   : >> { %v3026_v62 = vpop.f32.mrf.mxu1  ;;  %v6370_v12 = vpop.f32.mrf.mxu0 }
 0x319   : >> { %v2936_v28 = vadd.f32 %v6370_v12, %v2824_v59  ;;  %v3045_v36 = vadd.f32 %v3026_v62, %v2933_v30 }
 0x31a   : >> { %v2924_v15 = vpop.f32.mrf.mxu0  ;;  %v6384_v0 = vpop.f32.mrf.mxu1 }
 0x31b   : >> { %v2935_v9 = vadd.f32 %v2924_v15, %v2823_v25  ;;  %v3048_v60 = vadd.f32 %v6384_v0, %v2936_v28 }
 0x31c   : >> { %v3036_v5 = vpop.f32.mrf.mxu1 }
 0x31d   : >> { %v6395_v29 = vpop.f32.mrf.mxu0  ;;  %v3047_v38 = vadd.f32 %v3036_v5, %v2935_v9 }
 0x31e   : >> { %v3158_v51 = vadd.f32 %v6395_v29, %v3046_v32 }
 0x31f   : >> { %v3138_v31 = vpop.f32.mrf.mxu0 }
 0x320   : >> { %v3157_v37 = vadd.f32 %v3138_v31, %v3045_v36  ;;  %v3168_v10 = vadd.f32 %v7364_v24, %v3158_v51 }
 0x321   : >> { %v6398_v17 = vpop.f32.mrf.mxu0 }
 0x322   : >> { %v3160_v26 = vadd.f32 %v6398_v17, %v3048_v60  ;;  %v3167_v41 = vadd.f32 %v7364_v24, %v3157_v37  ;;  %v3172_v52 = vmax.f32 %v3168_v10, 0.0 }
 0x323   : >> { %v3148_v13 = vpop.f32.mrf.mxu0 }
 0x324   : >> { %v3170_v40 = vadd.f32 %v7364_v24, %v3160_v26  ;;  %v3159_v14 = vadd.f32 %v3148_v13, %v3047_v38  ;;  %v3171_v21 = vmax.f32 %v3167_v41, 0.0 }
 0x326   : >> { %v3174_v19 = vmax.f32 %v3170_v40, 0.0  ;;  %v3169_v33 = vadd.f32 %v7364_v24, %v3159_v14 }
 0x328   : >> { %v3173_v47 = vmax.f32 %v3169_v33, 0.0  ;;  %6400 = vmatpush3.msk.msra.mxu1 %vm3179_vm1, %v3174_v19  ;;  %6411 = vmatpush3.msk.msra.mxu0 %vm3179_vm1, %v3174_v19 }
 0x329   : >> { %6401 = vmatprep.subr.mxu1 %v6911_v49  ;;  %6412 = vmatprep.subr.mxu0 %v6911_v49 }
 0x32a   : >> { %6402 = vmatpush3.msra.mxu1 %v3173_v47  ;;  %6413 = vmatpush3.msra.mxu0 %v3173_v47 }
 0x32b   : >> { %6403 = vmatprep.subr.mxu1 %v6911_v49  ;;  %6414 = vmatprep.subr.mxu0 %v6911_v49 }
 0x32c   : >> { %6404 = vmatpush3.msra.mxu1 %v3172_v52  ;;  %6415 = vmatpush3.msra.mxu0 %v3172_v52 }
 0x32d   : >> { %6405 = vmatprep.subr.mxu1 %v6911_v49  ;;  %6416 = vmatprep.subr.mxu0 %v6911_v49 }
 0x32e   : >> { %6406 = vmatpush3.msra.mxu1 %v3171_v21  ;;  %6417 = vmatpush3.msra.mxu0 %v3171_v21 }
 0x32f   : >> { %6408 = vmatmul.mubr.msk.f32.vlgmr.msra.gmra.mxu1 %vm3175_vm2, %v8224_v23  ;;  %6419 = vmatmul.mubr.msk.f32.vlgmr.msra.gmra.mxu0 %vm3175_vm2, %v8225_v50 }
 0x330   : >> { %6421 = vmatprep.subr.mxu1 %v6911_v49  ;;  %6432 = vmatprep.subr.mxu0 %v6911_v49 }
 0x331   : >> { %6422 = vmatpush3.msk.msra.mxu1 %vm3179_vm1, %v3174_v19  ;;  %6433 = vmatpush3.msk.msra.mxu0 %vm3179_vm1, %v3174_v19 }
 0x332   : >> { %6423 = vmatprep.subr.mxu1 %v6911_v49  ;;  %6434 = vmatprep.subr.mxu0 %v6911_v49 }
 0x333   : >> { %6424 = vmatpush3.msra.mxu1 %v3173_v47  ;;  %6435 = vmatpush3.msra.mxu0 %v3173_v47 }
 0x334   : >> { %6425 = vmatprep.subr.mxu1 %v6911_v49  ;;  %6436 = vmatprep.subr.mxu0 %v6911_v49 }
 0x335   : >> { %6426 = vmatpush3.msra.mxu1 %v3172_v52  ;;  %6437 = vmatpush3.msra.mxu0 %v3172_v52 }
 0x336   : >> { %6427 = vmatprep.subr.mxu1 %v6911_v49  ;;  %6438 = vmatprep.subr.mxu0 %v6911_v49 }
 0x337   : >> { %6428 = vmatpush3.msra.mxu1 %v3171_v21  ;;  %6429 = vmatprep.mubr.msk.f32.mxu1 %vm6912_vm0, %v6911_v49 }
 0x338   : >> { %6439 = vmatpush3.msra.mxu0 %v3171_v21  ;;  %6440 = vmatprep.mubr.msk.f32.mxu0 %vm6912_vm0, %v6911_v49  ;;  %v8226_v49 = vld [vmem:[#allocation10_spill] sm:$0xff] (%p2157_p12) }
 0x339   : >> { %6430 = vmatmul.mubr.msk.f32.vlgmr.msra.gmra.mxu1 %vm3175_vm2, %v7368_v58  ;;  %6441 = vmatmul.mubr.msk.f32.vlgmr.msra.gmra.mxu0 %vm3175_vm2, %v7372_v27  ;;  %v3479_v54 = vadd.s32 (%p2157_p12), 6, %v8226_v49 }
 0x33b   : > { %vm3480_vm4 = vcmp.eq.s32.totalorder (%p2157_p12), %v8227_v42, %v3479_v54  ;;  %v3483_v56 = vadd.s32 (%p2157_p12), 1, %v3479_v54 }
 0x33c   : > { %v7622_v63 = vsel (%p2157_p12), %vm3480_vm4, 1.0, %v8228_v61 }
 0x33d   : > { %vm3484_vm5 = vcmp.eq.s32.totalorder (%p2157_p12), %v8227_v42, %v3483_v56 }
 0x33e   : > { %v7626_v2 = vsel (%p2157_p12), %vm3484_vm5, 1.0, %v8228_v61 }
 0x3ef   : >> { %v3249_v20 = vpop.f32.mrf.mxu1  ;;  %v3322_v39 = vpop.f32.mrf.mxu0 }
 0x3f0   : >> { %v3326_v34 = vmax.f32 %v3249_v20, %v3322_v39 }
 0x3f1   : >> { %v6409_v1 = vpop.f32.mrf.mxu1  ;;  %v6420_v46 = vpop.f32.mrf.mxu0 }
 0x3f9   : >> { %v3396_v35 = vpop.f32.mrf.mxu1  ;;  %v3469_v16 = vpop.f32.mrf.mxu0 }
 0x3fa   : >> { %v3473_v43 = vmax.f32 %v3396_v35, %v3469_v16  ;;  %2159 = sbr.rel (!%p2157_p12) target bundleno = 550 (0x226), region = 188 }
 0x3fb   : >> { %v6431_v45 = vpop.f32.mrf.mxu1  ;;  %v6442_v48 = vpop.f32.mrf.mxu0 }
 0x3fc   : >> { %v3474_v53 = vmax.f32 %v3326_v34, %v3473_v43 }
 0x3fe   : >> { %3478 = vst.msk [vmem:[%s3476_s22] sm:$0x3f] %vm3477_vm3, %v3474_v53 }
 0x3ff LB: >> { %v5573_v24 = vld [vmem:[%s8170_s5 + $0x78] sm:$0xff]  ;;  %v5572_v27 = vld [vmem:[%s8170_s5 + $0x70] sm:$0xff]  ;;  %v5571_v6 = vld [vmem:[%s8170_s5 + $0x68] sm:$0xff]  ;;  %s3494_s12 = smul.u32 12, %s6908_s25  ;;  %vm3519_vm6 = vcmask 523264   ;;  %vm6914_vm7 = vmmov 0   ;;  %s6908_s25 = sphi %s7628_s25, %s3493_s25  }
 0x400   : >> { %v3505_v58 = vld [vmem:[%s8170_s5 + $0x38] sm:$0xff]  ;;  %6443 = vmatprep.subr.mxu0 %v5573_v24  ;;  %v3504_v4 = vld [vmem:[%s8170_s5 + $0x30] sm:$0xff]  ;;  %v3503_v44 = vld [vmem:[%s8170_s5 + $0x28] sm:$0xff]  ;;  %vm4368_vm8 = vcmask 1041408   ;;  %vm4364_vm9 = vcmask 80896   ;;  %vm4666_vm10 = vcmask 517120  }
 0x401   : >> { %6462 = vmatprep.subr.mxu1 %v3505_v58  ;;  %6444 = vmatpush3.msra.mxu0 %v5573_v24  ;;  %v5570_v7 = vld [vmem:[%s8170_s5 + $0x60] sm:$0xff]  ;;  %v5569_v8 = vld [vmem:[%s8170_s5 + $0x58] sm:$0xff]  ;;  %v5568_v62 = vld [vmem:[%s8170_s5 + $0x50] sm:$0xff]  ;;  %s7682_s1 = scalar_lea.vmem [#allocation3], %s3494_s12 }
 0x402   : >> { %6463 = vmatpush3.msra.mxu1 %v3505_v58  ;;  %6445 = vmatprep.subr.mxu0 %v5572_v27  ;;  %v3502_v57 = vld [vmem:[%s8170_s5 + $0x20] sm:$0xff]  ;;  %v3501_v11 = vld [vmem:[%s8170_s5 + $0x18] sm:$0xff]  ;;  %v3500_v12 = vld [vmem:[%s8170_s5 + $0x10] sm:$0xff] }
 0x403   : >> { %6464 = vmatprep.subr.mxu1 %v3504_v4  ;;  %6446 = vmatpush3.msra.mxu0 %v5572_v27  ;;  %v5567_v3 = vld [vmem:[%s8170_s5 + $0x48] sm:$0xff]  ;;  %v5566_v15 = vld [vmem:[%s8170_s5 + $0x40] sm:$0xff]  ;;  %v5587_v29 = vld [vmem:[%s8170_s5 + $0xb8] sm:$0xff] }
 0x404   : >> { %6465 = vmatpush3.msra.mxu1 %v3504_v4  ;;  %6447 = vmatprep.subr.mxu0 %v5571_v6  ;;  %v3499_v59 = vld [vmem:[%s8170_s5 + $0x8] sm:$0xff]  ;;  %v3498_v0 = vld [vmem:[%s8170_s5] sm:$0xff]  ;;  %v5599_v30 = vld [vmem:[%s8170_s5 + $0xf8] sm:$0xff] }
 0x405   : >> { %6466 = vmatprep.subr.mxu1 %v3503_v44  ;;  %6448 = vmatpush3.msra.mxu0 %v5571_v6  ;;  %v5564_v22 = vld [vmem:[%s7682_s1 + $0x1] sm:$0xff]  ;;  %v5565_v18 = vld [vmem:[%s7682_s1 + $0x9] sm:$0x3]  ;;  %v5586_v9 = vld [vmem:[%s8170_s5 + $0xb0] sm:$0xff] }
 0x406   : >> { %6467 = vmatpush3.msra.mxu1 %v3503_v44  ;;  %6449 = vmatprep.subr.mxu0 %v5570_v7  ;;  %v3496_v25 = vld [vmem:[%s7682_s1] sm:$0xff]  ;;  %v3497_v28 = vld [vmem:[%s7682_s1 + $0x8] sm:$0x3]  ;;  %v5598_v5 = vld [vmem:[%s8170_s5 + $0xf0] sm:$0xff] }
 0x407   : >> { %6468 = vmatprep.subr.mxu1 %v3502_v57  ;;  %6450 = vmatpush3.msra.mxu0 %v5570_v7  ;;  %v5585_v31 = vld [vmem:[%s8170_s5 + $0xa8] sm:$0xff]  ;;  %v5584_v60 = vld [vmem:[%s8170_s5 + $0xa0] sm:$0xff]  ;;  %v5583_v36 = vld [vmem:[%s8170_s5 + $0x98] sm:$0xff] }
 0x408   : >> { %6469 = vmatpush3.msra.mxu1 %v3502_v57  ;;  %6451 = vmatprep.subr.mxu0 %v5569_v8  ;;  %v5597_v32 = vld [vmem:[%s8170_s5 + $0xe8] sm:$0xff]  ;;  %v5596_v17 = vld [vmem:[%s8170_s5 + $0xe0] sm:$0xff]  ;;  %v5595_v38 = vld [vmem:[%s8170_s5 + $0xd8] sm:$0xff] }
 0x409   : >> { %6470 = vmatprep.subr.mxu1 %v3501_v11  ;;  %6452 = vmatpush3.msra.mxu0 %v5569_v8  ;;  %v5582_v51 = vld [vmem:[%s8170_s5 + $0x90] sm:$0xff]  ;;  %v5581_v13 = vld [vmem:[%s8170_s5 + $0x88] sm:$0xff]  ;;  %v5580_v14 = vld [vmem:[%s8170_s5 + $0x80] sm:$0xff] }
 0x40a   : >> { %6471 = vmatpush3.msra.mxu1 %v3501_v11  ;;  %6453 = vmatprep.subr.mxu0 %v5568_v62  ;;  %v5594_v26 = vld [vmem:[%s8170_s5 + $0xd0] sm:$0xff]  ;;  %v5593_v37 = vld [vmem:[%s8170_s5 + $0xc8] sm:$0xff]  ;;  %v5592_v10 = vld [vmem:[%s8170_s5 + $0xc0] sm:$0xff] }
 0x40b   : >> { %6472 = vmatprep.subr.mxu1 %v3500_v12  ;;  %6454 = vmatpush3.msra.mxu0 %v5568_v62  ;;  %v5578_v40 = vld [vmem:[%s7682_s1 + $0x2] sm:$0xff]  ;;  %v5579_v19 = vld [vmem:[%s7682_s1 + $0xa] sm:$0x3]  ;;  %v5611_v33 = vld [vmem:[%s8170_s5 + $0x138] sm:$0xff] }
 0x40c   : >> { %6473 = vmatpush3.msra.mxu1 %v3500_v12  ;;  %6455 = vmatprep.subr.mxu0 %v5567_v3  ;;  %v5590_v41 = vld [vmem:[%s7682_s1 + $0x6] sm:$0xff]  ;;  %v5591_v47 = vld [vmem:[%s7682_s1 + $0xe] sm:$0x3]  ;;  %v5610_v52 = vld [vmem:[%s8170_s5 + $0x130] sm:$0xff] }
 0x40d   : >> { %6474 = vmatprep.subr.mxu1 %v3499_v59  ;;  %6456 = vmatpush3.msra.mxu0 %v5567_v3  ;;  %v5623_v21 = vld [vmem:[%s8170_s5 + $0x178] sm:$0xff]  ;;  %v5609_v23 = vld [vmem:[%s8170_s5 + $0x128] sm:$0xff]  ;;  %v5622_v50 = vld [vmem:[%s8170_s5 + $0x170] sm:$0xff] }
 0x40e   : >> { %6475 = vmatpush3.msra.mxu1 %v3499_v59  ;;  %6457 = vmatprep.subr.mxu0 %v5566_v15  ;;  %v5608_v20 = vld [vmem:[%s8170_s5 + $0x120] sm:$0xff]  ;;  %v5621_v39 = vld [vmem:[%s8170_s5 + $0x168] sm:$0xff]  ;;  %v5607_v1 = vld [vmem:[%s8170_s5 + $0x118] sm:$0xff] }
 0x40f   : >> { %6476 = vmatprep.subr.mxu1 %v3498_v0  ;;  %6458 = vmatpush3.msra.mxu0 %v5566_v15  ;;  %v5620_v46 = vld [vmem:[%s8170_s5 + $0x160] sm:$0xff]  ;;  %v5606_v35 = vld [vmem:[%s8170_s5 + $0x110] sm:$0xff]  ;;  %v5619_v16 = vld [vmem:[%s8170_s5 + $0x158] sm:$0xff] }
 0x410   : >> { %6459 = vmatprep.mubr.msk.f32.mxu0 %vm3519_vm6, %v5564_v22  ;;  %6477 = vmatpush3.msra.mxu1 %v3498_v0  ;;  %v5605_v34 = vld [vmem:[%s8170_s5 + $0x108] sm:$0xff]  ;;  %v5618_v43 = vld [vmem:[%s8170_s5 + $0x150] sm:$0xff]  ;;  %v5604_v45 = vld [vmem:[%s8170_s5 + $0x100] sm:$0xff] }
 0x411   : >> { %6478 = vmatprep.mubr.msk.f32.mxu1 %vm3519_vm6, %v3496_v25  ;;  %6460 = vmatmul.mubr.msk.f32.vlgmr.msra.gmra.mxu0 %vm3519_vm6, %v5565_v18  ;;  %v5617_v48 = vld [vmem:[%s8170_s5 + $0x148] sm:$0xff]  ;;  %v5616_v54 = vld [vmem:[%s8170_s5 + $0x140] sm:$0xff]  ;;  %v5635_v42 = vld [vmem:[%s8170_s5 + $0x1b8] sm:$0xff] }
 0x412   : >> { %6479 = vmatmul.mubr.msk.f32.vlgmr.msra.gmra.mxu1 %vm3519_vm6, %v3497_v28  ;;  %6481 = vmatprep.subr.mxu0 %v5587_v29  ;;  %v5602_v53 = vld [vmem:[%s7682_s1 + $0x7] sm:$0xff]  ;;  %v5603_v49 = vld [vmem:[%s7682_s1 + $0xf] sm:$0x3]  ;;  %v5647_v58 = vld [vmem:[%s8170_s5 + $0x1f8] sm:$0xff] }
 0x413   : >> { %6500 = vmatprep.subr.mxu1 %v5599_v30  ;;  %6482 = vmatpush3.msra.mxu0 %v5587_v29  ;;  %v5614_v56 = vld [vmem:[%s7682_s1 + $0x8] sm:$0xff]  ;;  %v5615_v61 = vld [vmem:[%s7682_s1 + $0x10] sm:$0x3]  ;;  %v5632_v6 = vld [vmem:[%s8170_s5 + $0x1a0] sm:$0xff] }
 0x414   : >> { %6501 = vmatpush3.msra.mxu1 %v5599_v30  ;;  %6483 = vmatprep.subr.mxu0 %v5586_v9  ;;  %v5634_v24 = vld [vmem:[%s8170_s5 + $0x1b0] sm:$0xff]  ;;  %v5633_v27 = vld [vmem:[%s8170_s5 + $0x1a8] sm:$0xff]  ;;  %v5631_v7 = vld [vmem:[%s8170_s5 + $0x198] sm:$0xff] }
 0x415   : >> { %6502 = vmatprep.subr.mxu1 %v5598_v5  ;;  %6484 = vmatpush3.msra.mxu0 %v5586_v9  ;;  %v5646_v4 = vld [vmem:[%s8170_s5 + $0x1f0] sm:$0xff]  ;;  %v5645_v44 = vld [vmem:[%s8170_s5 + $0x1e8] sm:$0xff]  ;;  %v5644_v57 = vld [vmem:[%s8170_s5 + $0x1e0] sm:$0xff] }
 0x416   : >> { %6503 = vmatpush3.msra.mxu1 %v5598_v5  ;;  %6485 = vmatprep.subr.mxu0 %v5585_v31  ;;  %v5630_v8 = vld [vmem:[%s8170_s5 + $0x190] sm:$0xff]  ;;  %v5643_v11 = vld [vmem:[%s8170_s5 + $0x1d8] sm:$0xff]  ;;  %v5629_v62 = vld [vmem:[%s8170_s5 + $0x188] sm:$0xff] }
 0x417   : >> { %6504 = vmatprep.subr.mxu1 %v5597_v32  ;;  %6486 = vmatpush3.msra.mxu0 %v5585_v31  ;;  %v5642_v12 = vld [vmem:[%s8170_s5 + $0x1d0] sm:$0xff]  ;;  %v5628_v3 = vld [vmem:[%s8170_s5 + $0x180] sm:$0xff]  ;;  %v5641_v59 = vld [vmem:[%s8170_s5 + $0x1c8] sm:$0xff] }
 0x418   : >> { %6505 = vmatpush3.msra.mxu1 %v5597_v32  ;;  %6487 = vmatprep.subr.mxu0 %v5584_v60  ;;  %v5626_v15 = vld [vmem:[%s7682_s1 + $0xc] sm:$0xff]  ;;  %v5627_v0 = vld [vmem:[%s7682_s1 + $0x14] sm:$0x3]  ;;  %v5640_v22 = vld [vmem:[%s8170_s5 + $0x1c0] sm:$0xff] }
 0x419   : >> { %6506 = vmatprep.subr.mxu1 %v5596_v17  ;;  %6488 = vmatpush3.msra.mxu0 %v5584_v60  ;;  %v5659_v25 = vld [vmem:[%s8170_s5 + $0x238] sm:$0xff]  ;;  %v5638_v18 = vld [vmem:[%s7682_s1 + $0xd] sm:$0xff]  ;;  %v5639_v28 = vld [vmem:[%s7682_s1 + $0x15] sm:$0x3] }
 0x41a   : >> { %6507 = vmatpush3.msra.mxu1 %v5596_v17  ;;  %6489 = vmatprep.subr.mxu0 %v5583_v36  ;;  %v5658_v29 = vld [vmem:[%s8170_s5 + $0x230] sm:$0xff]  ;;  %v5657_v9 = vld [vmem:[%s8170_s5 + $0x228] sm:$0xff]  ;;  %v5656_v5 = vld [vmem:[%s8170_s5 + $0x220] sm:$0xff] }
 0x41b   : >> { %6508 = vmatprep.subr.mxu1 %v5595_v38  ;;  %6490 = vmatpush3.msra.mxu0 %v5583_v36  ;;  %v5650_v30 = vld [vmem:[%s7682_s1 + $0xe] sm:$0xff]  ;;  %v5655_v31 = vld [vmem:[%s8170_s5 + $0x218] sm:$0xff]  ;;  %v5652_v17 = vld [vmem:[%s8170_s5 + $0x200] sm:$0xff] }
 0x41c   : >> { %6509 = vmatpush3.msra.mxu1 %v5595_v38  ;;  %6491 = vmatprep.subr.mxu0 %v5582_v51  ;;  %v5654_v32 = vld [vmem:[%s8170_s5 + $0x210] sm:$0xff]  ;;  %v5653_v60 = vld [vmem:[%s8170_s5 + $0x208] sm:$0xff]  ;;  %v6913_v38 = vmov 0.0  }
 0x41d   : >> { %6510 = vmatprep.subr.mxu1 %v5594_v26  ;;  %6492 = vmatpush3.msra.mxu0 %v5582_v51  ;;  %v5651_v36 = vld [vmem:[%s7682_s1 + $0x16] sm:$0x3]  ;;  %s5671_s1 = sshll.u32 %s6908_s25, 1  ;;  %s3493_s25 = sadd.s32 1, %s6908_s25  }
 0x41e   : >> { %6511 = vmatpush3.msra.mxu1 %v5594_v26  ;;  %6493 = vmatprep.subr.mxu0 %v5581_v13  ;;  %s4665_s13 = scalar_lea.vmem [#allocation4], %s5671_s1  ;;  %p3490_p13 = scmp.ge.s32.totalorder %s3493_s25, 2  }
 0x41f   : >> { %6512 = vmatprep.subr.mxu1 %v5593_v37  ;;  %6494 = vmatpush3.msra.mxu0 %v5581_v13  ;;  %vm6915_vm11 = vmmov (%p3490_p13), 0   ;;  %s5700_s15 = sshll.u32 (%p3490_p13), %s6998_s21, 4  ;;  %s5108_s29 = sshll.u32 (%p3490_p13), %s7078_s24, 4  ;;  %vm5093_vm12 = vcmask (%p3490_p13), 73728   ;;  %s5109_s29 = int_to_ptr.vmem [resolvable:$true] %s5108_s29 }
 0x420   : >> { %6497 = vmatprep.mubr.msk.f32.mxu0 %vm3519_vm6, %v5578_v40  ;;  %6495 = vmatprep.subr.mxu0 %v5580_v14  ;;  %s8127_s30 = scalar_lea.hbm (%p3490_p13), %s8176_s11, %s5700_s15  ;;  %s8232_s0 = sand.u32 (%p3490_p13), 1, %s6888_s18  }
 0x421   : >> { %6513 = vmatpush3.msra.mxu1 %v5593_v37  ;;  %6496 = vmatpush3.msra.mxu0 %v5580_v14  ;;  %s5096_s12 = scalar_lea.sflag (%p3490_p13), [#allocation6], %s8232_s0  ;;  %s6824_s22 = scalar_lea.vmem (%p3490_p13), %s5109_s29, 16 }
 0x422   : >> { %6514 = vmatprep.subr.mxu1 %v5592_v10  ;;  %6498 = vmatmul.mubr.msk.f32.vlgmr.msra.gmra.mxu0 %vm3519_vm6, %v5579_v19  ;;  %p6825_p0 = scmp.ne.s32.totalorder (%p3490_p13), %s5109_s29, %s6824_s22  ;;  %s6916_s21 = smov (%p3490_p13), [#allocation5]  }
 0x423   : >> { %6519 = vmatprep.subr.mxu0 %v5611_v33  ;;  %6515 = vmatpush3.msra.mxu1 %v5592_v10  ;;  %s6828_s1 = sshll.u32 (%p3490_p13), %s6916_s21, 4  ;;  %s6829_s1 = int_to_ptr.vmem [resolvable:$false] %s6828_s1 }
 0x424   : >> { %6516 = vmatprep.mubr.msk.f32.mxu1 %vm3519_vm6, %v5590_v41  ;;  %6520 = vmatpush3.msra.mxu0 %v5611_v33  ;;  %p6826_p1 = pnand (%p3490_p13), %p6825_p0, %p7015_p5  ;;  %p6831_p3 = scmp.lt.s32.totalorder (%p3490_p13), %s5109_s29, %s6829_s1 }
 0x425   : >> { %6517 = vmatmul.mubr.msk.f32.vlgmr.msra.gmra.mxu1 %vm3519_vm6, %v5591_v47  ;;  %6521 = vmatprep.subr.mxu0 %v5610_v52 }
 0x426   : >> { %6538 = vmatprep.subr.mxu1 %v5623_v21  ;;  %6522 = vmatpush3.msra.mxu0 %v5610_v52  ;;  %p6827_p2 = pneg (%p3490_p13), %p6826_p1 }
 0x427   : >> { %6539 = vmatpush3.msra.mxu1 %v5623_v21  ;;  %6523 = vmatprep.subr.mxu0 %v5609_v23 }
 0x428   : >> { %6540 = vmatprep.subr.mxu1 %v5622_v50  ;;  %6524 = vmatpush3.msra.mxu0 %v5609_v23 }
 0x429   : >> { %6541 = vmatpush3.msra.mxu1 %v5622_v50  ;;  %6525 = vmatprep.subr.mxu0 %v5608_v20 }
 0x42a   : >> { %6542 = vmatprep.subr.mxu1 %v5621_v39  ;;  %6526 = vmatpush3.msra.mxu0 %v5608_v20 }
 0x42b   : >> { %6543 = vmatpush3.msra.mxu1 %v5621_v39  ;;  %6527 = vmatprep.subr.mxu0 %v5607_v1 }
 0x42c   : >> { %6544 = vmatprep.subr.mxu1 %v5620_v46  ;;  %6528 = vmatpush3.msra.mxu0 %v5607_v1 }
 0x42d   : >> { %6545 = vmatpush3.msra.mxu1 %v5620_v46  ;;  %6529 = vmatprep.subr.mxu0 %v5606_v35 }
 0x42e   : >> { %6546 = vmatprep.subr.mxu1 %v5619_v16  ;;  %6530 = vmatpush3.msra.mxu0 %v5606_v35 }
 0x42f   : >> { %6547 = vmatpush3.msra.mxu1 %v5619_v16  ;;  %6531 = vmatprep.subr.mxu0 %v5605_v34 }
 0x430   : >> { %6548 = vmatprep.subr.mxu1 %v5618_v43  ;;  %6532 = vmatpush3.msra.mxu0 %v5605_v34 }
 0x431   : >> { %6549 = vmatpush3.msra.mxu1 %v5618_v43  ;;  %6533 = vmatprep.subr.mxu0 %v5604_v45 }
 0x432   : >> { %6550 = vmatprep.subr.mxu1 %v5617_v48  ;;  %6534 = vmatpush3.msra.mxu0 %v5604_v45 }
 0x433   : >> { %6535 = vmatprep.mubr.msk.f32.mxu0 %vm3519_vm6, %v5602_v53  ;;  %6551 = vmatpush3.msra.mxu1 %v5617_v48 }
 0x434   : >> { %6536 = vmatmul.mubr.msk.f32.vlgmr.msra.gmra.mxu0 %vm3519_vm6, %v5603_v49  ;;  %6552 = vmatprep.subr.mxu1 %v5616_v54 }
 0x435   : >> { %6557 = vmatprep.subr.mxu0 %v5635_v42  ;;  %6553 = vmatpush3.msra.mxu1 %v5616_v54 }
 0x436   : >> { %6554 = vmatprep.mubr.msk.f32.mxu1 %vm3519_vm6, %v5614_v56  ;;  %6558 = vmatpush3.msra.mxu0 %v5635_v42 }
 0x437   : >> { %6555 = vmatmul.mubr.msk.f32.vlgmr.msra.gmra.mxu1 %vm3519_vm6, %v5615_v61  ;;  %6559 = vmatprep.subr.mxu0 %v5634_v24 }
 0x438   : >> { %6576 = vmatprep.subr.mxu1 %v5647_v58  ;;  %6560 = vmatpush3.msra.mxu0 %v5634_v24 }
 0x439   : >> { %6577 = vmatpush3.msra.mxu1 %v5647_v58  ;;  %6561 = vmatprep.subr.mxu0 %v5633_v27 }
 0x43a   : >> { %6578 = vmatprep.subr.mxu1 %v5646_v4  ;;  %6562 = vmatpush3.msra.mxu0 %v5633_v27 }
 0x43b   : >> { %6579 = vmatpush3.msra.mxu1 %v5646_v4  ;;  %6563 = vmatprep.subr.mxu0 %v5632_v6 }
 0x43c   : >> { %6580 = vmatprep.subr.mxu1 %v5645_v44  ;;  %6564 = vmatpush3.msra.mxu0 %v5632_v6 }
 0x43d   : >> { %6581 = vmatpush3.msra.mxu1 %v5645_v44  ;;  %6565 = vmatprep.subr.mxu0 %v5631_v7 }
 0x43e   : >> { %6582 = vmatprep.subr.mxu1 %v5644_v57  ;;  %6566 = vmatpush3.msra.mxu0 %v5631_v7 }
 0x43f   : >> { %6583 = vmatpush3.msra.mxu1 %v5644_v57  ;;  %6567 = vmatprep.subr.mxu0 %v5630_v8  ;;  %v8229_v57 = vld [vmem:[#allocation11_spill] sm:$0xff] }
 0x440   : >> { %6584 = vmatprep.subr.mxu1 %v5643_v11  ;;  %6568 = vmatpush3.msra.mxu0 %v5630_v8  ;;  %v8230_v8 = vld [vmem:[#allocation13_spill] sm:$0xff] }
 0x441   : >> { %6585 = vmatpush3.msra.mxu1 %v5643_v11  ;;  %6569 = vmatprep.subr.mxu0 %v5629_v62 }
 0x442   : >> { %6586 = vmatprep.subr.mxu1 %v5642_v12  ;;  %6570 = vmatpush3.msra.mxu0 %v5629_v62 }
 0x443   : >> { %6587 = vmatpush3.msra.mxu1 %v5642_v12  ;;  %6571 = vmatprep.subr.mxu0 %v5628_v3 }
 0x444   : >> { %6588 = vmatprep.subr.mxu1 %v5641_v59  ;;  %6572 = vmatpush3.msra.mxu0 %v5628_v3 }
 0x445   : >> { %6573 = vmatprep.mubr.msk.f32.mxu0 %vm3519_vm6, %v5626_v15  ;;  %6589 = vmatpush3.msra.mxu1 %v5641_v59 }
 0x446   : >> { %6574 = vmatmul.mubr.msk.f32.vlgmr.msra.gmra.mxu0 %vm3519_vm6, %v5627_v0  ;;  %6590 = vmatprep.subr.mxu1 %v5640_v22 }
 0x447   : >> { %6595 = vmatprep.subr.mxu0 %v5659_v25  ;;  %6591 = vmatpush3.msra.mxu1 %v5640_v22 }
 0x448   : >> { %6592 = vmatprep.mubr.msk.f32.mxu1 %vm3519_vm6, %v5638_v18  ;;  %6596 = vmatpush3.msra.mxu0 %v5659_v25 }
 0x449   : >> { %6593 = vmatmul.mubr.msk.f32.vlgmr.msra.gmra.mxu1 %vm3519_vm6, %v5639_v28  ;;  %6597 = vmatprep.subr.mxu0 %v5658_v29 }
 0x44a   : >> { %6611 = vmatprep.mubr.msk.f32.mxu0 %vm3519_vm6, %v5650_v30  ;;  %6598 = vmatpush3.msra.mxu0 %v5658_v29  ;;  %v8231_v29 = vmov (%p3490_p13), 0.0   ;;  %v4677_v30 = vld [vmem:[%s8172_s7 + $0x38] sm:$0xff] (%p3490_p13) }
 0x44b   : >> { %6599 = vmatprep.subr.mxu0 %v5657_v9  ;;  %6614 = vmatprep.subr.mxu1 %v6913_v38 }
 0x44c   : >> { %6600 = vmatpush3.msra.mxu0 %v5657_v9  ;;  %6618 = vmatprep.mubr.msk.f32.mxu1 %vm6914_vm7, %v6913_v38  ;;  %v4676_v9 = vld [vmem:[%s8172_s7 + $0x30] sm:$0xff] (%p3490_p13) }
 0x44d   : >> { %6601 = vmatprep.subr.mxu0 %v5656_v5 }
 0x44e   : >> { %6602 = vmatpush3.msra.mxu0 %v5656_v5  ;;  %v5688_v5 = vld [vmem:[%s8172_s7 + $0xb0] sm:$0xff] (%p3490_p13) }
 0x44f   : >> { %6603 = vmatprep.subr.mxu0 %v5655_v31 }
 0x450   : >> { %6604 = vmatpush3.msra.mxu0 %v5655_v31  ;;  %v5687_v31 = vld [vmem:[%s8172_s7 + $0xa8] sm:$0xff] (%p3490_p13) }
 0x451   : >> { %6605 = vmatprep.subr.mxu0 %v5654_v32 }
 0x452   : >> { %6606 = vmatpush3.msra.mxu0 %v5654_v32  ;;  %v4673_v32 = vld [vmem:[%s8172_s7 + $0x18] sm:$0xff] (%p3490_p13) }
 0x453   : >> { %6607 = vmatprep.subr.mxu0 %v5653_v60 }
 0x454   : >> { %6608 = vmatpush3.msra.mxu0 %v5653_v60  ;;  %v5686_v60 = vld [vmem:[%s8172_s7 + $0xa0] sm:$0xff] (%p3490_p13) }
 0x455   : >> { %6609 = vmatprep.subr.mxu0 %v5652_v17 }
 0x456   : >> { %6610 = vmatpush3.msra.mxu0 %v5652_v17  ;;  %v4672_v17 = vld [vmem:[%s8172_s7 + $0x10] sm:$0xff] (%p3490_p13) }
 0x457   : >> { %6612 = vmatmul.mubr.msk.f32.vlgmr.msra.gmra.mxu0 %vm3519_vm6, %v5651_v36  ;;  %6680 = vmatprep.subr.mxu0 (%p3490_p13), %v8231_v29  ;;  %v5685_v36 = vld [vmem:[%s8172_s7 + $0x98] sm:$0xff] (%p3490_p13) }
 0x458   : > { %6696 = vmatprep.mubr.msk.f32.mxu0 (%p3490_p13), %vm6915_vm11, %v8231_v29 }
 0x4d1   : >> { %v6461_v51 = vpop.f32.mrf.mxu0 }
 0x4d2   : >> { %v6480_v26 = vpop.f32.mrf.mxu1 }
 0x4d3   : >> { %v3592_v13 = vpop.f32.mrf.mxu0  ;;  %v3679_v14 = vadd.f32 %v6480_v26, %v6461_v51  ;;  %v5684_v51 = vld [vmem:[%s8172_s7 + $0x90] sm:$0xff] (%p3490_p13)  ;;  %v4670_v26 = vld [vmem:[%s8172_s7] sm:$0xff] (%p3490_p13) }
 0x4d4   : >> { %v3673_v40 = vpop.f32.mrf.mxu1 }
 0x4d5   : >> { %v3674_v33 = vadd.f32 %v3673_v40, %v3592_v13  ;;  %v5683_v40 = vld [vmem:[%s8172_s7 + $0x88] sm:$0xff] (%p3490_p13) }
 0x4e2   : >> { %v6499_v37 = vpop.f32.mrf.mxu0 }
 0x4e3   : >> { %v3777_v41 = vadd.f32 %v6499_v37, %v3679_v14  ;;  %v5680_v37 = vld [vmem:[%s8172_s7 + $0x78] sm:$0xff] (%p3490_p13)  ;;  %v5679_v14 = vld [vmem:[%s8172_s7 + $0x70] sm:$0xff] (%p3490_p13) }
 0x4e4   : >> { %v3767_v10 = vpop.f32.mrf.mxu0 }
 0x4e5   : >> { %v6518_v19 = vpop.f32.mrf.mxu1  ;;  %v3776_v52 = vadd.f32 %v3767_v10, %v3674_v33  ;;  %v5682_v10 = vld [vmem:[%s8172_s7 + $0x80] sm:$0xff] (%p3490_p13) }
 0x4e6   : >> { %v3873_v23 = vadd.f32 %v6518_v19, %v3777_v41  ;;  %v5678_v19 = vld [vmem:[%s8172_s7 + $0x68] sm:$0xff] (%p3490_p13)  ;;  %v5677_v41 = vld [vmem:[%s8172_s7 + $0x60] sm:$0xff] (%p3490_p13) }
 0x4e7   : >> { %v3863_v21 = vpop.f32.mrf.mxu1 }
 0x4e8   : >> { %v3872_v39 = vadd.f32 %v3863_v21, %v3776_v52  ;;  %v5675_v52 = vld [vmem:[%s8172_s7 + $0x50] sm:$0xff] (%p3490_p13)  ;;  %v5674_v21 = vld [vmem:[%s8172_s7 + $0x48] sm:$0xff] (%p3490_p13) }
 0x4f4   : >> { %v6537_v47 = vpop.f32.mrf.mxu0 }
 0x4f5   : >> { %v3969_v1 = vadd.f32 %v6537_v47, %v3873_v23  ;;  %v5676_v47 = vld [vmem:[%s8172_s7 + $0x58] sm:$0xff] (%p3490_p13)  ;;  %v5673_v23 = vld [vmem:[%s8172_s7 + $0x40] sm:$0xff] (%p3490_p13) }
 0x4f6   : >> { %v3959_v50 = vpop.f32.mrf.mxu0 }
 0x4f7   : >> { %v6556_v20 = vpop.f32.mrf.mxu1  ;;  %v3968_v35 = vadd.f32 %v3959_v50, %v3872_v39  ;;  %v5697_v39 = vld [vmem:[%s8172_s7 + $0xf0] sm:$0xff] (%p3490_p13) }
 0x4f8   : >> { %v4065_v34 = vadd.f32 %v6556_v20, %v3969_v1  ;;  %v5698_v20 = vld [vmem:[%s8172_s7 + $0xf8] sm:$0xff] (%p3490_p13)  ;;  %v5696_v1 = vld [vmem:[%s8172_s7 + $0xe8] sm:$0xff] (%p3490_p13) }
 0x4f9   : >> { %v4055_v16 = vpop.f32.mrf.mxu1 }
 0x4fa   : >> { %v4064_v48 = vadd.f32 %v4055_v16, %v3968_v35  ;;  %v5694_v35 = vld [vmem:[%s8172_s7 + $0xd8] sm:$0xff] (%p3490_p13)  ;;  %v5693_v16 = vld [vmem:[%s8172_s7 + $0xd0] sm:$0xff] (%p3490_p13) }
 0x506   : >> { %v6575_v46 = vpop.f32.mrf.mxu0 }
 0x507   : >> { %v4161_v53 = vadd.f32 %v6575_v46, %v4065_v34  ;;  %v5695_v46 = vld [vmem:[%s8172_s7 + $0xe0] sm:$0xff] (%p3490_p13)  ;;  %v5692_v34 = vld [vmem:[%s8172_s7 + $0xc8] sm:$0xff] (%p3490_p13) }
 0x508   : >> { %v4151_v43 = vpop.f32.mrf.mxu0 }
 0x509   : >> { %v6594_v45 = vpop.f32.mrf.mxu1  ;;  %v4160_v49 = vadd.f32 %v4151_v43, %v4064_v48  ;;  %v5691_v43 = vld [vmem:[%s8172_s7 + $0xc0] sm:$0xff] (%p3490_p13)  ;;  %v5021_v48 = vld [vmem:[%s8174_s9 + $0x78] sm:$0xff] (%p3490_p13) }
 0x50a   : >> { %v4257_v42 = vadd.f32 %v6594_v45, %v4161_v53  ;;  %v5020_v53 = vld [vmem:[%s8174_s9 + $0x70] sm:$0xff] (%p3490_p13) }
 0x50b   : >> { %v4247_v54 = vpop.f32.mrf.mxu1 }
 0x50c   : >> { %v4256_v61 = vadd.f32 %v4247_v54, %v4160_v49  ;;  %v5019_v49 = vld [vmem:[%s8174_s9 + $0x68] sm:$0xff] (%p3490_p13)  ;;  %v5018_v54 = vld [vmem:[%s8174_s9 + $0x60] sm:$0xff] (%p3490_p13) }
 0x517   : >> { %v6613_v56 = vpop.f32.mrf.mxu0 }
 0x518   : >> { %v4353_v24 = vadd.f32 %v6613_v56, %v4257_v42  ;;  %v5017_v42 = vld [vmem:[%s8174_s9 + $0x58] sm:$0xff] (%p3490_p13)  ;;  %v5016_v56 = vld [vmem:[%s8174_s9 + $0x50] sm:$0xff] (%p3490_p13) }
 0x519   : >> { %v4343_v58 = vpop.f32.mrf.mxu0 }
 0x51a   : >> { %v4361_v27 = vadd.f32 %v7618_v55, %v4353_v24  ;;  %v4352_v4 = vadd.f32 %v4343_v58, %v4256_v61  ;;  %v5015_v61 = vld [vmem:[%s8174_s9 + $0x48] sm:$0xff] (%p3490_p13)  ;;  %v5014_v24 = vld [vmem:[%s8174_s9 + $0x40] sm:$0xff] (%p3490_p13)  ;;  %v5013_v58 = vld [vmem:[%s8174_s9 + $0x38] sm:$0xff] (%p3490_p13) }
 0x51c   : >> { %v4363_v6 = vmax.f32 %v4361_v27, 0.0  ;;  %v4360_v44 = vadd.f32 %v7618_v55, %v4352_v4  ;;  %v4675_v55 = vld [vmem:[%s8172_s7 + $0x28] sm:$0xff] (%p3490_p13)  ;;  %v5012_v27 = vld [vmem:[%s8174_s9 + $0x30] sm:$0xff] (%p3490_p13) }
 0x51d   : > { %v5011_v4 = vld [vmem:[%s8174_s9 + $0x28] sm:$0xff] (%p3490_p13) }
 0x51e   : >> { %v4362_v7 = vmax.f32 %v4360_v44, 0.0  ;;  %6615 = vmatpush3.msk.msra.mxu1 %vm4368_vm8, %v4363_v6  ;;  %v5009_v44 = vld [vmem:[%s8174_s9 + $0x18] sm:$0xff] (%p3490_p13) }
 0x51f   : >> { %6616 = vmatprep.subr.mxu1 %v6913_v38 }
 0x520   : >> { %6617 = vmatpush3.msra.mxu1 %v4362_v7 }
 0x521   : >> { %6619 = vmatmul.mubr.msk.f32.vlgmr.msra.gmra.mxu1 %vm4364_vm9, %v8229_v57  ;;  %6621 = vmatprep.subr.mxu1 %v6913_v38  ;;  %v5007_v57 = vld [vmem:[%s8174_s9 + $0x8] sm:$0xff] (%p3490_p13) }
 0x522   : >> { %6622 = vmatpush3.msk.msra.mxu1 %vm4368_vm8, %v4363_v6  ;;  %6625 = vmatprep.mubr.msk.f32.mxu1 %vm6914_vm7, %v6913_v38 }
 0x523   : >> { %6623 = vmatprep.subr.mxu1 %v6913_v38 }
 0x524   : >> { %6624 = vmatpush3.msra.mxu1 %v4362_v7 }
 0x525   : >> { %6626 = vmatmul.mubr.msk.f32.vlgmr.msra.gmra.mxu1 %vm4364_vm9, %v8230_v8  ;;  %6628 = vmatprep.subr.mxu1 %v6913_v38  ;;  %v5006_v8 = vld [vmem:[%s8174_s9] sm:$0xff] (%p3490_p13) }
 0x526   : >> { %6629 = vmatpush3.msk.msra.mxu1 %vm4368_vm8, %v4363_v6  ;;  %6632 = vmatprep.mubr.msk.f32.mxu1 %vm6914_vm7, %v6913_v38 }
 0x527   : >> { %6630 = vmatprep.subr.mxu1 %v6913_v38 }
 0x528   : >> { %6631 = vmatpush3.msra.mxu1 %v4362_v7 }
 0x529   : >> { %6633 = vmatmul.mubr.msk.f32.vlgmr.msra.gmra.mxu1 %vm4364_vm9, %v7622_v63  ;;  %6635 = vmatprep.subr.mxu1 %v6913_v38  ;;  %v5689_v63 = vld [vmem:[%s8172_s7 + $0xb8] sm:$0xff] (%p3490_p13) }
 0x52a   : >> { %6636 = vmatpush3.msk.msra.mxu1 %vm4368_vm8, %v4363_v6  ;;  %6639 = vmatprep.mubr.msk.f32.mxu1 %vm6914_vm7, %v6913_v38  ;;  %v5010_v6 = vld [vmem:[%s8174_s9 + $0x20] sm:$0xff] (%p3490_p13) }
 0x52b   : >> { %6637 = vmatprep.subr.mxu1 %v6913_v38  ;;  %6681 = vmatpush3.msra.mxu0 (%p3490_p13), %v5689_v63  ;;  %v4671_v38 = vld [vmem:[%s8172_s7 + $0x8] sm:$0xff] (%p3490_p13) }
 0x52c   : >> { %6638 = vmatpush3.msra.mxu1 %v4362_v7  ;;  %6682 = vmatprep.subr.mxu0 (%p3490_p13), %v8231_v29  ;;  %v5008_v7 = vld [vmem:[%s8174_s9 + $0x10] sm:$0xff] (%p3490_p13) }
 0x52d   : >> { %6640 = vmatmul.mubr.msk.f32.vlgmr.msra.gmra.mxu1 %vm4364_vm9, %v7626_v2  ;;  %6642 = vmatprep.subr.mxu1 (%p3490_p13), %v8231_v29  ;;  %v4674_v2 = vld [vmem:[%s8172_s7 + $0x20] sm:$0xff] (%p3490_p13) }
 0x52e   : > { %6643 = vmatpush3.msra.mxu1 (%p3490_p13), %v4677_v30  ;;  %6658 = vmatprep.mubr.msk.f32.mxu1 (%p3490_p13), %vm6915_vm11, %v8231_v29 }
 0x52f   : > { %6644 = vmatprep.subr.mxu1 (%p3490_p13), %v8231_v29  ;;  %6683 = vmatpush3.msra.mxu0 (%p3490_p13), %v5688_v5 }
 0x530   : > { %6645 = vmatpush3.msra.mxu1 (%p3490_p13), %v4676_v9  ;;  %6684 = vmatprep.subr.mxu0 (%p3490_p13), %v8231_v29 }
 0x531   : > { %6646 = vmatprep.subr.mxu1 (%p3490_p13), %v8231_v29  ;;  %6685 = vmatpush3.msra.mxu0 (%p3490_p13), %v5687_v31 }
 0x532   : > { %6647 = vmatpush3.msra.mxu1 (%p3490_p13), %v4675_v55  ;;  %6686 = vmatprep.subr.mxu0 (%p3490_p13), %v8231_v29  ;;  %v5022_v55 = vld [vmem:[%s8175_s10] sm:$0x1] (%p3490_p13) }
 0x533   : > { %6648 = vmatprep.subr.mxu1 (%p3490_p13), %v8231_v29  ;;  %6687 = vmatpush3.msra.mxu0 (%p3490_p13), %v5686_v60 }
 0x534   : > { %6649 = vmatpush3.msra.mxu1 (%p3490_p13), %v4674_v2  ;;  %6688 = vmatprep.subr.mxu0 (%p3490_p13), %v8231_v29 }
 0x535   : > { %6650 = vmatprep.subr.mxu1 (%p3490_p13), %v8231_v29  ;;  %6689 = vmatpush3.msra.mxu0 (%p3490_p13), %v5685_v36 }
 0x536   : > { %6651 = vmatpush3.msra.mxu1 (%p3490_p13), %v4673_v32  ;;  %6690 = vmatprep.subr.mxu0 (%p3490_p13), %v8231_v29 }
 0x537   : > { %6652 = vmatprep.subr.mxu1 (%p3490_p13), %v8231_v29  ;;  %6691 = vmatpush3.msra.mxu0 (%p3490_p13), %v5684_v51 }
 0x538   : > { %6653 = vmatpush3.msra.mxu1 (%p3490_p13), %v4672_v17  ;;  %6692 = vmatprep.subr.mxu0 (%p3490_p13), %v8231_v29 }
 0x539   : > { %6654 = vmatprep.subr.mxu1 (%p3490_p13), %v8231_v29  ;;  %6693 = vmatpush3.msra.mxu0 (%p3490_p13), %v5683_v40 }
 0x53a   : > { %6655 = vmatpush3.msra.mxu1 (%p3490_p13), %v4671_v38  ;;  %6694 = vmatprep.subr.mxu0 (%p3490_p13), %v8231_v29 }
 0x53b   : > { %6656 = vmatprep.subr.mxu1 (%p3490_p13), %v8231_v29  ;;  %6695 = vmatpush3.msra.mxu0 (%p3490_p13), %v5682_v10 }
 0x53c   : > { %6657 = vmatpush3.msra.mxu1 (%p3490_p13), %v4670_v26  ;;  %6718 = vmatprep.subr.mxu0 (%p3490_p13), %v8231_v29 }
 0x53d   : > { %6661 = vmatprep.subr.mxu1 (%p3490_p13), %v8231_v29 }
 0x5e1   : >> { %v4438_v11 = vpop.f32.mrf.mxu1 }
 0x5e3   : >> { %v6620_v62 = vpop.f32.mrf.mxu1 }
 0x5e5   : >> { %v4511_v12 = vpop.f32.mrf.mxu1 }
 0x5e6   : >> { %v4515_v22 = vmax.f32 %v4438_v11, %v4511_v12 }
 0x5e7   : >> { %v6627_v3 = vpop.f32.mrf.mxu1 }
 0x5e9   : >> { %v4585_v59 = vpop.f32.mrf.mxu1 }
 0x5eb   : >> { %v6634_v15 = vpop.f32.mrf.mxu1 }
 0x5ed   : >> { %v4658_v0 = vpop.f32.mrf.mxu1 }
 0x5ee   : >> { %v4662_v25 = vmax.f32 %v4585_v59, %v4658_v0  ;;  %3492 = sbr.rel (!%p3490_p13) target bundleno = 1023 (0x3ff), region = 199  ;;  %v4668_v0 = vld [vmem:[%s8173_s8] sm:$0x1] (%p3490_p13) }
 0x5ef   : >> { %v6641_v18 = vpop.f32.mrf.mxu1 }
 0x5f0   : >> { %v4663_v28 = vmax.f32 %v4515_v22, %v4662_v25 }
 0x5f2   : >> { %4667 = vst.msk [vmem:[%s4665_s13] sm:$0x3] %vm4666_vm10, %v4663_v28  ;;  %s6830_s13 = scalar_lea.vmem (%p3490_p13), %s6829_s1, 32 }
 0x5f3   : > { %p6832_p4 = scmp.lt.s32.totalorder %s6830_s13, %s6824_s22 }
 0x5f5   : > { %p6833_p7 = por %p6832_p4, %p6831_p3 }
 0x5f7   : > { %p6834_p8 = pnand %p6833_p7, %p6827_p2 }
 0x5f9   : > { %v4669_v13 = vld [vmem:[#allocation4] sm:$0x1]  ;;  %v4837_v33 = vld [vmem:[#allocation4 + $0x2] sm:$0x1]  ;;  %v4753_v50 = vld [vmem:[#allocation4 + $0x1] sm:$0x1] }
 0x5fa   : > { %6659 = vmatmul.mubr.msk.f32.vlgmr.msra.gmra.mxu1 %vm3519_vm6, %v4669_v13  ;;  %6697 = vmatmul.mubr.msk.f32.vlgmr.msra.gmra.mxu0 %vm3519_vm6, %v4837_v33  ;;  %v4921_v45 = vld [vmem:[#allocation4 + $0x3] sm:$0x1] }
 0x5fb   : > { %6662 = vmatpush3.msra.mxu1 %v5680_v37  ;;  %6677 = vmatprep.mubr.msk.f32.mxu1 %vm6915_vm11, %v8231_v29 }
 0x5fc   : > { %6663 = vmatprep.subr.mxu1 %v8231_v29  ;;  %6750 = vmatprep.mubr.msk.f32.mxu0 %vm6915_vm11, %v8231_v29 }
 0x5fd   : > { %6664 = vmatpush3.msra.mxu1 %v5679_v14  ;;  %6719 = vmatpush3.msra.mxu0 %v5021_v48 }
 0x5fe   : > { %6665 = vmatprep.subr.mxu1 %v8231_v29  ;;  %6720 = vmatprep.subr.mxu0 %v8231_v29 }
 0x5ff   : > { %6666 = vmatpush3.msra.mxu1 %v5678_v19  ;;  %6721 = vmatpush3.msra.mxu0 %v5020_v53 }
 0x600   : > { %6667 = vmatprep.subr.mxu1 %v8231_v29  ;;  %6722 = vmatprep.subr.mxu0 %v8231_v29 }
 0x601   : > { %6668 = vmatpush3.msra.mxu1 %v5677_v41  ;;  %6723 = vmatpush3.msra.mxu0 %v5019_v49 }
 0x602   : > { %6669 = vmatprep.subr.mxu1 %v8231_v29  ;;  %6724 = vmatprep.subr.mxu0 %v8231_v29 }
 0x603   : > { %6670 = vmatpush3.msra.mxu1 %v5676_v47  ;;  %6725 = vmatpush3.msra.mxu0 %v5018_v54 }
 0x604   : > { %6671 = vmatprep.subr.mxu1 %v8231_v29  ;;  %6726 = vmatprep.subr.mxu0 %v8231_v29 }
 0x605   : > { %6672 = vmatpush3.msra.mxu1 %v5675_v52  ;;  %6727 = vmatpush3.msra.mxu0 %v5017_v42 }
 0x606   : > { %6673 = vmatprep.subr.mxu1 %v8231_v29  ;;  %6728 = vmatprep.subr.mxu0 %v8231_v29 }
 0x607   : > { %6674 = vmatpush3.msra.mxu1 %v5674_v21  ;;  %6729 = vmatpush3.msra.mxu0 %v5016_v56 }
 0x608   : > { %6675 = vmatprep.subr.mxu1 %v8231_v29  ;;  %6730 = vmatprep.subr.mxu0 %v8231_v29 }
 0x609   : > { %6676 = vmatpush3.msra.mxu1 %v5673_v23  ;;  %6731 = vmatpush3.msra.mxu0 %v5015_v61 }
 0x60a   : > { %6678 = vmatmul.mubr.msk.f32.vlgmr.msra.gmra.mxu1 %vm3519_vm6, %v4753_v50  ;;  %6699 = vmatprep.subr.mxu1 %v8231_v29 }
 0x60b   : > { %6700 = vmatpush3.msra.mxu1 %v5698_v20  ;;  %6715 = vmatprep.mubr.msk.f32.mxu1 %vm6915_vm11, %v8231_v29 }
 0x60c   : > { %6701 = vmatprep.subr.mxu1 %v8231_v29  ;;  %6732 = vmatprep.subr.mxu0 %v8231_v29 }
 0x60d   : > { %6702 = vmatpush3.msra.mxu1 %v5697_v39  ;;  %6733 = vmatpush3.msra.mxu0 %v5014_v24 }
 0x60e   : > { %6703 = vmatprep.subr.mxu1 %v8231_v29  ;;  %6734 = vmatprep.subr.mxu0 %v8231_v29 }
 0x60f   : > { %6704 = vmatpush3.msra.mxu1 %v5696_v1  ;;  %6735 = vmatpush3.msra.mxu0 %v5013_v58 }
 0x610   : > { %6705 = vmatprep.subr.mxu1 %v8231_v29  ;;  %6736 = vmatprep.subr.mxu0 %v8231_v29 }
 0x611   : > { %6706 = vmatpush3.msra.mxu1 %v5695_v46  ;;  %6737 = vmatpush3.msra.mxu0 %v5012_v27 }
 0x612   : > { %6707 = vmatprep.subr.mxu1 %v8231_v29  ;;  %6738 = vmatprep.subr.mxu0 %v8231_v29 }
 0x613   : > { %6708 = vmatpush3.msra.mxu1 %v5694_v35  ;;  %6739 = vmatpush3.msra.mxu0 %v5011_v4 }
 0x614   : > { %6709 = vmatprep.subr.mxu1 %v8231_v29  ;;  %6740 = vmatprep.subr.mxu0 %v8231_v29 }
 0x615   : > { %6710 = vmatpush3.msra.mxu1 %v5693_v16  ;;  %6741 = vmatpush3.msra.mxu0 %v5010_v6 }
 0x616   : > { %6711 = vmatprep.subr.mxu1 %v8231_v29  ;;  %6742 = vmatprep.subr.mxu0 %v8231_v29 }
 0x617   : > { %6712 = vmatpush3.msra.mxu1 %v5692_v34  ;;  %6743 = vmatpush3.msra.mxu0 %v5009_v44 }
 0x618   : > { %6713 = vmatprep.subr.mxu1 %v8231_v29  ;;  %6744 = vmatprep.subr.mxu0 %v8231_v29 }
 0x619   : > { %6714 = vmatpush3.msra.mxu1 %v5691_v43  ;;  %6745 = vmatpush3.msra.mxu0 %v5008_v7 }
 0x61a   : > { %6716 = vmatmul.mubr.msk.f32.vlgmr.msra.gmra.mxu1 %vm3519_vm6, %v4921_v45  ;;  %6746 = vmatprep.subr.mxu0 %v8231_v29 }
 0x61b   : > { %6747 = vmatpush3.msra.mxu0 %v5007_v57 }
 0x61c   : > { %6748 = vmatprep.subr.mxu0 %v8231_v29 }
 0x61d   : > { %6749 = vmatpush3.msra.mxu0 %v5006_v8 }
 0x6ba   : > { %v4748_v11 = vpop.f32.mrf.mxu1  ;;  %v4916_v12 = vpop.f32.mrf.mxu0 }
 0x6bb   : > { %v4752_v22 = vadd.f32 %v4748_v11, %v4668_v0 }
 0x6bc   : > { %v6660_v62 = vpop.f32.mrf.mxu1  ;;  %v6698_v3 = vpop.f32.mrf.mxu0 }
 0x6ca   : > { %v4832_v59 = vpop.f32.mrf.mxu1 }
 0x6cb   : > { %v4836_v25 = vadd.f32 %v4832_v59, %v4752_v22 }
 0x6cc   : > { %v6679_v15 = vpop.f32.mrf.mxu1 }
 0x6cd   : > { %v4920_v18 = vadd.f32 %v4916_v12, %v4836_v25 }
 0x6da   : > { %v5000_v28 = vpop.f32.mrf.mxu1 }
 0x6db   : > { %v5004_v29 = vadd.f32 %v5000_v28, %v4920_v18 }
 0x6dc   : > { %v6717_v30 = vpop.f32.mrf.mxu1 }
 0x6dd   : > { %v5005_v9 = vmax.f32 %v5004_v29, 0.0 }
 0x6df   : > { %6751 = vmatmul.mubr.f32.vlgmr.msra.gmra.mxu0 %v5005_v9 }
 0x79f   : > { %v5089_v63 = vpop.f32.mrf.mxu0 }
 0x7a0   : > { %v5090_v2 = vadd.f32 %v5089_v63, %v5022_v55 }
 0x7a1   : > { %v6752_v5 = vpop.f32.mrf.mxu0 }
 0x7a2   : > { %5094 = vst.msk [vmem:[%s7078_s24] sm:$0x1] %vm5093_vm12, %v5090_v2 }
 0x7a3   : > { %6837 = shalt.err (!%p6834_p8)
}
 0x7a4   : > { %s6838_s24 = scalar_lea.hbm %s8127_s30, 16  ;;  %s6842_s16 = scalar_lea.hbm %s8176_s11, 32 }
 0x7a5   : > { %p6839_p9 = scmp.ne.s32.totalorder %s8127_s30, %s6838_s24  ;;  %p6843_p12 = scmp.lt.s32.totalorder %s8127_s30, %s8176_s11 }
 0x7a6   : > { %p6844_p13 = scmp.lt.s32.totalorder %s6842_s16, %s6838_s24 }
 0x7a7   : > { %p6840_p10 = pnand %p6839_p9, %p7015_p5 }
 0x7a8   : > { %p6845_p0 = por %p6844_p13, %p6843_p12 }
 0x7a9   : > { %p6841_p11 = pneg %p6840_p10 }
 0x7ab   : > { %p6846_p1 = pnand %p6845_p0, %p6841_p11 }
 0x7ad   : > { %6849 = shalt.err (!%p6846_p1)
}
 0x7ae   : > { %6755 = dma.vmem_to_hbm [thread:$0]  (%p7015_p5), %s5109_s29, 16, %s8127_s30, %s5096_s12  }
 0x7af PF: > { %p6761_p2 = scmp.ge.s32.totalorder %s6896_s20, 2  ;;  %s5120_s22 = sand.u32 1, %s6884_s17  }
 0x7b0   : > { %s5121_s21 = scalar_lea.sflag [#allocation6], %s5120_s22 }
 0x7b1   : > { %p6758_p3 = pnand %p6761_p2, %p7019_p6 }
 0x7b3   : > { %p6759_p4 = pneg %p6758_p3 }
 0x7b5   : > { %6879 = dma.done.wait (%p6759_p4), %s5121_s21, 16  }
 0x7b6   : > { %6881 = vsyncadd (%p6759_p4), %s5121_s21, 4294967280  ;;  %p21_p7 = scmp.ge.s32.totalorder %s7002_s23, 4   ;;  %s8233_s17 = smov %s6888_s18 }
 0x7b7   : > { %s8234_s18 = smov %s6892_s19  ;;  %s8235_s19 = smov %s7013_s26 }
 0x7b8   : > { %s8236_s20 = smov %s7002_s23  ;;  %23 = sbr.rel (!%p21_p7) target bundleno = 6 (0x6), region = 210 }
 0x7bd   :  { %5125 = vsyncpa [#allocation6], 1 }
 0x7be   :  { %5127 = vsyncpa [#allocation6 + $0x1], 1 }

</bundles_post_ra>
